<compile_context>
chip_gen: v5e
topology: v5e:2x2
jax: 0.10.0
libtpu: 0.0.40
codegen_flags: <defaults>
</compile_context>

<pallas_src>
import functools

import numpy as np
import jax
import jax.numpy as jnp
from jax.experimental import pallas as pl
from jax.experimental.pallas import tpu as pltpu

F32 = jnp.float32
BF16 = jnp.bfloat16


# --------------------------------------------------------------------------- #
# Host-side constants (baked at trace time; no in-kernel iota / integer div).
# --------------------------------------------------------------------------- #
def _attn_bias(n_seq, L):
    """(n_seq*L, n_seq*L) additive bias: 0 within a sequence, -1e30 across
    sequences.  All folded streams share one dense block-diagonal attention,
    so the kernel never needs per-sequence reshapes or per-head einsum loops."""
    n = n_seq * L
    r = np.arange(n)[:, None] // L
    c = np.arange(n)[None, :] // L
    return jnp.asarray(np.where(r == c, 0.0, -1e30).astype(np.float32))


def _pool_mask(L, E, f):
    """(L, E) 0/1 mask at MaxPool2d window-start positions (filter == stride)."""
    m = np.zeros((L, E), np.float32)
    m[::f, ::f] = 1.0
    return jnp.asarray(m)


# --------------------------------------------------------------------------- #
# Shared in-kernel body: n_layers encoder layers + full-resolution f x f window
# max (the stride-f downsample is folded into the phase heads, not done here).
# --------------------------------------------------------------------------- #
def _encoder_windowed_max(x_ref, bias_ref, enc_refs, *, n_head, n_layers, f):
    (wqkv_ref, bqkv_ref, wo_ref, bo_ref, g1_ref, be1_ref,
     w1_ref, b1_ref, w2_ref, b2_ref, g2_ref, be2_ref) = enc_refs

    SBL, E = x_ref.shape
    hd = E // n_head
    scale = 1.0 / float(hd) ** 0.5

    bias = bias_ref[...]                      # (SBL, SBL) block-diagonal 0 / -1e30
    x2 = x_ref[...]                           # residual stream stays f32

    def ln(t, g, b):
        mu = jnp.mean(t, axis=-1, keepdims=True)
        var = jnp.mean((t - mu) ** 2, axis=-1, keepdims=True)
        return (t - mu) * jax.lax.rsqrt(var + 1e-5) * g + b

    for l in range(n_layers):                 # static unroll (n_layers is tiny)
        # --- fused QKV projection: one (SBL, E) @ (E, 3E) dot, bf16 x bf16 -> f32 ---
        qkv = jnp.dot(x2.astype(BF16), wqkv_ref[l],
                      preferred_element_type=F32) + bqkv_ref[l]        # (SBL, 3E)
        # single transpose of all K heads per layer (instead of per-head .T)
        kT = qkv[:, E:2 * E].T                                          # (E, SBL) f32

        heads = []
        for h in range(n_head):               # small static head loop, 2 dots each
            q = qkv[:, h * hd:(h + 1) * hd].astype(BF16)                # (SBL, hd)
            kTh = kT[h * hd:(h + 1) * hd, :].astype(BF16)               # (hd, SBL)
            v = qkv[:, 2 * E + h * hd:2 * E + (h + 1) * hd].astype(BF16)
            s = jnp.dot(q, kTh, preferred_element_type=F32) * scale + bias
            s = s - jnp.max(s, axis=-1, keepdims=True)
            p = jnp.exp(s)
            p = p * pl.reciprocal(jnp.sum(p, axis=-1, keepdims=True), approx=True)
            heads.append(jnp.dot(p.astype(BF16), v, preferred_element_type=F32))

        attn = jnp.concatenate(heads, axis=-1)                          # (SBL, E)
        attn = jnp.dot(attn.astype(BF16), wo_ref[l],
                       preferred_element_type=F32) + bo_ref[l]

        y = ln(x2 + attn, g1_ref[l], be1_ref[l])
        h1 = jnp.maximum(jnp.dot(y.astype(BF16), w1_ref[l],
                                 preferred_element_type=F32) + b1_ref[l], 0.0)
        ff = jnp.dot(h1.astype(BF16), w2_ref[l],
                     preferred_element_type=F32) + b2_ref[l]
        x2 = ln(y + ff, g2_ref[l], be2_ref[l])

    # --- MaxPool2d(f, f) window max at full resolution (no compaction here).
    #     Shifted-concat maxes; wraparound positions are never selected because
    #     filter_size == stride and L, E are divisible by f. ---
    wl = x2
    for dj in range(1, f):
        wl = jnp.maximum(wl, jnp.concatenate([x2[:, dj:], x2[:, :dj]], axis=1))
    w = wl
    for di in range(1, f):
        w = jnp.maximum(w, jnp.concatenate([wl[di:, :], wl[:di, :]], axis=0))
    return w                                                            # (SBL, E)


# --------------------------------------------------------------------------- #
# Phase-1 kernel: encoder + pool + cosine-similarity head (modes simple/cat/mul).
# Downsample is a 0/1 mask (VPU), so no selection matmuls / strided gathers.
# --------------------------------------------------------------------------- #
def phase1_kernel(x_ref, bias_ref, mask_ref,
                  wqkv_ref, bqkv_ref, wo_ref, bo_ref, g1_ref, be1_ref,
                  w1_ref, b1_ref, w2_ref, b2_ref, g2_ref, be2_ref,
                  o_ref, *, n_head, n_layers, f, n_batch, seq_len, mode):
    enc_refs = (wqkv_ref, bqkv_ref, wo_ref, bo_ref, g1_ref, be1_ref,
                w1_ref, b1_ref, w2_ref, b2_ref, g2_ref, be2_ref)
    w = _encoder_windowed_max(x_ref, bias_ref, enc_refs,
                              n_head=n_head, n_layers=n_layers, f=f)

    B, L = n_batch, seq_len
    mask = mask_ref[...]                       # (L, E) 0/1 window-start mask
    eps = 1e-8

    def slab(stream, b):                       # masked (L, E) pooled-window slab
        r0 = (stream * B + b) * L
        return w[r0:r0 + L, :] * mask

    def sum2(t):                               # (L, E) -> (1, 1), two 1-axis reduces
        return jnp.sum(jnp.sum(t, axis=1, keepdims=True), axis=0, keepdims=True)

    outs = []
    for b in range(B):
        c = slab(0, b)
        t = slab(1, b)
        if mode == 'simple':
            dot = sum2(c * t)
            na = jnp.sqrt(sum2(c * c))
            nb = jnp.sqrt(sum2(t * t))
        elif mode == 'cat':
            d = slab(2, b)
            dot = sum2(c * t) + sum2(d * t)
            na = jnp.sqrt(sum2(c * c) + sum2(d * d))
            nb = jnp.sqrt(2.0 * sum2(t * t))
        elif mode == 'mul':
            d = slab(2, b)
            a2 = c * d
            b2 = t * t
            dot = sum2(a2 * b2)
            na = jnp.sqrt(sum2(a2 * a2))
            nb = jnp.sqrt(sum2(b2 * b2))
        else:
            raise ValueError(mode)
        # torch.nn.CosineSimilarity clamps each norm separately with eps=1e-8
        outs.append(dot / (jnp.maximum(na, eps) * jnp.maximum(nb, eps)))
    o_ref[...] = jnp.concatenate(outs, axis=0)          # (B, 1)


# --------------------------------------------------------------------------- #
# Phase-2 kernel: encoder + pool + fc1-relu .. fc4 + softmax head.
# fc_1 weights are zero-expanded over the un-pooled emb lanes, so the kernel
# feeds the row-compacted / lane-uncompacted pooled repr straight into the dot.
# --------------------------------------------------------------------------- #
def phase2_kernel(x_ref, bias_ref,
                  wqkv_ref, bqkv_ref, wo_ref, bo_ref, g1_ref, be1_ref,
                  w1_ref, b1_ref, w2_ref, b2_ref, g2_ref, be2_ref,
                  w1c_ref, w1t_ref, fb1_ref, fw2_ref, fb2_ref,
                  fw3_ref, fb3_ref, fw4_ref, fb4_ref,
                  o_ref, *, n_head, n_layers, f, n_batch, seq_len):
    enc_refs = (wqkv_ref, bqkv_ref, wo_ref, bo_ref, g1_ref, be1_ref,
                w1_ref, b1_ref, w2_ref, b2_ref, g2_ref, be2_ref)
    w = _encoder_windowed_max(x_ref, bias_ref, enc_refs,
                              n_head=n_head, n_layers=n_layers, f=f)

    B, L = n_batch, seq_len
    Lo = (L - f) // f + 1

    def flat_stream(stream):                   # (B, Lo*E) lane-uncompacted pooled repr
        rows = []
        for b in range(B):
            r0 = (stream * B + b) * L
            pieces = [w[r0 + i * f: r0 + i * f + 1, :] for i in range(Lo)]
            rows.append(jnp.concatenate(pieces, axis=1))                # (1, Lo*E)
        return jnp.concatenate(rows, axis=0)                            # (B, Lo*E)

    code_r = flat_stream(0).astype(BF16)
    test_r = flat_stream(1).astype(BF16)
    # fc_1(cat(code_repr, test_repr)) via the two zero-expanded halves
    h = (jnp.dot(code_r, w1c_ref[...], preferred_element_type=F32)
         + jnp.dot(test_r, w1t_ref[...], preferred_element_type=F32)
         + fb1_ref[...])
    h = jnp.maximum(h, 0.0)
    h = jnp.maximum(jnp.dot(h.astype(BF16), fw2_ref[...],
                            preferred_element_type=F32) + fb2_ref[...], 0.0)
    h = jnp.maximum(jnp.dot(h.astype(BF16), fw3_ref[...],
                            preferred_element_type=F32) + fb3_ref[...], 0.0)
    logits = jnp.dot(h.astype(BF16), fw4_ref[...],
                     preferred_element_type=F32) + fb4_ref[...]
    m = jnp.max(logits, axis=-1, keepdims=True)
    e = jnp.exp(logits - m)
    o_ref[...] = e * pl.reciprocal(jnp.sum(e, axis=-1, keepdims=True), approx=True)


# --------------------------------------------------------------------------- #
# Parameter init (deterministic; per-layer encoder weights are stacked along a
# leading layer axis; matmul weights stored in bf16, biases / LN params in f32).
# --------------------------------------------------------------------------- #
def init_params(key, cfg):
    E, H, V = cfg['emb_size'], cfg['n_hidden'], cfg['n_words']
    L = max(cfg['code_len'], cfg['test_len'])
    f, s = cfg['filter_size'], cfg['stride']
    assert f == s and L % f == 0 and E % f == 0, \
        "fc_1 sizing in the reference module requires filter_size == stride (+ divisibility)"
    Lo, Eo = L // f, E // f
    Fdim = Lo * Eo
    nl = cfg['n_layers']

    keys = iter(jax.random.split(key, 6 * nl + 8))

    def nrm(shape, scale=0.05):
        return (scale * jax.random.normal(next(keys), shape)).astype(F32)

    def kaiming(shape):  # (fan_in, fan_out); kaiming_uniform, relu gain
        bound = (6.0 / shape[0]) ** 0.5
        return jax.random.uniform(next(keys), shape, F32, -bound, bound)

    wqkv, wo, w1, w2 = [], [], [], []
    for _ in range(nl):
        wqkv.append(jnp.concatenate([nrm((E, E)), nrm((E, E)), nrm((E, E))], axis=1))
        wo.append(nrm((E, E)))
        w1.append(nrm((E, H)))
        w2.append(nrm((H, E)))

    # fc_1 at its reference shape, then zero-expanded over un-pooled emb lanes so
    # the kernel needs no lane compaction / selection matmul.
    fc1_w = np.asarray(kaiming((2 * Fdim, H)))
    fc1c = np.zeros((Lo * E, H), np.float32)
    fc1t = np.zeros((Lo * E, H), np.float32)
    for i in range(Lo):
        for j in range(Eo):
            fc1c[i * E + j * f, :] = fc1_w[i * Eo + j, :]
            fc1t[i * E + j * f, :] = fc1_w[Fdim + i * Eo + j, :]

    return dict(
        emb=nrm((V, E), 0.02), pos=nrm((L, E), 0.02),
        wqkv=jnp.stack(wqkv).astype(BF16), bqkv=jnp.zeros((nl, 1, 3 * E), F32),
        wo=jnp.stack(wo).astype(BF16), bo=jnp.zeros((nl, 1, E), F32),
        g1=jnp.ones((nl, 1, E), F32), be1=jnp.zeros((nl, 1, E), F32),
        w1=jnp.stack(w1).astype(BF16), b1=jnp.zeros((nl, 1, H), F32),
        w2=jnp.stack(w2).astype(BF16), b2=jnp.zeros((nl, 1, E), F32),
        g2=jnp.ones((nl, 1, E), F32), be2=jnp.zeros((nl, 1, E), F32),
        fc1c_w=jnp.asarray(fc1c, BF16), fc1t_w=jnp.asarray(fc1t, BF16),
        fc1_b=jnp.zeros((1, H), F32),
        fc2_w=kaiming((H, H)).astype(BF16), fc2_b=jnp.zeros((1, H), F32),
        fc3_w=kaiming((H, H)).astype(BF16), fc3_b=jnp.zeros((1, H), F32),
        fc4_w=kaiming((H, 2)).astype(BF16), fc4_b=jnp.zeros((1, 2), F32),
    )


# --------------------------------------------------------------------------- #
# Forward: ONE fused pallas_call (no grid; all arrays whole-in-VMEM).
# --------------------------------------------------------------------------- #
def _vmem():
    return pl.BlockSpec(memory_space=pltpu.MemorySpace.VMEM)


def joint_embedder_forward(params, cfg, code, test, diff, phase=1, type='simple'):
    E, f = cfg['emb_size'], cfg['filter_size']
    need_diff = (phase == 1 and type in ('cat', 'mul'))
    # NOTE: stacking requires code_len == test_len (reference module pads to seq_max_len).
    streams = (code, test, diff) if need_diff else (code, test)
    toks = jnp.stack(streams, axis=0)                       # (S, B, L)
    S, B, L = toks.shape

    # token embedding gather + learned positional embedding (tiny XLA glue)
    x = (params['emb'][toks] + params['pos'][None, None, :L, :]).astype(F32)
    x_flat = x.reshape(S * B * L, E)                        # streams folded into batch
    bias = _attn_bias(S * B, L)

    enc = (params['wqkv'], params['bqkv'], params['wo'], params['bo'],
           params['g1'], params['be1'], params['w1'], params['b1'],
           params['w2'], params['b2'], params['g2'], params['be2'])
    common = dict(n_head=cfg['n_head'], n_layers=cfg['n_layers'], f=f,
                  n_batch=B, seq_len=L)

    if phase == 1:
        args = (x_flat, bias, _pool_mask(L, E, f)) + enc
        out = pl.pallas_call(
            functools.partial(phase1_kernel, mode=type, **common),
            out_shape=jax.ShapeDtypeStruct((B, 1), F32),
            in_specs=[_vmem()] * len(args),
            out_specs=_vmem(),
        )(*args)
        return out.reshape(-1)                              # matches torch -> (B,)
    elif phase == 2:
        head = (params['fc1c_w'], params['fc1t_w'], params['fc1_b'],
                params['fc2_w'], params['fc2_b'], params['fc3_w'], params['fc3_b'],
                params['fc4_w'], params['fc4_b'])
        args = (x_flat, bias) + enc + head
        return pl.pallas_call(
            functools.partial(phase2_kernel, **common),
            out_shape=jax.ShapeDtypeStruct((B, 2), F32),
            in_specs=[_vmem()] * len(args),
            out_specs=_vmem(),
        )(*args)
    raise ValueError(phase)


# --------------------------------------------------------------------------- #
if __name__ == "__main__":
    cfg = dict(n_words=100, n_head=4, n_hidden=32, n_layers=2, emb_size=32,
               code_len=16, test_len=16, filter_size=2, stride=2, dropout=0.0)

    root = jax.random.PRNGKey(0)
    kp, kc, kt, kd = jax.random.split(root, 4)
    params = init_params(kp, cfg)

    B = 2
    code = jax.random.randint(kc, (B, cfg['code_len']), 0, cfg['n_words'], dtype=jnp.int32)
    test = jax.random.randint(kt, (B, cfg['test_len']), 0, cfg['n_words'], dtype=jnp.int32)
    diff = jax.random.randint(kd, (B, cfg['code_len']), 0, cfg['n_words'], dtype=jnp.int32)

    out_p1 = joint_embedder_forward(params, cfg, code, test, diff, phase=1, type='simple')
    out_p1m = joint_embedder_forward(params, cfg, code, test, diff, phase=1, type='mul')
    out_p2 = joint_embedder_forward(params, cfg, code, test, diff, phase=2)
    jax.block_until_ready((out_p1, out_p1m, out_p2))

    assert out_p1.shape == (B,) and out_p1m.shape == (B,)
    assert out_p2.shape == (B, 2)
    assert bool(jnp.all(jnp.isfinite(out_p1)))
    assert bool(jnp.all(jnp.isfinite(out_p1m)))
    assert bool(jnp.all(jnp.isfinite(out_p2)))
    assert bool(jnp.all(jnp.abs(out_p1) <= 1.0 + 1e-3))
    print("KERNEL_OK")
</pallas_src>

<mosaic_0001>
module attributes {stable_mosaic.version = 11 : i64} {
  func.func @phase1_kernel(%arg0: memref<64x32xf32, #tpu.memory_space<vmem>>, %arg1: memref<64x64xf32, #tpu.memory_space<vmem>>, %arg2: memref<16x32xf32, #tpu.memory_space<vmem>>, %arg3: memref<2x32x96xbf16, #tpu.memory_space<vmem>>, %arg4: memref<2x1x96xf32, #tpu.memory_space<vmem>>, %arg5: memref<2x32x32xbf16, #tpu.memory_space<vmem>>, %arg6: memref<2x1x32xf32, #tpu.memory_space<vmem>>, %arg7: memref<2x1x32xf32, #tpu.memory_space<vmem>>, %arg8: memref<2x1x32xf32, #tpu.memory_space<vmem>>, %arg9: memref<2x32x32xbf16, #tpu.memory_space<vmem>>, %arg10: memref<2x1x32xf32, #tpu.memory_space<vmem>>, %arg11: memref<2x32x32xbf16, #tpu.memory_space<vmem>>, %arg12: memref<2x1x32xf32, #tpu.memory_space<vmem>>, %arg13: memref<2x1x32xf32, #tpu.memory_space<vmem>>, %arg14: memref<2x1x32xf32, #tpu.memory_space<vmem>>, %arg15: memref<2x1xf32, #tpu.memory_space<vmem>>) attributes {dimension_semantics = [], scalar_prefetch = 0 : i64, scratch_operands = 0 : i64, tpu.core_type = #tpu.core_type<tc>} {
    %c0 = arith.constant 0 : index
    %c0_0 = arith.constant 0 : index
    %0 = vector.load %arg1[%c0, %c0_0] : memref<64x64xf32, #tpu.memory_space<vmem>>, vector<64x64xf32>
    %c0_1 = arith.constant 0 : index
    %c0_2 = arith.constant 0 : index
    %1 = vector.load %arg0[%c0_1, %c0_2] : memref<64x32xf32, #tpu.memory_space<vmem>>, vector<64x32xf32>
    %2 = arith.truncf %1 : vector<64x32xf32> to vector<64x32xbf16>
    %c0_3 = arith.constant 0 : index
    %c0_4 = arith.constant 0 : index
    %c0_5 = arith.constant 0 : index
    %3 = vector.load %arg3[%c0_3, %c0_4, %c0_5] : memref<2x32x96xbf16, #tpu.memory_space<vmem>>, vector<1x32x96xbf16>
    %4 = vector.shape_cast %3 : vector<1x32x96xbf16> to vector<32x96xbf16>
    %cst = arith.constant dense<0.000000e+00> : vector<64x96xf32>
    %5 = tpu.matmul %2, %4, %cst {dimension_numbers = #tpu.dot_dimension_numbers<[1], [0], [0], [1], [0, 0, 1, 1], [], []>} : vector<64x32xbf16>, vector<32x96xbf16>, vector<64x96xf32> -> vector<64x96xf32>
    %c0_6 = arith.constant 0 : index
    %c0_7 = arith.constant 0 : index
    %c0_8 = arith.constant 0 : index
    %6 = vector.load %arg4[%c0_6, %c0_7, %c0_8] : memref<2x1x96xf32, #tpu.memory_space<vmem>>, vector<1x1x96xf32>
    %7 = vector.shape_cast %6 : vector<1x1x96xf32> to vector<1x96xf32>
    %8 = vector.broadcast %7 : vector<1x96xf32> to vector<64x96xf32>
    %9 = arith.addf %5, %8 : vector<64x96xf32>
    %10 = vector.extract_strided_slice %9 {offsets = [0, 32], sizes = [64, 32], strides = [1, 1]} : vector<64x96xf32> to vector<64x32xf32>
    %11 = tpu.transpose %10, [1, 0] : vector<64x32xf32> -> vector<32x64xf32>
    %12 = vector.extract_strided_slice %9 {offsets = [0, 0], sizes = [64, 8], strides = [1, 1]} : vector<64x96xf32> to vector<64x8xf32>
    %13 = arith.truncf %12 : vector<64x8xf32> to vector<64x8xbf16>
    %14 = vector.extract_strided_slice %11 {offsets = [0, 0], sizes = [8, 64], strides = [1, 1]} : vector<32x64xf32> to vector<8x64xf32>
    %15 = arith.truncf %14 : vector<8x64xf32> to vector<8x64xbf16>
    %16 = vector.extract_strided_slice %9 {offsets = [0, 64], sizes = [64, 8], strides = [1, 1]} : vector<64x96xf32> to vector<64x8xf32>
    %17 = arith.truncf %16 : vector<64x8xf32> to vector<64x8xbf16>
    %cst_9 = arith.constant dense<0.000000e+00> : vector<64x64xf32>
    %18 = tpu.matmul %13, %15, %cst_9 {dimension_numbers = #tpu.dot_dimension_numbers<[1], [0], [0], [1], [0, 0, 1, 1], [], []>} : vector<64x8xbf16>, vector<8x64xbf16>, vector<64x64xf32> -> vector<64x64xf32>
    %cst_10 = arith.constant 0.353553385 : f32
    %19 = vector.broadcast %cst_10 : f32 to vector<64x64xf32>
    %20 = arith.mulf %18, %19 : vector<64x64xf32>
    %21 = arith.addf %20, %0 : vector<64x64xf32>
    %cst_11 = arith.constant dense<0xFF800000> : vector<64xf32>
    %22 = vector.multi_reduction <maximumf>, %21, %cst_11 [1] : vector<64x64xf32> to vector<64xf32>
    %23 = vector.shape_cast %22 : vector<64xf32> to vector<64x1xf32>
    %24 = vector.broadcast %23 : vector<64x1xf32> to vector<64x64xf32>
    %25 = arith.subf %21, %24 : vector<64x64xf32>
    %26 = math.exp %25 : vector<64x64xf32>
    %cst_12 = arith.constant dense<0.000000e+00> : vector<64xf32>
    %27 = vector.multi_reduction <add>, %26, %cst_12 [1] : vector<64x64xf32> to vector<64xf32>
    %28 = vector.shape_cast %27 : vector<64xf32> to vector<64x1xf32>
    %29 = tpu.reciprocal %28 {approx = true} : vector<64x1xf32> -> vector<64x1xf32>
    %30 = vector.broadcast %29 : vector<64x1xf32> to vector<64x64xf32>
    %31 = arith.mulf %26, %30 : vector<64x64xf32>
    %32 = arith.truncf %31 : vector<64x64xf32> to vector<64x64xbf16>
    %cst_13 = arith.constant dense<0.000000e+00> : vector<64x8xf32>
    %33 = tpu.matmul %32, %17, %cst_13 {dimension_numbers = #tpu.dot_dimension_numbers<[1], [0], [0], [1], [0, 0, 1, 1], [], []>} : vector<64x64xbf16>, vector<64x8xbf16>, vector<64x8xf32> -> vector<64x8xf32>
    %34 = vector.extract_strided_slice %9 {offsets = [0, 8], sizes = [64, 8], strides = [1, 1]} : vector<64x96xf32> to vector<64x8xf32>
    %35 = arith.truncf %34 : vector<64x8xf32> to vector<64x8xbf16>
    %36 = vector.extract_strided_slice %11 {offsets = [8, 0], sizes = [8, 64], strides = [1, 1]} : vector<32x64xf32> to vector<8x64xf32>
    %37 = arith.truncf %36 : vector<8x64xf32> to vector<8x64xbf16>
    %38 = vector.extract_strided_slice %9 {offsets = [0, 72], sizes = [64, 8], strides = [1, 1]} : vector<64x96xf32> to vector<64x8xf32>
    %39 = arith.truncf %38 : vector<64x8xf32> to vector<64x8xbf16>
    %cst_14 = arith.constant dense<0.000000e+00> : vector<64x64xf32>
    %40 = tpu.matmul %35, %37, %cst_14 {dimension_numbers = #tpu.dot_dimension_numbers<[1], [0], [0], [1], [0, 0, 1, 1], [], []>} : vector<64x8xbf16>, vector<8x64xbf16>, vector<64x64xf32> -> vector<64x64xf32>
    %cst_15 = arith.constant 0.353553385 : f32
    %41 = vector.broadcast %cst_15 : f32 to vector<64x64xf32>
    %42 = arith.mulf %40, %41 : vector<64x64xf32>
    %43 = arith.addf %42, %0 : vector<64x64xf32>
    %cst_16 = arith.constant dense<0xFF800000> : vector<64xf32>
    %44 = vector.multi_reduction <maximumf>, %43, %cst_16 [1] : vector<64x64xf32> to vector<64xf32>
    %45 = vector.shape_cast %44 : vector<64xf32> to vector<64x1xf32>
    %46 = vector.broadcast %45 : vector<64x1xf32> to vector<64x64xf32>
    %47 = arith.subf %43, %46 : vector<64x64xf32>
    %48 = math.exp %47 : vector<64x64xf32>
    %cst_17 = arith.constant dense<0.000000e+00> : vector<64xf32>
    %49 = vector.multi_reduction <add>, %48, %cst_17 [1] : vector<64x64xf32> to vector<64xf32>
    %50 = vector.shape_cast %49 : vector<64xf32> to vector<64x1xf32>
    %51 = tpu.reciprocal %50 {approx = true} : vector<64x1xf32> -> vector<64x1xf32>
    %52 = vector.broadcast %51 : vector<64x1xf32> to vector<64x64xf32>
    %53 = arith.mulf %48, %52 : vector<64x64xf32>
    %54 = arith.truncf %53 : vector<64x64xf32> to vector<64x64xbf16>
    %cst_18 = arith.constant dense<0.000000e+00> : vector<64x8xf32>
    %55 = tpu.matmul %54, %39, %cst_18 {dimension_numbers = #tpu.dot_dimension_numbers<[1], [0], [0], [1], [0, 0, 1, 1], [], []>} : vector<64x64xbf16>, vector<64x8xbf16>, vector<64x8xf32> -> vector<64x8xf32>
    %56 = vector.extract_strided_slice %9 {offsets = [0, 16], sizes = [64, 8], strides = [1, 1]} : vector<64x96xf32> to vector<64x8xf32>
    %57 = arith.truncf %56 : vector<64x8xf32> to vector<64x8xbf16>
    %58 = vector.extract_strided_slice %11 {offsets = [16, 0], sizes = [8, 64], strides = [1, 1]} : vector<32x64xf32> to vector<8x64xf32>
    %59 = arith.truncf %58 : vector<8x64xf32> to vector<8x64xbf16>
    %60 = vector.extract_strided_slice %9 {offsets = [0, 80], sizes = [64, 8], strides = [1, 1]} : vector<64x96xf32> to vector<64x8xf32>
    %61 = arith.truncf %60 : vector<64x8xf32> to vector<64x8xbf16>
    %cst_19 = arith.constant dense<0.000000e+00> : vector<64x64xf32>
    %62 = tpu.matmul %57, %59, %cst_19 {dimension_numbers = #tpu.dot_dimension_numbers<[1], [0], [0], [1], [0, 0, 1, 1], [], []>} : vector<64x8xbf16>, vector<8x64xbf16>, vector<64x64xf32> -> vector<64x64xf32>
    %cst_20 = arith.constant 0.353553385 : f32
    %63 = vector.broadcast %cst_20 : f32 to vector<64x64xf32>
    %64 = arith.mulf %62, %63 : vector<64x64xf32>
    %65 = arith.addf %64, %0 : vector<64x64xf32>
    %cst_21 = arith.constant dense<0xFF800000> : vector<64xf32>
    %66 = vector.multi_reduction <maximumf>, %65, %cst_21 [1] : vector<64x64xf32> to vector<64xf32>
    %67 = vector.shape_cast %66 : vector<64xf32> to vector<64x1xf32>
    %68 = vector.broadcast %67 : vector<64x1xf32> to vector<64x64xf32>
    %69 = arith.subf %65, %68 : vector<64x64xf32>
    %70 = math.exp %69 : vector<64x64xf32>
    %cst_22 = arith.constant dense<0.000000e+00> : vector<64xf32>
    %71 = vector.multi_reduction <add>, %70, %cst_22 [1] : vector<64x64xf32> to vector<64xf32>
    %72 = vector.shape_cast %71 : vector<64xf32> to vector<64x1xf32>
    %73 = tpu.reciprocal %72 {approx = true} : vector<64x1xf32> -> vector<64x1xf32>
    %74 = vector.broadcast %73 : vector<64x1xf32> to vector<64x64xf32>
    %75 = arith.mulf %70, %74 : vector<64x64xf32>
    %76 = arith.truncf %75 : vector<64x64xf32> to vector<64x64xbf16>
    %cst_23 = arith.constant dense<0.000000e+00> : vector<64x8xf32>
    %77 = tpu.matmul %76, %61, %cst_23 {dimension_numbers = #tpu.dot_dimension_numbers<[1], [0], [0], [1], [0, 0, 1, 1], [], []>} : vector<64x64xbf16>, vector<64x8xbf16>, vector<64x8xf32> -> vector<64x8xf32>
    %78 = vector.extract_strided_slice %9 {offsets = [0, 24], sizes = [64, 8], strides = [1, 1]} : vector<64x96xf32> to vector<64x8xf32>
    %79 = arith.truncf %78 : vector<64x8xf32> to vector<64x8xbf16>
    %80 = vector.extract_strided_slice %11 {offsets = [24, 0], sizes = [8, 64], strides = [1, 1]} : vector<32x64xf32> to vector<8x64xf32>
    %81 = arith.truncf %80 : vector<8x64xf32> to vector<8x64xbf16>
    %82 = vector.extract_strided_slice %9 {offsets = [0, 88], sizes = [64, 8], strides = [1, 1]} : vector<64x96xf32> to vector<64x8xf32>
    %83 = arith.truncf %82 : vector<64x8xf32> to vector<64x8xbf16>
    %cst_24 = arith.constant dense<0.000000e+00> : vector<64x64xf32>
    %84 = tpu.matmul %79, %81, %cst_24 {dimension_numbers = #tpu.dot_dimension_numbers<[1], [0], [0], [1], [0, 0, 1, 1], [], []>} : vector<64x8xbf16>, vector<8x64xbf16>, vector<64x64xf32> -> vector<64x64xf32>
    %cst_25 = arith.constant 0.353553385 : f32
    %85 = vector.broadcast %cst_25 : f32 to vector<64x64xf32>
    %86 = arith.mulf %84, %85 : vector<64x64xf32>
    %87 = arith.addf %86, %0 : vector<64x64xf32>
    %cst_26 = arith.constant dense<0xFF800000> : vector<64xf32>
    %88 = vector.multi_reduction <maximumf>, %87, %cst_26 [1] : vector<64x64xf32> to vector<64xf32>
    %89 = vector.shape_cast %88 : vector<64xf32> to vector<64x1xf32>
    %90 = vector.broadcast %89 : vector<64x1xf32> to vector<64x64xf32>
    %91 = arith.subf %87, %90 : vector<64x64xf32>
    %92 = math.exp %91 : vector<64x64xf32>
    %cst_27 = arith.constant dense<0.000000e+00> : vector<64xf32>
    %93 = vector.multi_reduction <add>, %92, %cst_27 [1] : vector<64x64xf32> to vector<64xf32>
    %94 = vector.shape_cast %93 : vector<64xf32> to vector<64x1xf32>
    %95 = tpu.reciprocal %94 {approx = true} : vector<64x1xf32> -> vector<64x1xf32>
    %96 = vector.broadcast %95 : vector<64x1xf32> to vector<64x64xf32>
    %97 = arith.mulf %92, %96 : vector<64x64xf32>
    %98 = arith.truncf %97 : vector<64x64xf32> to vector<64x64xbf16>
    %cst_28 = arith.constant dense<0.000000e+00> : vector<64x8xf32>
    %99 = tpu.matmul %98, %83, %cst_28 {dimension_numbers = #tpu.dot_dimension_numbers<[1], [0], [0], [1], [0, 0, 1, 1], [], []>} : vector<64x64xbf16>, vector<64x8xbf16>, vector<64x8xf32> -> vector<64x8xf32>
    %100 = tpu.concatenate %33, %55, %77, %99 in 1 : vector<64x8xf32>, vector<64x8xf32>, vector<64x8xf32>, vector<64x8xf32> -> vector<64x32xf32>
    %101 = arith.truncf %100 : vector<64x32xf32> to vector<64x32xbf16>
    %c0_29 = arith.constant 0 : index
    %c0_30 = arith.constant 0 : index
    %c0_31 = arith.constant 0 : index
    %102 = vector.load %arg5[%c0_29, %c0_30, %c0_31] : memref<2x32x32xbf16, #tpu.memory_space<vmem>>, vector<1x32x32xbf16>
    %103 = vector.shape_cast %102 : vector<1x32x32xbf16> to vector<32x32xbf16>
    %cst_32 = arith.constant dense<0.000000e+00> : vector<64x32xf32>
    %104 = tpu.matmul %101, %103, %cst_32 {dimension_numbers = #tpu.dot_dimension_numbers<[1], [0], [0], [1], [0, 0, 1, 1], [], []>} : vector<64x32xbf16>, vector<32x32xbf16>, vector<64x32xf32> -> vector<64x32xf32>
    %c0_33 = arith.constant 0 : index
    %c0_34 = arith.constant 0 : index
    %c0_35 = arith.constant 0 : index
    %105 = vector.load %arg6[%c0_33, %c0_34, %c0_35] : memref<2x1x32xf32, #tpu.memory_space<vmem>>, vector<1x1x32xf32>
    %106 = vector.shape_cast %105 : vector<1x1x32xf32> to vector<1x32xf32>
    %107 = vector.broadcast %106 : vector<1x32xf32> to vector<64x32xf32>
    %108 = arith.addf %104, %107 : vector<64x32xf32>
    %109 = arith.addf %1, %108 : vector<64x32xf32>
    %c0_36 = arith.constant 0 : index
    %c0_37 = arith.constant 0 : index
    %c0_38 = arith.constant 0 : index
    %110 = vector.load %arg7[%c0_36, %c0_37, %c0_38] : memref<2x1x32xf32, #tpu.memory_space<vmem>>, vector<1x1x32xf32>
    %111 = vector.shape_cast %110 : vector<1x1x32xf32> to vector<1x32xf32>
    %c0_39 = arith.constant 0 : index
    %c0_40 = arith.constant 0 : index
    %c0_41 = arith.constant 0 : index
    %112 = vector.load %arg8[%c0_39, %c0_40, %c0_41] : memref<2x1x32xf32, #tpu.memory_space<vmem>>, vector<1x1x32xf32>
    %113 = vector.shape_cast %112 : vector<1x1x32xf32> to vector<1x32xf32>
    %cst_42 = arith.constant dense<0.000000e+00> : vector<64xf32>
    %114 = vector.multi_reduction <add>, %109, %cst_42 [1] : vector<64x32xf32> to vector<64xf32>
    %115 = vector.shape_cast %114 : vector<64xf32> to vector<64x1xf32>
    %cst_43 = arith.constant 3.200000e+01 : f32
    %116 = vector.broadcast %cst_43 : f32 to vector<64x1xf32>
    %117 = arith.divf %115, %116 : vector<64x1xf32>
    %118 = vector.broadcast %117 : vector<64x1xf32> to vector<64x32xf32>
    %119 = arith.subf %109, %118 : vector<64x32xf32>
    %120 = arith.mulf %119, %119 : vector<64x32xf32>
    %cst_44 = arith.constant dense<0.000000e+00> : vector<64xf32>
    %121 = vector.multi_reduction <add>, %120, %cst_44 [1] : vector<64x32xf32> to vector<64xf32>
    %122 = vector.shape_cast %121 : vector<64xf32> to vector<64x1xf32>
    %cst_45 = arith.constant 3.200000e+01 : f32
    %123 = vector.broadcast %cst_45 : f32 to vector<64x1xf32>
    %124 = arith.divf %122, %123 : vector<64x1xf32>
    %125 = vector.broadcast %117 : vector<64x1xf32> to vector<64x32xf32>
    %126 = arith.subf %109, %125 : vector<64x32xf32>
    %cst_46 = arith.constant 9.99999974E-6 : f32
    %127 = vector.broadcast %cst_46 : f32 to vector<64x1xf32>
    %128 = arith.addf %124, %127 : vector<64x1xf32>
    %129 = math.rsqrt %128 : vector<64x1xf32>
    %130 = vector.broadcast %129 : vector<64x1xf32> to vector<64x32xf32>
    %131 = arith.mulf %126, %130 : vector<64x32xf32>
    %132 = vector.broadcast %111 : vector<1x32xf32> to vector<64x32xf32>
    %133 = arith.mulf %131, %132 : vector<64x32xf32>
    %134 = vector.broadcast %113 : vector<1x32xf32> to vector<64x32xf32>
    %135 = arith.addf %133, %134 : vector<64x32xf32>
    %136 = arith.truncf %135 : vector<64x32xf32> to vector<64x32xbf16>
    %c0_47 = arith.constant 0 : index
    %c0_48 = arith.constant 0 : index
    %c0_49 = arith.constant 0 : index
    %137 = vector.load %arg9[%c0_47, %c0_48, %c0_49] : memref<2x32x32xbf16, #tpu.memory_space<vmem>>, vector<1x32x32xbf16>
    %138 = vector.shape_cast %137 : vector<1x32x32xbf16> to vector<32x32xbf16>
    %cst_50 = arith.constant dense<0.000000e+00> : vector<64x32xf32>
    %139 = tpu.matmul %136, %138, %cst_50 {dimension_numbers = #tpu.dot_dimension_numbers<[1], [0], [0], [1], [0, 0, 1, 1], [], []>} : vector<64x32xbf16>, vector<32x32xbf16>, vector<64x32xf32> -> vector<64x32xf32>
    %c0_51 = arith.constant 0 : index
    %c0_52 = arith.constant 0 : index
    %c0_53 = arith.constant 0 : index
    %140 = vector.load %arg10[%c0_51, %c0_52, %c0_53] : memref<2x1x32xf32, #tpu.memory_space<vmem>>, vector<1x1x32xf32>
    %141 = vector.shape_cast %140 : vector<1x1x32xf32> to vector<1x32xf32>
    %142 = vector.broadcast %141 : vector<1x32xf32> to vector<64x32xf32>
    %143 = arith.addf %139, %142 : vector<64x32xf32>
    %cst_54 = arith.constant 0.000000e+00 : f32
    %144 = vector.broadcast %cst_54 : f32 to vector<64x32xf32>
    %145 = arith.maximumf %143, %144 : vector<64x32xf32>
    %146 = arith.truncf %145 : vector<64x32xf32> to vector<64x32xbf16>
    %c0_55 = arith.constant 0 : index
    %c0_56 = arith.constant 0 : index
    %c0_57 = arith.constant 0 : index
    %147 = vector.load %arg11[%c0_55, %c0_56, %c0_57] : memref<2x32x32xbf16, #tpu.memory_space<vmem>>, vector<1x32x32xbf16>
    %148 = vector.shape_cast %147 : vector<1x32x32xbf16> to vector<32x32xbf16>
    %cst_58 = arith.constant dense<0.000000e+00> : vector<64x32xf32>
    %149 = tpu.matmul %146, %148, %cst_58 {dimension_numbers = #tpu.dot_dimension_numbers<[1], [0], [0], [1], [0, 0, 1, 1], [], []>} : vector<64x32xbf16>, vector<32x32xbf16>, vector<64x32xf32> -> vector<64x32xf32>
    %c0_59 = arith.constant 0 : index
    %c0_60 = arith.constant 0 : index
    %c0_61 = arith.constant 0 : index
    %150 = vector.load %arg12[%c0_59, %c0_60, %c0_61] : memref<2x1x32xf32, #tpu.memory_space<vmem>>, vector<1x1x32xf32>
    %151 = vector.shape_cast %150 : vector<1x1x32xf32> to vector<1x32xf32>
    %152 = vector.broadcast %151 : vector<1x32xf32> to vector<64x32xf32>
    %153 = arith.addf %149, %152 : vector<64x32xf32>
    %154 = arith.addf %135, %153 : vector<64x32xf32>
    %c0_62 = arith.constant 0 : index
    %c0_63 = arith.constant 0 : index
    %c0_64 = arith.constant 0 : index
    %155 = vector.load %arg13[%c0_62, %c0_63, %c0_64] : memref<2x1x32xf32, #tpu.memory_space<vmem>>, vector<1x1x32xf32>
    %156 = vector.shape_cast %155 : vector<1x1x32xf32> to vector<1x32xf32>
    %c0_65 = arith.constant 0 : index
    %c0_66 = arith.constant 0 : index
    %c0_67 = arith.constant 0 : index
    %157 = vector.load %arg14[%c0_65, %c0_66, %c0_67] : memref<2x1x32xf32, #tpu.memory_space<vmem>>, vector<1x1x32xf32>
    %158 = vector.shape_cast %157 : vector<1x1x32xf32> to vector<1x32xf32>
    %cst_68 = arith.constant dense<0.000000e+00> : vector<64xf32>
    %159 = vector.multi_reduction <add>, %154, %cst_68 [1] : vector<64x32xf32> to vector<64xf32>
    %160 = vector.shape_cast %159 : vector<64xf32> to vector<64x1xf32>
    %cst_69 = arith.constant 3.200000e+01 : f32
    %161 = vector.broadcast %cst_69 : f32 to vector<64x1xf32>
    %162 = arith.divf %160, %161 : vector<64x1xf32>
    %163 = vector.broadcast %162 : vector<64x1xf32> to vector<64x32xf32>
    %164 = arith.subf %154, %163 : vector<64x32xf32>
    %165 = arith.mulf %164, %164 : vector<64x32xf32>
    %cst_70 = arith.constant dense<0.000000e+00> : vector<64xf32>
    %166 = vector.multi_reduction <add>, %165, %cst_70 [1] : vector<64x32xf32> to vector<64xf32>
    %167 = vector.shape_cast %166 : vector<64xf32> to vector<64x1xf32>
    %cst_71 = arith.constant 3.200000e+01 : f32
    %168 = vector.broadcast %cst_71 : f32 to vector<64x1xf32>
    %169 = arith.divf %167, %168 : vector<64x1xf32>
    %170 = vector.broadcast %162 : vector<64x1xf32> to vector<64x32xf32>
    %171 = arith.subf %154, %170 : vector<64x32xf32>
    %cst_72 = arith.constant 9.99999974E-6 : f32
    %172 = vector.broadcast %cst_72 : f32 to vector<64x1xf32>
    %173 = arith.addf %169, %172 : vector<64x1xf32>
    %174 = math.rsqrt %173 : vector<64x1xf32>
    %175 = vector.broadcast %174 : vector<64x1xf32> to vector<64x32xf32>
    %176 = arith.mulf %171, %175 : vector<64x32xf32>
    %177 = vector.broadcast %156 : vector<1x32xf32> to vector<64x32xf32>
    %178 = arith.mulf %176, %177 : vector<64x32xf32>
    %179 = vector.broadcast %158 : vector<1x32xf32> to vector<64x32xf32>
    %180 = arith.addf %178, %179 : vector<64x32xf32>
    %181 = arith.truncf %180 : vector<64x32xf32> to vector<64x32xbf16>
    %c1 = arith.constant 1 : index
    %c0_73 = arith.constant 0 : index
    %c0_74 = arith.constant 0 : index
    %182 = vector.load %arg3[%c1, %c0_73, %c0_74] : memref<2x32x96xbf16, #tpu.memory_space<vmem>>, vector<1x32x96xbf16>
    %183 = vector.shape_cast %182 : vector<1x32x96xbf16> to vector<32x96xbf16>
    %cst_75 = arith.constant dense<0.000000e+00> : vector<64x96xf32>
    %184 = tpu.matmul %181, %183, %cst_75 {dimension_numbers = #tpu.dot_dimension_numbers<[1], [0], [0], [1], [0, 0, 1, 1], [], []>} : vector<64x32xbf16>, vector<32x96xbf16>, vector<64x96xf32> -> vector<64x96xf32>
    %c1_76 = arith.constant 1 : index
    %c0_77 = arith.constant 0 : index
    %c0_78 = arith.constant 0 : index
    %185 = vector.load %arg4[%c1_76, %c0_77, %c0_78] : memref<2x1x96xf32, #tpu.memory_space<vmem>>, vector<1x1x96xf32>
    %186 = vector.shape_cast %185 : vector<1x1x96xf32> to vector<1x96xf32>
    %187 = vector.broadcast %186 : vector<1x96xf32> to vector<64x96xf32>
    %188 = arith.addf %184, %187 : vector<64x96xf32>
    %189 = vector.extract_strided_slice %188 {offsets = [0, 32], sizes = [64, 32], strides = [1, 1]} : vector<64x96xf32> to vector<64x32xf32>
    %190 = tpu.transpose %189, [1, 0] : vector<64x32xf32> -> vector<32x64xf32>
    %191 = vector.extract_strided_slice %188 {offsets = [0, 0], sizes = [64, 8], strides = [1, 1]} : vector<64x96xf32> to vector<64x8xf32>
    %192 = arith.truncf %191 : vector<64x8xf32> to vector<64x8xbf16>
    %193 = vector.extract_strided_slice %190 {offsets = [0, 0], sizes = [8, 64], strides = [1, 1]} : vector<32x64xf32> to vector<8x64xf32>
    %194 = arith.truncf %193 : vector<8x64xf32> to vector<8x64xbf16>
    %195 = vector.extract_strided_slice %188 {offsets = [0, 64], sizes = [64, 8], strides = [1, 1]} : vector<64x96xf32> to vector<64x8xf32>
    %196 = arith.truncf %195 : vector<64x8xf32> to vector<64x8xbf16>
    %cst_79 = arith.constant dense<0.000000e+00> : vector<64x64xf32>
    %197 = tpu.matmul %192, %194, %cst_79 {dimension_numbers = #tpu.dot_dimension_numbers<[1], [0], [0], [1], [0, 0, 1, 1], [], []>} : vector<64x8xbf16>, vector<8x64xbf16>, vector<64x64xf32> -> vector<64x64xf32>
    %cst_80 = arith.constant 0.353553385 : f32
    %198 = vector.broadcast %cst_80 : f32 to vector<64x64xf32>
    %199 = arith.mulf %197, %198 : vector<64x64xf32>
    %200 = arith.addf %199, %0 : vector<64x64xf32>
    %cst_81 = arith.constant dense<0xFF800000> : vector<64xf32>
    %201 = vector.multi_reduction <maximumf>, %200, %cst_81 [1] : vector<64x64xf32> to vector<64xf32>
    %202 = vector.shape_cast %201 : vector<64xf32> to vector<64x1xf32>
    %203 = vector.broadcast %202 : vector<64x1xf32> to vector<64x64xf32>
    %204 = arith.subf %200, %203 : vector<64x64xf32>
    %205 = math.exp %204 : vector<64x64xf32>
    %cst_82 = arith.constant dense<0.000000e+00> : vector<64xf32>
    %206 = vector.multi_reduction <add>, %205, %cst_82 [1] : vector<64x64xf32> to vector<64xf32>
    %207 = vector.shape_cast %206 : vector<64xf32> to vector<64x1xf32>
    %208 = tpu.reciprocal %207 {approx = true} : vector<64x1xf32> -> vector<64x1xf32>
    %209 = vector.broadcast %208 : vector<64x1xf32> to vector<64x64xf32>
    %210 = arith.mulf %205, %209 : vector<64x64xf32>
    %211 = arith.truncf %210 : vector<64x64xf32> to vector<64x64xbf16>
    %cst_83 = arith.constant dense<0.000000e+00> : vector<64x8xf32>
    %212 = tpu.matmul %211, %196, %cst_83 {dimension_numbers = #tpu.dot_dimension_numbers<[1], [0], [0], [1], [0, 0, 1, 1], [], []>} : vector<64x64xbf16>, vector<64x8xbf16>, vector<64x8xf32> -> vector<64x8xf32>
    %213 = vector.extract_strided_slice %188 {offsets = [0, 8], sizes = [64, 8], strides = [1, 1]} : vector<64x96xf32> to vector<64x8xf32>
    %214 = arith.truncf %213 : vector<64x8xf32> to vector<64x8xbf16>
    %215 = vector.extract_strided_slice %190 {offsets = [8, 0], sizes = [8, 64], strides = [1, 1]} : vector<32x64xf32> to vector<8x64xf32>
    %216 = arith.truncf %215 : vector<8x64xf32> to vector<8x64xbf16>
    %217 = vector.extract_strided_slice %188 {offsets = [0, 72], sizes = [64, 8], strides = [1, 1]} : vector<64x96xf32> to vector<64x8xf32>
    %218 = arith.truncf %217 : vector<64x8xf32> to vector<64x8xbf16>
    %cst_84 = arith.constant dense<0.000000e+00> : vector<64x64xf32>
    %219 = tpu.matmul %214, %216, %cst_84 {dimension_numbers = #tpu.dot_dimension_numbers<[1], [0], [0], [1], [0, 0, 1, 1], [], []>} : vector<64x8xbf16>, vector<8x64xbf16>, vector<64x64xf32> -> vector<64x64xf32>
    %cst_85 = arith.constant 0.353553385 : f32
    %220 = vector.broadcast %cst_85 : f32 to vector<64x64xf32>
    %221 = arith.mulf %219, %220 : vector<64x64xf32>
    %222 = arith.addf %221, %0 : vector<64x64xf32>
    %cst_86 = arith.constant dense<0xFF800000> : vector<64xf32>
    %223 = vector.multi_reduction <maximumf>, %222, %cst_86 [1] : vector<64x64xf32> to vector<64xf32>
    %224 = vector.shape_cast %223 : vector<64xf32> to vector<64x1xf32>
    %225 = vector.broadcast %224 : vector<64x1xf32> to vector<64x64xf32>
    %226 = arith.subf %222, %225 : vector<64x64xf32>
    %227 = math.exp %226 : vector<64x64xf32>
    %cst_87 = arith.constant dense<0.000000e+00> : vector<64xf32>
    %228 = vector.multi_reduction <add>, %227, %cst_87 [1] : vector<64x64xf32> to vector<64xf32>
    %229 = vector.shape_cast %228 : vector<64xf32> to vector<64x1xf32>
    %230 = tpu.reciprocal %229 {approx = true} : vector<64x1xf32> -> vector<64x1xf32>
    %231 = vector.broadcast %230 : vector<64x1xf32> to vector<64x64xf32>
    %232 = arith.mulf %227, %231 : vector<64x64xf32>
    %233 = arith.truncf %232 : vector<64x64xf32> to vector<64x64xbf16>
    %cst_88 = arith.constant dense<0.000000e+00> : vector<64x8xf32>
    %234 = tpu.matmul %233, %218, %cst_88 {dimension_numbers = #tpu.dot_dimension_numbers<[1], [0], [0], [1], [0, 0, 1, 1], [], []>} : vector<64x64xbf16>, vector<64x8xbf16>, vector<64x8xf32> -> vector<64x8xf32>
    %235 = vector.extract_strided_slice %188 {offsets = [0, 16], sizes = [64, 8], strides = [1, 1]} : vector<64x96xf32> to vector<64x8xf32>
    %236 = arith.truncf %235 : vector<64x8xf32> to vector<64x8xbf16>
    %237 = vector.extract_strided_slice %190 {offsets = [16, 0], sizes = [8, 64], strides = [1, 1]} : vector<32x64xf32> to vector<8x64xf32>
    %238 = arith.truncf %237 : vector<8x64xf32> to vector<8x64xbf16>
    %239 = vector.extract_strided_slice %188 {offsets = [0, 80], sizes = [64, 8], strides = [1, 1]} : vector<64x96xf32> to vector<64x8xf32>
    %240 = arith.truncf %239 : vector<64x8xf32> to vector<64x8xbf16>
    %cst_89 = arith.constant dense<0.000000e+00> : vector<64x64xf32>
    %241 = tpu.matmul %236, %238, %cst_89 {dimension_numbers = #tpu.dot_dimension_numbers<[1], [0], [0], [1], [0, 0, 1, 1], [], []>} : vector<64x8xbf16>, vector<8x64xbf16>, vector<64x64xf32> -> vector<64x64xf32>
    %cst_90 = arith.constant 0.353553385 : f32
    %242 = vector.broadcast %cst_90 : f32 to vector<64x64xf32>
    %243 = arith.mulf %241, %242 : vector<64x64xf32>
    %244 = arith.addf %243, %0 : vector<64x64xf32>
    %cst_91 = arith.constant dense<0xFF800000> : vector<64xf32>
    %245 = vector.multi_reduction <maximumf>, %244, %cst_91 [1] : vector<64x64xf32> to vector<64xf32>
    %246 = vector.shape_cast %245 : vector<64xf32> to vector<64x1xf32>
    %247 = vector.broadcast %246 : vector<64x1xf32> to vector<64x64xf32>
    %248 = arith.subf %244, %247 : vector<64x64xf32>
    %249 = math.exp %248 : vector<64x64xf32>
    %cst_92 = arith.constant dense<0.000000e+00> : vector<64xf32>
    %250 = vector.multi_reduction <add>, %249, %cst_92 [1] : vector<64x64xf32> to vector<64xf32>
    %251 = vector.shape_cast %250 : vector<64xf32> to vector<64x1xf32>
    %252 = tpu.reciprocal %251 {approx = true} : vector<64x1xf32> -> vector<64x1xf32>
    %253 = vector.broadcast %252 : vector<64x1xf32> to vector<64x64xf32>
    %254 = arith.mulf %249, %253 : vector<64x64xf32>
    %255 = arith.truncf %254 : vector<64x64xf32> to vector<64x64xbf16>
    %cst_93 = arith.constant dense<0.000000e+00> : vector<64x8xf32>
    %256 = tpu.matmul %255, %240, %cst_93 {dimension_numbers = #tpu.dot_dimension_numbers<[1], [0], [0], [1], [0, 0, 1, 1], [], []>} : vector<64x64xbf16>, vector<64x8xbf16>, vector<64x8xf32> -> vector<64x8xf32>
    %257 = vector.extract_strided_slice %188 {offsets = [0, 24], sizes = [64, 8], strides = [1, 1]} : vector<64x96xf32> to vector<64x8xf32>
    %258 = arith.truncf %257 : vector<64x8xf32> to vector<64x8xbf16>
    %259 = vector.extract_strided_slice %190 {offsets = [24, 0], sizes = [8, 64], strides = [1, 1]} : vector<32x64xf32> to vector<8x64xf32>
    %260 = arith.truncf %259 : vector<8x64xf32> to vector<8x64xbf16>
    %261 = vector.extract_strided_slice %188 {offsets = [0, 88], sizes = [64, 8], strides = [1, 1]} : vector<64x96xf32> to vector<64x8xf32>
    %262 = arith.truncf %261 : vector<64x8xf32> to vector<64x8xbf16>
    %cst_94 = arith.constant dense<0.000000e+00> : vector<64x64xf32>
    %263 = tpu.matmul %258, %260, %cst_94 {dimension_numbers = #tpu.dot_dimension_numbers<[1], [0], [0], [1], [0, 0, 1, 1], [], []>} : vector<64x8xbf16>, vector<8x64xbf16>, vector<64x64xf32> -> vector<64x64xf32>
    %cst_95 = arith.constant 0.353553385 : f32
    %264 = vector.broadcast %cst_95 : f32 to vector<64x64xf32>
    %265 = arith.mulf %263, %264 : vector<64x64xf32>
    %266 = arith.addf %265, %0 : vector<64x64xf32>
    %cst_96 = arith.constant dense<0xFF800000> : vector<64xf32>
    %267 = vector.multi_reduction <maximumf>, %266, %cst_96 [1] : vector<64x64xf32> to vector<64xf32>
    %268 = vector.shape_cast %267 : vector<64xf32> to vector<64x1xf32>
    %269 = vector.broadcast %268 : vector<64x1xf32> to vector<64x64xf32>
    %270 = arith.subf %266, %269 : vector<64x64xf32>
    %271 = math.exp %270 : vector<64x64xf32>
    %cst_97 = arith.constant dense<0.000000e+00> : vector<64xf32>
    %272 = vector.multi_reduction <add>, %271, %cst_97 [1] : vector<64x64xf32> to vector<64xf32>
    %273 = vector.shape_cast %272 : vector<64xf32> to vector<64x1xf32>
    %274 = tpu.reciprocal %273 {approx = true} : vector<64x1xf32> -> vector<64x1xf32>
    %275 = vector.broadcast %274 : vector<64x1xf32> to vector<64x64xf32>
    %276 = arith.mulf %271, %275 : vector<64x64xf32>
    %277 = arith.truncf %276 : vector<64x64xf32> to vector<64x64xbf16>
    %cst_98 = arith.constant dense<0.000000e+00> : vector<64x8xf32>
    %278 = tpu.matmul %277, %262, %cst_98 {dimension_numbers = #tpu.dot_dimension_numbers<[1], [0], [0], [1], [0, 0, 1, 1], [], []>} : vector<64x64xbf16>, vector<64x8xbf16>, vector<64x8xf32> -> vector<64x8xf32>
    %279 = tpu.concatenate %212, %234, %256, %278 in 1 : vector<64x8xf32>, vector<64x8xf32>, vector<64x8xf32>, vector<64x8xf32> -> vector<64x32xf32>
    %280 = arith.truncf %279 : vector<64x32xf32> to vector<64x32xbf16>
    %c1_99 = arith.constant 1 : index
    %c0_100 = arith.constant 0 : index
    %c0_101 = arith.constant 0 : index
    %281 = vector.load %arg5[%c1_99, %c0_100, %c0_101] : memref<2x32x32xbf16, #tpu.memory_space<vmem>>, vector<1x32x32xbf16>
    %282 = vector.shape_cast %281 : vector<1x32x32xbf16> to vector<32x32xbf16>
    %cst_102 = arith.constant dense<0.000000e+00> : vector<64x32xf32>
    %283 = tpu.matmul %280, %282, %cst_102 {dimension_numbers = #tpu.dot_dimension_numbers<[1], [0], [0], [1], [0, 0, 1, 1], [], []>} : vector<64x32xbf16>, vector<32x32xbf16>, vector<64x32xf32> -> vector<64x32xf32>
    %c1_103 = arith.constant 1 : index
    %c0_104 = arith.constant 0 : index
    %c0_105 = arith.constant 0 : index
    %284 = vector.load %arg6[%c1_103, %c0_104, %c0_105] : memref<2x1x32xf32, #tpu.memory_space<vmem>>, vector<1x1x32xf32>
    %285 = vector.shape_cast %284 : vector<1x1x32xf32> to vector<1x32xf32>
    %286 = vector.broadcast %285 : vector<1x32xf32> to vector<64x32xf32>
    %287 = arith.addf %283, %286 : vector<64x32xf32>
    %288 = arith.addf %180, %287 : vector<64x32xf32>
    %c1_106 = arith.constant 1 : index
    %c0_107 = arith.constant 0 : index
    %c0_108 = arith.constant 0 : index
    %289 = vector.load %arg7[%c1_106, %c0_107, %c0_108] : memref<2x1x32xf32, #tpu.memory_space<vmem>>, vector<1x1x32xf32>
    %290 = vector.shape_cast %289 : vector<1x1x32xf32> to vector<1x32xf32>
    %c1_109 = arith.constant 1 : index
    %c0_110 = arith.constant 0 : index
    %c0_111 = arith.constant 0 : index
    %291 = vector.load %arg8[%c1_109, %c0_110, %c0_111] : memref<2x1x32xf32, #tpu.memory_space<vmem>>, vector<1x1x32xf32>
    %292 = vector.shape_cast %291 : vector<1x1x32xf32> to vector<1x32xf32>
    %cst_112 = arith.constant dense<0.000000e+00> : vector<64xf32>
    %293 = vector.multi_reduction <add>, %288, %cst_112 [1] : vector<64x32xf32> to vector<64xf32>
    %294 = vector.shape_cast %293 : vector<64xf32> to vector<64x1xf32>
    %cst_113 = arith.constant 3.200000e+01 : f32
    %295 = vector.broadcast %cst_113 : f32 to vector<64x1xf32>
    %296 = arith.divf %294, %295 : vector<64x1xf32>
    %297 = vector.broadcast %296 : vector<64x1xf32> to vector<64x32xf32>
    %298 = arith.subf %288, %297 : vector<64x32xf32>
    %299 = arith.mulf %298, %298 : vector<64x32xf32>
    %cst_114 = arith.constant dense<0.000000e+00> : vector<64xf32>
    %300 = vector.multi_reduction <add>, %299, %cst_114 [1] : vector<64x32xf32> to vector<64xf32>
    %301 = vector.shape_cast %300 : vector<64xf32> to vector<64x1xf32>
    %cst_115 = arith.constant 3.200000e+01 : f32
    %302 = vector.broadcast %cst_115 : f32 to vector<64x1xf32>
    %303 = arith.divf %301, %302 : vector<64x1xf32>
    %304 = vector.broadcast %296 : vector<64x1xf32> to vector<64x32xf32>
    %305 = arith.subf %288, %304 : vector<64x32xf32>
    %cst_116 = arith.constant 9.99999974E-6 : f32
    %306 = vector.broadcast %cst_116 : f32 to vector<64x1xf32>
    %307 = arith.addf %303, %306 : vector<64x1xf32>
    %308 = math.rsqrt %307 : vector<64x1xf32>
    %309 = vector.broadcast %308 : vector<64x1xf32> to vector<64x32xf32>
    %310 = arith.mulf %305, %309 : vector<64x32xf32>
    %311 = vector.broadcast %290 : vector<1x32xf32> to vector<64x32xf32>
    %312 = arith.mulf %310, %311 : vector<64x32xf32>
    %313 = vector.broadcast %292 : vector<1x32xf32> to vector<64x32xf32>
    %314 = arith.addf %312, %313 : vector<64x32xf32>
    %315 = arith.truncf %314 : vector<64x32xf32> to vector<64x32xbf16>
    %c1_117 = arith.constant 1 : index
    %c0_118 = arith.constant 0 : index
    %c0_119 = arith.constant 0 : index
    %316 = vector.load %arg9[%c1_117, %c0_118, %c0_119] : memref<2x32x32xbf16, #tpu.memory_space<vmem>>, vector<1x32x32xbf16>
    %317 = vector.shape_cast %316 : vector<1x32x32xbf16> to vector<32x32xbf16>
    %cst_120 = arith.constant dense<0.000000e+00> : vector<64x32xf32>
    %318 = tpu.matmul %315, %317, %cst_120 {dimension_numbers = #tpu.dot_dimension_numbers<[1], [0], [0], [1], [0, 0, 1, 1], [], []>} : vector<64x32xbf16>, vector<32x32xbf16>, vector<64x32xf32> -> vector<64x32xf32>
    %c1_121 = arith.constant 1 : index
    %c0_122 = arith.constant 0 : index
    %c0_123 = arith.constant 0 : index
    %319 = vector.load %arg10[%c1_121, %c0_122, %c0_123] : memref<2x1x32xf32, #tpu.memory_space<vmem>>, vector<1x1x32xf32>
    %320 = vector.shape_cast %319 : vector<1x1x32xf32> to vector<1x32xf32>
    %321 = vector.broadcast %320 : vector<1x32xf32> to vector<64x32xf32>
    %322 = arith.addf %318, %321 : vector<64x32xf32>
    %cst_124 = arith.constant 0.000000e+00 : f32
    %323 = vector.broadcast %cst_124 : f32 to vector<64x32xf32>
    %324 = arith.maximumf %322, %323 : vector<64x32xf32>
    %325 = arith.truncf %324 : vector<64x32xf32> to vector<64x32xbf16>
    %c1_125 = arith.constant 1 : index
    %c0_126 = arith.constant 0 : index
    %c0_127 = arith.constant 0 : index
    %326 = vector.load %arg11[%c1_125, %c0_126, %c0_127] : memref<2x32x32xbf16, #tpu.memory_space<vmem>>, vector<1x32x32xbf16>
    %327 = vector.shape_cast %326 : vector<1x32x32xbf16> to vector<32x32xbf16>
    %cst_128 = arith.constant dense<0.000000e+00> : vector<64x32xf32>
    %328 = tpu.matmul %325, %327, %cst_128 {dimension_numbers = #tpu.dot_dimension_numbers<[1], [0], [0], [1], [0, 0, 1, 1], [], []>} : vector<64x32xbf16>, vector<32x32xbf16>, vector<64x32xf32> -> vector<64x32xf32>
    %c1_129 = arith.constant 1 : index
    %c0_130 = arith.constant 0 : index
    %c0_131 = arith.constant 0 : index
    %329 = vector.load %arg12[%c1_129, %c0_130, %c0_131] : memref<2x1x32xf32, #tpu.memory_space<vmem>>, vector<1x1x32xf32>
    %330 = vector.shape_cast %329 : vector<1x1x32xf32> to vector<1x32xf32>
    %331 = vector.broadcast %330 : vector<1x32xf32> to vector<64x32xf32>
    %332 = arith.addf %328, %331 : vector<64x32xf32>
    %333 = arith.addf %314, %332 : vector<64x32xf32>
    %c1_132 = arith.constant 1 : index
    %c0_133 = arith.constant 0 : index
    %c0_134 = arith.constant 0 : index
    %334 = vector.load %arg13[%c1_132, %c0_133, %c0_134] : memref<2x1x32xf32, #tpu.memory_space<vmem>>, vector<1x1x32xf32>
    %335 = vector.shape_cast %334 : vector<1x1x32xf32> to vector<1x32xf32>
    %c1_135 = arith.constant 1 : index
    %c0_136 = arith.constant 0 : index
    %c0_137 = arith.constant 0 : index
    %336 = vector.load %arg14[%c1_135, %c0_136, %c0_137] : memref<2x1x32xf32, #tpu.memory_space<vmem>>, vector<1x1x32xf32>
    %337 = vector.shape_cast %336 : vector<1x1x32xf32> to vector<1x32xf32>
    %cst_138 = arith.constant dense<0.000000e+00> : vector<64xf32>
    %338 = vector.multi_reduction <add>, %333, %cst_138 [1] : vector<64x32xf32> to vector<64xf32>
    %339 = vector.shape_cast %338 : vector<64xf32> to vector<64x1xf32>
    %cst_139 = arith.constant 3.200000e+01 : f32
    %340 = vector.broadcast %cst_139 : f32 to vector<64x1xf32>
    %341 = arith.divf %339, %340 : vector<64x1xf32>
    %342 = vector.broadcast %341 : vector<64x1xf32> to vector<64x32xf32>
    %343 = arith.subf %333, %342 : vector<64x32xf32>
    %344 = arith.mulf %343, %343 : vector<64x32xf32>
    %cst_140 = arith.constant dense<0.000000e+00> : vector<64xf32>
    %345 = vector.multi_reduction <add>, %344, %cst_140 [1] : vector<64x32xf32> to vector<64xf32>
    %346 = vector.shape_cast %345 : vector<64xf32> to vector<64x1xf32>
    %cst_141 = arith.constant 3.200000e+01 : f32
    %347 = vector.broadcast %cst_141 : f32 to vector<64x1xf32>
    %348 = arith.divf %346, %347 : vector<64x1xf32>
    %349 = vector.broadcast %341 : vector<64x1xf32> to vector<64x32xf32>
    %350 = arith.subf %333, %349 : vector<64x32xf32>
    %cst_142 = arith.constant 9.99999974E-6 : f32
    %351 = vector.broadcast %cst_142 : f32 to vector<64x1xf32>
    %352 = arith.addf %348, %351 : vector<64x1xf32>
    %353 = math.rsqrt %352 : vector<64x1xf32>
    %354 = vector.broadcast %353 : vector<64x1xf32> to vector<64x32xf32>
    %355 = arith.mulf %350, %354 : vector<64x32xf32>
    %356 = vector.broadcast %335 : vector<1x32xf32> to vector<64x32xf32>
    %357 = arith.mulf %355, %356 : vector<64x32xf32>
    %358 = vector.broadcast %337 : vector<1x32xf32> to vector<64x32xf32>
    %359 = arith.addf %357, %358 : vector<64x32xf32>
    %360 = vector.extract_strided_slice %359 {offsets = [0, 1], sizes = [64, 31], strides = [1, 1]} : vector<64x32xf32> to vector<64x31xf32>
    %361 = vector.extract_strided_slice %359 {offsets = [0, 0], sizes = [64, 1], strides = [1, 1]} : vector<64x32xf32> to vector<64x1xf32>
    %362 = tpu.concatenate %360, %361 in 1 : vector<64x31xf32>, vector<64x1xf32> -> vector<64x32xf32>
    %363 = arith.maximumf %359, %362 : vector<64x32xf32>
    %364 = vector.extract_strided_slice %363 {offsets = [1, 0], sizes = [63, 32], strides = [1, 1]} : vector<64x32xf32> to vector<63x32xf32>
    %365 = vector.extract_strided_slice %363 {offsets = [0, 0], sizes = [1, 32], strides = [1, 1]} : vector<64x32xf32> to vector<1x32xf32>
    %366 = tpu.concatenate %364, %365 in 0 : vector<63x32xf32>, vector<1x32xf32> -> vector<64x32xf32>
    %367 = arith.maximumf %363, %366 : vector<64x32xf32>
    %c0_143 = arith.constant 0 : index
    %c0_144 = arith.constant 0 : index
    %368 = vector.load %arg2[%c0_143, %c0_144] : memref<16x32xf32, #tpu.memory_space<vmem>>, vector<16x32xf32>
    %369 = vector.extract_strided_slice %367 {offsets = [0, 0], sizes = [16, 32], strides = [1, 1]} : vector<64x32xf32> to vector<16x32xf32>
    %370 = arith.mulf %369, %368 : vector<16x32xf32>
    %371 = vector.extract_strided_slice %367 {offsets = [32, 0], sizes = [16, 32], strides = [1, 1]} : vector<64x32xf32> to vector<16x32xf32>
    %372 = arith.mulf %371, %368 : vector<16x32xf32>
    %373 = arith.mulf %370, %372 : vector<16x32xf32>
    %cst_145 = arith.constant dense<0.000000e+00> : vector<16xf32>
    %374 = vector.multi_reduction <add>, %373, %cst_145 [1] : vector<16x32xf32> to vector<16xf32>
    %375 = vector.shape_cast %374 : vector<16xf32> to vector<16x1xf32>
    %cst_146 = arith.constant dense<0.000000e+00> : vector<1xf32>
    %376 = vector.multi_reduction <add>, %375, %cst_146 [0] : vector<16x1xf32> to vector<1xf32>
    %377 = vector.shape_cast %376 : vector<1xf32> to vector<1x1xf32>
    %378 = arith.mulf %370, %370 : vector<16x32xf32>
    %cst_147 = arith.constant dense<0.000000e+00> : vector<16xf32>
    %379 = vector.multi_reduction <add>, %378, %cst_147 [1] : vector<16x32xf32> to vector<16xf32>
    %380 = vector.shape_cast %379 : vector<16xf32> to vector<16x1xf32>
    %cst_148 = arith.constant dense<0.000000e+00> : vector<1xf32>
    %381 = vector.multi_reduction <add>, %380, %cst_148 [0] : vector<16x1xf32> to vector<1xf32>
    %382 = vector.shape_cast %381 : vector<1xf32> to vector<1x1xf32>
    %383 = math.sqrt %382 : vector<1x1xf32>
    %384 = arith.mulf %372, %372 : vector<16x32xf32>
    %cst_149 = arith.constant dense<0.000000e+00> : vector<16xf32>
    %385 = vector.multi_reduction <add>, %384, %cst_149 [1] : vector<16x32xf32> to vector<16xf32>
    %386 = vector.shape_cast %385 : vector<16xf32> to vector<16x1xf32>
    %cst_150 = arith.constant dense<0.000000e+00> : vector<1xf32>
    %387 = vector.multi_reduction <add>, %386, %cst_150 [0] : vector<16x1xf32> to vector<1xf32>
    %388 = vector.shape_cast %387 : vector<1xf32> to vector<1x1xf32>
    %389 = math.sqrt %388 : vector<1x1xf32>
    %cst_151 = arith.constant 9.99999993E-9 : f32
    %390 = vector.broadcast %cst_151 : f32 to vector<1x1xf32>
    %391 = arith.maximumf %383, %390 : vector<1x1xf32>
    %cst_152 = arith.constant 9.99999993E-9 : f32
    %392 = vector.broadcast %cst_152 : f32 to vector<1x1xf32>
    %393 = arith.maximumf %389, %392 : vector<1x1xf32>
    %394 = arith.mulf %391, %393 : vector<1x1xf32>
    %395 = arith.divf %377, %394 : vector<1x1xf32>
    %396 = vector.extract_strided_slice %367 {offsets = [16, 0], sizes = [16, 32], strides = [1, 1]} : vector<64x32xf32> to vector<16x32xf32>
    %397 = arith.mulf %396, %368 : vector<16x32xf32>
    %398 = vector.extract_strided_slice %367 {offsets = [48, 0], sizes = [16, 32], strides = [1, 1]} : vector<64x32xf32> to vector<16x32xf32>
    %399 = arith.mulf %398, %368 : vector<16x32xf32>
    %400 = arith.mulf %397, %399 : vector<16x32xf32>
    %cst_153 = arith.constant dense<0.000000e+00> : vector<16xf32>
    %401 = vector.multi_reduction <add>, %400, %cst_153 [1] : vector<16x32xf32> to vector<16xf32>
    %402 = vector.shape_cast %401 : vector<16xf32> to vector<16x1xf32>
    %cst_154 = arith.constant dense<0.000000e+00> : vector<1xf32>
    %403 = vector.multi_reduction <add>, %402, %cst_154 [0] : vector<16x1xf32> to vector<1xf32>
    %404 = vector.shape_cast %403 : vector<1xf32> to vector<1x1xf32>
    %405 = arith.mulf %397, %397 : vector<16x32xf32>
    %cst_155 = arith.constant dense<0.000000e+00> : vector<16xf32>
    %406 = vector.multi_reduction <add>, %405, %cst_155 [1] : vector<16x32xf32> to vector<16xf32>
    %407 = vector.shape_cast %406 : vector<16xf32> to vector<16x1xf32>
    %cst_156 = arith.constant dense<0.000000e+00> : vector<1xf32>
    %408 = vector.multi_reduction <add>, %407, %cst_156 [0] : vector<16x1xf32> to vector<1xf32>
    %409 = vector.shape_cast %408 : vector<1xf32> to vector<1x1xf32>
    %410 = math.sqrt %409 : vector<1x1xf32>
    %411 = arith.mulf %399, %399 : vector<16x32xf32>
    %cst_157 = arith.constant dense<0.000000e+00> : vector<16xf32>
    %412 = vector.multi_reduction <add>, %411, %cst_157 [1] : vector<16x32xf32> to vector<16xf32>
    %413 = vector.shape_cast %412 : vector<16xf32> to vector<16x1xf32>
    %cst_158 = arith.constant dense<0.000000e+00> : vector<1xf32>
    %414 = vector.multi_reduction <add>, %413, %cst_158 [0] : vector<16x1xf32> to vector<1xf32>
    %415 = vector.shape_cast %414 : vector<1xf32> to vector<1x1xf32>
    %416 = math.sqrt %415 : vector<1x1xf32>
    %cst_159 = arith.constant 9.99999993E-9 : f32
    %417 = vector.broadcast %cst_159 : f32 to vector<1x1xf32>
    %418 = arith.maximumf %410, %417 : vector<1x1xf32>
    %cst_160 = arith.constant 9.99999993E-9 : f32
    %419 = vector.broadcast %cst_160 : f32 to vector<1x1xf32>
    %420 = arith.maximumf %416, %419 : vector<1x1xf32>
    %421 = arith.mulf %418, %420 : vector<1x1xf32>
    %422 = arith.divf %404, %421 : vector<1x1xf32>
    %423 = tpu.concatenate %395, %422 in 0 : vector<1x1xf32>, vector<1x1xf32> -> vector<2x1xf32>
    %c0_161 = arith.constant 0 : index
    %c0_162 = arith.constant 0 : index
    %424 = vector.load %arg15[%c0_161, %c0_162] : memref<2x1xf32, #tpu.memory_space<vmem>>, vector<2x1xf32>
    tpu.vector_store %arg15[%c0_161, %c0_162], %423 {strides = array<i32>} : memref<2x1xf32, #tpu.memory_space<vmem>>, vector<2x1xf32>,
    return
  }
}

</mosaic_0001>

<bundles_post_ra>
// kernel: tpu_custom_call.1
= control target key start
LH: loop header
LB: loop body
LE: loop exit
PB: predicated region body
PF: predicated region fallthrough
CT: control target
= control target key end

     0   :  { %20 = vsyncpa [#allocation3], 0  ;;  %s6812_s0 = inlined_call_operand.vmem [shape: f32[64,32], index: 0, kind: input, shape index: {}]   ;;  %s6813_s1 = inlined_call_operand.vmem [shape: f32[64,64], index: 1, kind: input, shape index: {}]   ;;  %s6814_s2 = inlined_call_operand.hbm [shape: f32[16,32], index: 2, kind: input, shape index: {}]   ;;  %s6815_s3 = inlined_call_operand.vmem [shape: bf16[2,32,96], index: 3, kind: input, shape index: {}]   ;;  %s6816_s4 = inlined_call_operand.vmem [shape: f32[2,1,96], index: 4, kind: input, shape index: {}]   ;;  %s6817_s5 = inlined_call_operand.hbm [shape: bf16[2,32,32], index: 5, kind: input, shape index: {}]   ;;  %s6818_s6 = inlined_call_operand.vmem [shape: f32[2,1,32], index: 6, kind: input, shape index: {}]   ;;  %s6819_s7 = inlined_call_operand.hbm [shape: f32[2,1,32], index: 7, kind: input, shape index: {}]   ;;  %s6820_s8 = inlined_call_operand.vmem [shape: f32[2,1,32], index: 8, kind: input, shape index: {}]   ;;  %s6821_s9 = inlined_call_operand.hbm [shape: bf16[2,32,32], index: 9, kind: input, shape index: {}]   ;;  %s6822_s10 = inlined_call_operand.vmem [shape: f32[2,1,32], index: 10, kind: input, shape index: {}]   ;;  %s6823_s11 = inlined_call_operand.hbm [shape: bf16[2,32,32], index: 11, kind: input, shape index: {}]   ;;  %s6824_s12 = inlined_call_operand.vmem [shape: f32[2,1,32], index: 12, kind: input, shape index: {}]   ;;  %s6825_s13 = inlined_call_operand.hbm [shape: f32[2,1,32], index: 13, kind: input, shape index: {}]   ;;  %s6826_s14 = inlined_call_operand.vmem [shape: f32[2,1,32], index: 14, kind: input, shape index: {}]   ;;  %s6827_s15 = inlined_call_operand.vmem [shape: f32[2,1], index: 15, kind: output, shape index: {}]  }
   0x1   :  { %21 = vsyncpa [#allocation5], 0 }
   0x2   :  { %22 = vsyncpa [#allocation8], 0  ;;  %s49_s20 = sshll.u32 %s6817_s5, 4  ;;  %s50_s20 = int_to_ptr.hbm [resolvable:$true] %s49_s20 }
   0x3   :  { %23 = vsyncpa [#allocation11], 0  ;;  %s4813_s21 = smov [#allocation4]   ;;  %s79_s25 = sshll.u32 %s6821_s9, 4  ;;  %s80_s25 = int_to_ptr.hbm [resolvable:$true] %s79_s25 }
   0x4   :  { %s51_s22 = sshll.u32 %s4813_s21, 4  ;;  %s4814_s26 = smov 64   ;;  %s52_s22 = int_to_ptr.vmem [resolvable:$true] %s51_s22 }
   0x5   :  { %s4815_s27 = smov 4   ;;  %s4816_s28 = smov [#allocation7]  }
   0x6   :  { %57 = dma.hbm_to_vmem [thread:$0]  %s50_s20, 512, %s52_s22, [#allocation5], %s4814_s26, %s4814_s26, %s4815_s27  }
   0x7   :  { %s81_s29 = sshll.u32 %s4816_s28, 4  ;;  %s32_s16 = sshll.u32 %s6814_s2, 4  ;;  %s82_s29 = int_to_ptr.vmem [resolvable:$true] %s81_s29  ;;  %s33_s16 = int_to_ptr.hbm [resolvable:$true] %s32_s16 }
   0x8   :  { %87 = dma.hbm_to_vmem [thread:$0]  %s80_s25, 512, %s82_s29, [#allocation8], %s4814_s26, %s4814_s26, %s4815_s27  }
   0x9   :  { %s4817_s9 = smov [#allocation2]   ;;  %s64_s20 = sshll.u32 %s6819_s7, 4  ;;  %s65_s20 = int_to_ptr.hbm [resolvable:$true] %s64_s20 }
   0xa   :  { %s34_s17 = sshll.u32 %s4817_s9, 4  ;;  %s4818_s21 = smov 128   ;;  %s35_s17 = int_to_ptr.vmem [resolvable:$true] %s34_s17 }
   0xb   :  { %s4819_s22 = smov 8   ;;  %s4820_s23 = smov [#allocation6]  }
   0xc   :  { %40 = dma.hbm_to_vmem [thread:$0]  %s33_s16, 256, %s35_s17, [#allocation3], %s4818_s21, %s4818_s21, %s4819_s22  }
   0xd   :  { %s66_s2 = sshll.u32 %s4820_s23, 4  ;;  %s4821_s24 = smov 16   ;;  %s67_s2 = int_to_ptr.vmem [resolvable:$true] %s66_s2 }
   0xe   :  { %s4822_s28 = smov 1   ;;  %s94_s30 = sshll.u32 %s6823_s11, 4  ;;  %s95_s30 = int_to_ptr.hbm [resolvable:$true] %s94_s30 }
   0xf   :  { %72 = dma.hbm_to_vmem [thread:$0]  %s65_s20, 32, %s67_s2, [#allocation5], %s4821_s24, %s4821_s24, %s4822_s28  }
  0x10   :  { %s4823_s5 = smov [#allocation9]   ;;  %s109_s16 = sshll.u32 %s6825_s13, 4  ;;  %s110_s16 = int_to_ptr.hbm [resolvable:$true] %s109_s16 }
  0x11   :  { %s96_s7 = sshll.u32 %s4823_s5, 4  ;;  %s4824_s17 = smov [#allocation10]   ;;  %s97_s7 = int_to_ptr.vmem [resolvable:$true] %s96_s7 }
  0x12   :  { %102 = dma.hbm_to_vmem [thread:$0]  %s95_s30, 512, %s97_s7, [#allocation8], %s4814_s26, %s4814_s26, %s4815_s27  }
  0x13   :  { %s111_s19 = sshll.u32 %s4824_s17, 4  ;;  %s112_s19 = int_to_ptr.vmem [resolvable:$true] %s111_s19 }
  0x14   :  { %117 = dma.hbm_to_vmem [thread:$0]  %s110_s16, 32, %s112_s19, [#allocation11], %s4821_s24, %s4821_s24, %s4822_s28  }
  0x15   :  { %4805 = dma.done.wait [#allocation3], 256  }
  0x16   :  { %4806 = vsyncadd [#allocation3], 4294967040 }
  0x17   :  { %4807 = dma.done.wait [#allocation5], 544  }
  0x18   :  { %4808 = vsyncadd [#allocation5], 4294966752 }
  0x19   :  { %4809 = dma.done.wait [#allocation8], 1024  }
  0x1a   :  { %4810 = vsyncadd [#allocation8], 4294966272 }
  0x1b   :  { %4811 = dma.done.wait [#allocation11], 32  }
  0x1c   :  { %4812 = vsyncadd [#allocation11], 4294967264  ;;  %v4116_v0 = vld [vmem:[%s6815_s3 + $0x8] sm:$0xff]  ;;  %v4115_v1 = vld [vmem:[%s6815_s3] sm:$0xff]  ;;  %vm185_vm0 = vcmask 261120   ;;  %s4825_s21 = smov 96  }
  0x1d   :  { %204 = vmatpush.bf16.msra.mxu0 %v4116_v0  ;;  %v153_v2 = vld [vmem:[%s6812_s0] sm:$0xff]  ;;  %v154_v3 = vld [vmem:[%s6812_s0 + $0x8] sm:$0xff]  ;;  %v155_v5 = vld [vmem:[%s6812_s0 + $0x10] sm:$0xff]  ;;  %s4826_s23 = smov 120   ;;  %s4827_s2 = smov 104   ;;  %vm309_vm1 = vcmask 1043456  }
  0x1e   :  { %v161_v4 = vpack.c.bf16 %v154_v3, %v153_v2  ;;  %v156_v6 = vld [vmem:[%s6812_s0 + $0x18] sm:$0xff]  ;;  %v157_v8 = vld [vmem:[%s6812_s0 + $0x20] sm:$0xff]  ;;  %v158_v9 = vld [vmem:[%s6812_s0 + $0x28] sm:$0xff]  ;;  %vm296_vm2 = vcmask 64512   ;;  %s4828_s28 = smov 112   ;;  %vm358_vm3 = vcmask 523264  }
  0x1f   :  { %v162_v7 = vpack.c.bf16 %v156_v6, %v155_v5  ;;  %v163_v10 = vpack.c.bf16 %v158_v9, %v157_v8  ;;  %v159_v11 = vld [vmem:[%s6812_s0 + $0x30] sm:$0xff]  ;;  %v160_v12 = vld [vmem:[%s6812_s0 + $0x38] sm:$0xff]  ;;  %v4295_v14 = vld [vmem:[%s6816_s4] ss:$0 sm:$0xff]  ;;  %s4829_s30 = smov 56   ;;  %s4830_s5 = smov 48  }
  0x20   :  { %v164_v13 = vpack.c.bf16 %v160_v12, %v159_v11  ;;  %v5046_v58 = vld [vmem:[%s6813_s1] sm:$0xff]  ;;  %v5053_v63 = vld [vmem:[%s6813_s1 + $0x8] sm:$0xff]  ;;  %v5062_v8 = vld [vmem:[%s6813_s1 + $0x18] sm:$0xff]  ;;  %s4831_s7 = smov 40   ;;  %s4832_s9 = smov 24   ;;  %vm1254_vm4 = vcmask 130048  }
  0x21   :  { %205 = vmatpush.bf16.msra.mxu0 %v4115_v1  ;;  %vm1263_vm5 = vcmask 195584   ;;  %s4834_s20 = smov 127  }
  0x24   :  { %3953 = vmatmul.msk.bf16.vlgmr.msra.gmra.mxu0 %vm185_vm0, %v161_v4 }
  0x34   :  { %3954 = vmatmul.msk.bf16.gmra.mxu0 %vm185_vm0, %v162_v7 }
  0x44   :  { %3955 = vmatmul.msk.bf16.gmra.mxu0 %vm185_vm0, %v163_v10 }
  0x54   :  { %3956 = vmatmul.msk.bf16.gmra.mxu0 %vm185_vm0, %v164_v13 }
  0xa1   :  { %v207_v15 = vpop.f32.mrf.mxu0 }
  0xa2   :  { %v208_v16 = vadd.f32 %v4295_v14, %v207_v15 }
  0xa4   :  { %235 = vrot.lane.b32.xlu0 %v208_v16, %s4825_s21 }
  0xa9   :  { %v209_v17 = vpop.f32.mrf.mxu0 }
  0xaa   :  { %v210_v18 = vadd.f32 %v4295_v14, %v209_v17 }
  0xac   :  { %v4986_v19 = vpack.c.bf16 %v210_v18, %v208_v16  ;;  %237 = vrot.lane.b32.xlu0 %v210_v18, %s4825_s21  ;;  %v5079_v16 = vld [vmem:[%s6813_s1 + $0x28] sm:$0xff] }
  0xb1   :  { %v212_v20 = vpop.f32.mrf.mxu0 }
  0xb2   :  { %v213_v21 = vadd.f32 %v4295_v14, %v212_v20 }
  0xb4   :  { %239 = vrot.lane.b32.xlu1 %v213_v21, %s4825_s21 }
  0xb9   :  { %v214_v22 = vpop.f32.mrf.mxu0 }
  0xba   :  { %v215_v23 = vadd.f32 %v4295_v14, %v214_v22 }
  0xbc   :  { %241 = vrot.lane.b32.xlu1 %v215_v23, %s4825_s21  ;;  %v5001_v34 = vpack.c.bf16 %v215_v23, %v213_v21  ;;  %v5089_v23 = vld [vmem:[%s6813_s1 + $0x38] sm:$0xff] }
  0xc1   :  { %v217_v24 = vpop.f32.mrf.mxu0 }
  0xc2   :  { %v218_v25 = vadd.f32 %v4295_v14, %v217_v24 }
  0xc4   :  { %243 = vrot.lane.b32.xlu2 %v218_v25, %s4825_s21 }
  0xc9   :  { %v219_v26 = vpop.f32.mrf.mxu0 }
  0xca   :  { %v220_v27 = vadd.f32 %v4295_v14, %v219_v26 }
  0xcc   :  { %245 = vrot.lane.b32.xlu2 %v220_v27, %s4825_s21  ;;  %v4999_v33 = vpack.c.bf16 %v220_v27, %v218_v25  ;;  %v5097_v27 = vld [vmem:[%s6813_s1 + $0x10] sm:$0xff] }
  0xd1   :  { %v222_v28 = vpop.f32.mrf.mxu0 }
  0xd2   :  { %v223_v29 = vadd.f32 %v4295_v14, %v222_v28 }
  0xd4   :  { %247 = vrot.lane.b32.xlu0 %v223_v29, %s4825_s21 }
  0xd9   :  { %v224_v30 = vpop.f32.mrf.mxu0 }
  0xda   :  { %v225_v31 = vadd.f32 %v4295_v14, %v224_v30 }
  0xdc   :  { %v4994_v32 = vpack.c.bf16 %v225_v31, %v223_v29  ;;  %249 = vrot.lane.b32.xlu1 %v225_v31, %s4825_s21 }
  0xde   :  { %461 = vrot.lane.b32.xlu0 %v4994_v32, %s4814_s26 }
  0xe4   :  { %459 = vrot.lane.b32.xlu1 %v4999_v33, %s4814_s26 }
  0xe6   :  { %457 = vrot.lane.b32.xlu0 %v5001_v34, %s4814_s26 }
  0xec   :  { %515 = vrot.lane.b32.xlu1 %v4994_v32, %s4826_s23 }
  0xee   :  { %509 = vrot.lane.b32.xlu0 %v4986_v19, %s4826_s23 }
  0xf4   :  { %937 = vrot.lane.b32.xlu1 %v4986_v19, %s4827_s2 }
  0xf6   :  { %511 = vrot.lane.b32.xlu0 %v5001_v34, %s4826_s23 }
  0xfc   :  { %939 = vrot.lane.b32.xlu1 %v5001_v34, %s4827_s2 }
 0x116   :  { %v236_v35 = vpop.permute.xlu0 %235 }
 0x117   :  { %259 = vxpose.xlu2.b32.start [1/8] (short) (narrow) %v236_v35, 32  ;;  %v5106_v35 = vld [vmem:[%s6813_s1 + $0x20] sm:$0xff] }
 0x11e   :  { %v238_v36 = vpop.permute.xlu0 %237  ;;  %v244_v39 = vpop.permute.xlu2 %243 }
 0x11f   :  { %260 = vxpose.xlu2.b32.cont [2/8] (short) (narrow) %v238_v36, 32 }
 0x126   :  { %v240_v37 = vpop.permute.xlu1 %239  ;;  %v246_v40 = vpop.permute.xlu2 %245 }
 0x127   :  { %261 = vxpose.xlu2.b32.cont [3/8] (short) (narrow) %v240_v37, 32 }
 0x12e   :  { %v242_v38 = vpop.permute.xlu1 %241 }
 0x12f   :  { %262 = vxpose.xlu2.b32.cont [4/8] (short) (narrow) %v242_v38, 32 }
 0x137   :  { %263 = vxpose.xlu2.b32.cont [5/8] (short) (narrow) %v244_v39, 32  ;;  %v5113_v39 = vld [vmem:[%s6813_s1 + $0x30] sm:$0xff] }
 0x13f   :  { %264 = vxpose.xlu2.b32.cont [6/8] (short) (narrow) %v246_v40, 32 }
 0x146   :  { %v248_v41 = vpop.permute.xlu0 %247 }
 0x147   :  { %265 = vxpose.xlu2.b32.cont [7/8] (short) (narrow) %v248_v41, 32 }
 0x14e   :  { %v250_v42 = vpop.permute.xlu1 %249 }
 0x14f   :  { %266 = vxpose.xlu2.b32.end [8/8] (short) (narrow) %v250_v42, 32 }
 0x150   :  { %v462_v43 = vpop.permute.xlu0 %461 }
 0x151   :  { %483 = vmatpush.bf16.msra.mxu2 %v462_v43 }
 0x156   :  { %v460_v44 = vpop.permute.xlu1 %459 }
 0x157   :  { %484 = vmatpush.bf16.msra.mxu2 %v460_v44 }
 0x158   :  { %v458_v45 = vpop.permute.xlu0 %457 }
 0x15b   :  { %485 = vmatpush.bf16.msra.mxu2 %v458_v45 }
 0x15e   :  { %v516_v42 = vpop.permute.xlu1 %515 }
 0x160   :  { %v510_v52 = vpop.permute.xlu0 %509 }
 0x166   :  { %v5120_v43 = vpop.permute.xlu1 %937 }
 0x168   :  { %v512_v53 = vpop.permute.xlu0 %511 }
 0x16e   :  { %v5122_v44 = vpop.permute.xlu1 %939 }
 0x1b0   :  { %v275_v46 = vpop.trf.xlu2 }
 0x1b1   :  { %v295_v47 = vpack.c.bf16 %v275_v46, %v275_v46 }
 0x1b3   :  { %v311_v48 = vsel %vm309_vm1, %v295_v47, 0 }
 0x1b4   :  { %320 = vmatpush.bf16.msra.mxu1 %v311_v48 }
 0x1b7   :  { %3957 = vmatmul.msk.bf16.vlgmr.msra.gmra.mxu1 %vm296_vm2, %v4986_v19 }
 0x1b8   :  { %v276_v49 = vpop.trf.xlu2  ;;  %455 = vrot.lane.b32.xlu2 %v4986_v19, %s4814_s26 }
 0x1b9   :  { %v508_v50 = vpack.c.bf16 %v276_v49, %v276_v49 }
 0x1bb   :  { %v530_v51 = vsel %vm309_vm1, %v508_v50, 0 }
 0x1bc   :  { %539 = vmatpush.bf16.msra.mxu3 %v530_v51 }
 0x1bf   :  { %3965 = vmatmul.msk.bf16.vlgmr.msra.gmra.mxu3 %vm296_vm2, %v510_v52 }
 0x1c0   :  { %723 = vrot.lane.b32.xlu2 %v4986_v19, %s4828_s28  ;;  %v5039_v54 = vpop.trf.xlu2 }
 0x1c1   :  { %v722_v50 = vpack.c.bf16 %v5039_v54, %v5039_v54 }
 0x1c7   :  { %3958 = vmatmul.msk.bf16.gmra.mxu1 %vm296_vm2, %v5001_v34 }
 0x1c8   :  { %725 = vrot.lane.b32.xlu2 %v5001_v34, %s4828_s28  ;;  %v5041_v55 = vpop.trf.xlu2 }
 0x1cf   :  { %3966 = vmatmul.msk.bf16.gmra.mxu3 %vm296_vm2, %v512_v53 }
 0x1d0   :  { %727 = vrot.lane.b32.xlu2 %v4999_v33, %s4828_s28 }
 0x1d7   :  { %3959 = vmatmul.msk.bf16.gmra.mxu1 %vm296_vm2, %v4999_v33 }
 0x1d8   :  { %943 = vrot.lane.b32.xlu2 %v4994_v32, %s4827_s2 }
 0x1e7   :  { %3960 = vmatmul.msk.bf16.gmra.mxu1 %vm296_vm2, %v4994_v32 }
 0x212   :  { %v456_v56 = vpop.permute.xlu2 %455 }
 0x213   :  { %486 = vmatpush.bf16.msra.mxu2 %v456_v56  ;;  %v744_v56 = vsel %vm309_vm1, %v722_v50, 0 }
 0x214   :  { %753 = vmatpush.bf16.msrb.mxu3 %v744_v56 }
 0x21a   :  { %v724_v54 = vpop.permute.xlu2 %723 }
 0x234   :  { %v322_v57 = vpop.f32.mrf.mxu1 }
 0x235   :  { %v342_v59 = vmul.f32 0.35355338, %v322_v57 }
 0x237   :  { %v350_v60 = vadd.f32 %v342_v59, %v5046_v58 }
 0x239   :  { %v359_v61 = vsel %vm358_vm3, %v350_v60, -inf }
 0x23a   :  { %360 = vmax.xlane.f32.xlu0 %v359_v61 }
 0x23c   :  { %v324_v62 = vpop.f32.mrf.mxu1 }
 0x23d   :  { %v343_v0 = vmul.f32 0.35355338, %v324_v62 }
 0x23f   :  { %v351_v1 = vadd.f32 %v343_v0, %v5053_v63 }
 0x241   :  { %v362_v2 = vsel %vm358_vm3, %v351_v1, -inf }
 0x242   :  { %v5057_v3 = vpop.f32.mrf.mxu3  ;;  %363 = vmax.xlane.f32.xlu1 %v362_v2 }
 0x244   :  { %v327_v4 = vpop.f32.mrf.mxu1 }
 0x245   :  { %v344_v25 = vmul.f32 0.35355338, %v327_v4 }
 0x247   :  { %v352_v29 = vadd.f32 %v344_v25, %v5097_v27 }
 0x249   :  { %v365_v31 = vsel %vm358_vm3, %v352_v29, -inf }
 0x24a   :  { %v543_v5 = vpop.f32.mrf.mxu3 }
 0x24b   :  { %v562_v6 = vmul.f32 0.35355338, %v543_v5 }
 0x24c   :  { %v329_v7 = vpop.f32.mrf.mxu1 }
 0x24d   :  { %v345_v9 = vmul.f32 0.35355338, %v329_v7  ;;  %v5065_v10 = vadd.f32 %v562_v6, %v5053_v63 }
 0x24e   :  { %513 = vrot.lane.b32.xlu0 %v4999_v33, %s4826_s23 }
 0x24f   :  { %v580_v11 = vsel %vm358_vm3, %v5065_v10, -inf  ;;  %v5072_v12 = vadd.f32 %v345_v9, %v5062_v8 }
 0x250   :  { %581 = vmax.xlane.f32.xlu2 %v580_v11 }
 0x251   :  { %v368_v13 = vsel %vm358_vm3, %v5072_v12, -inf }
 0x252   :  { %369 = vmax.xlane.f32.xlu1 %v368_v13 }
 0x254   :  { %v332_v14 = vpop.f32.mrf.mxu1 }
 0x255   :  { %v346_v30 = vmul.f32 0.35355338, %v332_v14 }
 0x257   :  { %v354_v36 = vadd.f32 %v346_v30, %v5106_v35 }
 0x259   :  { %v371_v38 = vsel %vm358_vm3, %v354_v36, -inf }
 0x25c   :  { %v334_v15 = vpop.f32.mrf.mxu1 }
 0x25d   :  { %v347_v17 = vmul.f32 0.35355338, %v334_v15 }
 0x25f   :  { %v5082_v18 = vadd.f32 %v347_v17, %v5079_v16 }
 0x261   :  { %v374_v20 = vsel %vm358_vm3, %v5082_v18, -inf }
 0x262   :  { %375 = vmax.xlane.f32.xlu1 %v374_v20 }
 0x264   :  { %v337_v21 = vpop.f32.mrf.mxu1 }
 0x265   :  { %v348_v37 = vmul.f32 0.35355338, %v337_v21 }
 0x267   :  { %v5116_v40 = vadd.f32 %v348_v37, %v5113_v39 }
 0x269   :  { %v377_v41 = vsel %vm358_vm3, %v5116_v40, -inf }
 0x26c   :  { %v339_v22 = vpop.f32.mrf.mxu1 }
 0x26d   :  { %v349_v24 = vmul.f32 0.35355338, %v339_v22 }
 0x26f   :  { %v5092_v26 = vadd.f32 %v349_v24, %v5089_v23 }
 0x271   :  { %v380_v28 = vsel %vm358_vm3, %v5092_v26, -inf }
 0x272   :  { %381 = vmax.xlane.f32.xlu1 %v380_v28 }
 0x278   :  { %366 = vmax.xlane.f32.xlu0 %v365_v31  ;;  %v546_v31 = vpop.f32.mrf.mxu3 }
 0x279   :  { %v563_v56 = vmul.f32 0.35355338, %v546_v31 }
 0x280   :  { %372 = vmax.xlane.f32.xlu0 %v371_v38 }
 0x288   :  { %378 = vmax.xlane.f32.xlu0 %v377_v41 }
 0x2ad   :  { %v361_v45 = vpop.xlane.xlu0 %360 }
 0x2ae   :  { %v383_v46 = vsub.f32 %v350_v60, %v361_v45 }
 0x2b0   :  { %v391_v47 = vmul.f32 1.442695, %v383_v46 }
 0x2b2   :  { %4311 = vpow2.f32 %v391_v47 }
 0x2b5   :  { %v364_v48 = vpop.xlane.xlu1 %363 }
 0x2b6   :  { %v384_v49 = vsub.f32 %v351_v1, %v364_v48  ;;  %v726_v1 = vpop.permute.xlu2 %725 }
 0x2b8   :  { %v5126_v51 = vpop.eup %4311  ;;  %v393_v52 = vmul.f32 1.442695, %v384_v49  ;;  %v936_v49 = vpack.c.bf16 %v5041_v55, %v5041_v55  ;;  %v5187_v55 = vadd.f32 %v563_v56, %v5097_v27 }
 0x2b9   :  { %v407_v53 = vsel %vm358_vm3, %v5126_v51, 0.0 }
 0x2ba   :  { %4313 = vpow2.f32 %v393_v52  ;;  %408 = vadd.xlane.f32.xlu1 %v407_v53  ;;  %v958_v53 = vsel %vm309_vm1, %v936_v49, 0 }
 0x2bb   :  { %967 = vmatpush.bf16.msrb.mxu2 %v958_v53 }
 0x2be   :  { %v728_v14 = vpop.permute.xlu2 %727 }
 0x2c0   :  { %v5131_v57 = vpop.eup %4313  ;;  %v514_v59 = vpop.permute.xlu0 %513 }
 0x2c1   :  { %3967 = vmatmul.msk.bf16.gmra.mxu3 %vm296_vm2, %v514_v59  ;;  %v410_v60 = vsel %vm358_vm3, %v5131_v57, 0.0 }
 0x2c2   :  { %411 = vadd.xlane.f32.xlu1 %v410_v60 }
 0x2c5   :  { %v370_v2 = vpop.xlane.xlu1 %369 }
 0x2c6   :  { %v386_v4 = vsub.f32 %v5072_v12, %v370_v2 }
 0x2c8   :  { %v397_v6 = vmul.f32 1.442695, %v386_v4 }
 0x2d1   :  { %3968 = vmatmul.msk.bf16.gmra.mxu3 %vm296_vm2, %v516_v42  ;;  %v548_v42 = vpop.f32.mrf.mxu3 }
 0x2d2   :  { %v564_v45 = vmul.f32 0.35355338, %v548_v42 }
 0x2d4   :  { %v5175_v48 = vadd.f32 %v564_v45, %v5062_v8 }
 0x2d5   :  { %v376_v15 = vpop.xlane.xlu1 %375 }
 0x2d6   :  { %v388_v20 = vsub.f32 %v5082_v18, %v376_v15  ;;  %v586_v50 = vsel %vm358_vm3, %v5175_v48, -inf }
 0x2d8   :  { %v401_v21 = vmul.f32 1.442695, %v388_v20 }
 0x2db   :  { %729 = vrot.lane.b32.xlu1 %v4994_v32, %s4828_s28 }
 0x2e1   :  { %3973 = vmatmul.msk.bf16.vlgmr.msrb.gmra.mxu3 %vm296_vm2, %v724_v54 }
 0x2eb   :  { %v367_v61 = vpop.xlane.xlu0 %366 }
 0x2ec   :  { %v385_v62 = vsub.f32 %v352_v29, %v367_v61  ;;  %v561_v29 = vmul.f32 0.35355338, %v5057_v3 }
 0x2ee   :  { %v395_v0 = vmul.f32 1.442695, %v385_v62  ;;  %v5165_v37 = vadd.f32 %v561_v29, %v5046_v58  ;;  %v583_v62 = vsel %vm358_vm3, %v5187_v55, -inf }
 0x2f0   :  { %4315 = vpow2.f32 %v395_v0  ;;  %v577_v38 = vsel %vm358_vm3, %v5165_v37, -inf }
 0x2f1   :  { %3974 = vmatmul.msk.bf16.gmra.mxu3 %vm296_vm2, %v726_v1  ;;  %4317 = vpow2.f32 %v397_v6 }
 0x2f3   :  { %v373_v9 = vpop.xlane.xlu0 %372 }
 0x2f4   :  { %v387_v11 = vsub.f32 %v354_v36, %v373_v9 }
 0x2f6   :  { %v5142_v5 = vpop.eup %4315  ;;  %v399_v13 = vmul.f32 1.442695, %v387_v11 }
 0x2f7   :  { %v413_v7 = vsel %vm358_vm3, %v5142_v5, 0.0  ;;  %v5146_v17 = vpop.eup %4317 }
 0x2f8   :  { %414 = vadd.xlane.f32.xlu0 %v413_v7  ;;  %4319 = vpow2.f32 %v399_v13  ;;  %v416_v12 = vsel %vm358_vm3, %v5146_v17, 0.0  ;;  %v5199_v13 = vpop.permute.xlu2 %943 }
 0x2f9   :  { %4321 = vpow2.f32 %v401_v21 }
 0x2fb   :  { %v379_v25 = vpop.xlane.xlu0 %378 }
 0x2fc   :  { %v389_v18 = vsub.f32 %v5116_v40, %v379_v25  ;;  %v382_v40 = vpop.xlane.xlu1 %381 }
 0x2fd   :  { %v390_v3 = vsub.f32 %v5092_v26, %v382_v40 }
 0x2fe   :  { %v5152_v22 = vpop.eup %4319  ;;  %v403_v36 = vmul.f32 1.442695, %v389_v18 }
 0x2ff   :  { %v419_v24 = vsel %vm358_vm3, %v5152_v22, 0.0  ;;  %v5158_v28 = vpop.eup %4321  ;;  %v405_v47 = vmul.f32 1.442695, %v390_v3 }
 0x300   :  { %v422_v30 = vsel %vm358_vm3, %v5158_v28, 0.0  ;;  %4323 = vpow2.f32 %v403_v36 }
 0x301   :  { %3975 = vmatmul.msk.bf16.gmra.mxu3 %vm296_vm2, %v728_v14  ;;  %4325 = vpow2.f32 %v405_v47 }
 0x305   :  { %417 = vadd.xlane.f32.xlu1 %v416_v12  ;;  %v582_v12 = vpop.xlane.xlu2 %581 }
 0x306   :  { %v5169_v41 = vpop.eup %4323  ;;  %v602_v25 = vsub.f32 %v5065_v10, %v582_v12 }
 0x307   :  { %v425_v46 = vsel %vm358_vm3, %v5169_v41, 0.0  ;;  %v5182_v26 = vpop.eup %4325 }
 0x308   :  { %v428_v60 = vsel %vm358_vm3, %v5182_v26, 0.0  ;;  %v611_v29 = vmul.f32 1.442695, %v602_v25 }
 0x30c   :  { %941 = vrot.lane.b32.xlu0 %v4999_v33, %s4827_s2 }
 0x30d   :  { %420 = vadd.xlane.f32.xlu1 %v419_v24 }
 0x315   :  { %423 = vadd.xlane.f32.xlu1 %v422_v30 }
 0x31d   :  { %578 = vmax.xlane.f32.xlu1 %v577_v38 }
 0x325   :  { %426 = vadd.xlane.f32.xlu1 %v425_v46 }
 0x32d   :  { %v409_v52 = vpop.xlane.xlu1 %408  ;;  %587 = vmax.xlane.f32.xlu1 %v586_v50 }
 0x32e   :  { %4327 = vrcp.f32 %v409_v52 }
 0x334   :  { %v4328_v54 = vpop.eup %4327 }
 0x335   :  { %v412_v59 = vpop.xlane.xlu1 %411  ;;  %v439_v0 = vmul.f32 %v4328_v54, %v5126_v51 }
 0x336   :  { %4329 = vrcp.f32 %v412_v59  ;;  %429 = vadd.xlane.f32.xlu0 %v428_v60 }
 0x337   :  { %4331 = vpow2.f32 %v611_v29 }
 0x33c   :  { %v4330_v61 = vpop.eup %4329 }
 0x33d   :  { %v440_v1 = vmul.f32 %v4330_v61, %v5131_v57  ;;  %v5218_v42 = vpop.eup %4331 }
 0x33e   :  { %584 = vmax.xlane.f32.xlu0 %v583_v62  ;;  %v628_v10 = vsel %vm358_vm3, %v5218_v42, 0.0 }
 0x33f   :  { %v447_v2 = vpack.c.bf16 %v440_v1, %v439_v0 }
 0x341   :  { %3961 = vmatmul.msk.bf16.vlgmr.msra.gmra.mxu2 %vm358_vm3, %v447_v2 }
 0x344   :  { %v551_v4 = vpop.f32.mrf.mxu3 }
 0x345   :  { %v565_v6 = vmul.f32 0.35355338, %v551_v4 }
 0x347   :  { %v5195_v7 = vadd.f32 %v565_v6, %v5106_v35 }
 0x349   :  { %v589_v9 = vsel %vm358_vm3, %v5195_v7, -inf }
 0x34a   :  { %590 = vmax.xlane.f32.xlu2 %v589_v9 }
 0x34c   :  { %v553_v11 = vpop.f32.mrf.mxu3 }
 0x34d   :  { %v566_v14 = vmul.f32 0.35355338, %v553_v11  ;;  %v730_v51 = vpop.permute.xlu1 %729 }
 0x34e   :  { %3976 = vmatmul.msk.bf16.gmra.mxu3 %vm296_vm2, %v730_v51 }
 0x34f   :  { %v5203_v57 = vadd.f32 %v566_v14, %v5079_v16 }
 0x351   :  { %v592_v15 = vsel %vm358_vm3, %v5203_v57, -inf }
 0x352   :  { %593 = vmax.xlane.f32.xlu1 %v592_v15 }
 0x354   :  { %v556_v20 = vpop.f32.mrf.mxu3 }
 0x355   :  { %v567_v21 = vmul.f32 0.35355338, %v556_v20 }
 0x357   :  { %v5208_v24 = vadd.f32 %v567_v21, %v5113_v39 }
 0x359   :  { %v595_v18 = vsel %vm358_vm3, %v5208_v24, -inf }
 0x35a   :  { %596 = vmax.xlane.f32.xlu2 %v595_v18 }
 0x35c   :  { %v558_v30 = vpop.f32.mrf.mxu3 }
 0x35d   :  { %v568_v31 = vmul.f32 0.35355338, %v558_v30 }
 0x35f   :  { %v5214_v36 = vadd.f32 %v568_v31, %v5089_v23 }
 0x361   :  { %v598_v38 = vsel %vm358_vm3, %v5214_v36, -inf }
 0x362   :  { %599 = vmax.xlane.f32.xlu0 %v598_v38 }
 0x36a   :  { %629 = vadd.xlane.f32.xlu0 %v628_v10 }
 0x36b   :  { %675 = vrot.lane.b32.xlu1 %v4994_v32, %s4829_s30  ;;  %v415_v40 = vpop.xlane.xlu0 %414 }
 0x36c   :  { %4333 = vrcp.f32 %v415_v40 }
 0x372   :  { %v4334_v3 = vpop.eup %4333 }
 0x373   :  { %669 = vrot.lane.b32.xlu1 %v4986_v19, %s4829_s30  ;;  %v441_v49 = vmul.f32 %v4334_v3, %v5142_v5  ;;  %v755_v5 = vpop.f32.mrf.mxu3 }
 0x374   :  { %v775_v6 = vmul.f32 0.35355338, %v755_v5 }
 0x376   :  { %v5243_v14 = vadd.f32 %v775_v6, %v5046_v58 }
 0x378   :  { %v418_v45 = vpop.xlane.xlu1 %417  ;;  %v791_v51 = vsel %vm358_vm3, %v5243_v14, -inf }
 0x379   :  { %4335 = vrcp.f32 %v418_v45 }
 0x37e   :  { %671 = vrot.lane.b32.xlu0 %v5001_v34, %s4829_s30  ;;  %v5239_v11 = vpop.permute.xlu0 %941 }
 0x37f   :  { %v4336_v46 = vpop.eup %4335 }
 0x380   :  { %v421_v47 = vpop.xlane.xlu1 %420  ;;  %v442_v50 = vmul.f32 %v4336_v46, %v5146_v17 }
 0x381   :  { %4337 = vrcp.f32 %v421_v47 }
 0x382   :  { %v448_v52 = vpack.c.bf16 %v442_v50, %v441_v49 }
 0x384   :  { %3962 = vmatmul.msk.bf16.gmra.mxu2 %vm358_vm3, %v448_v52 }
 0x387   :  { %v4338_v56 = vpop.eup %4337 }
 0x388   :  { %v424_v53 = vpop.xlane.xlu1 %423  ;;  %v443_v54 = vmul.f32 %v4338_v56, %v5152_v22  ;;  %v757_v22 = vpop.f32.mrf.mxu3 }
 0x389   :  { %4339 = vrcp.f32 %v424_v53 }
 0x38f   :  { %v4340_v59 = vpop.eup %4339 }
 0x390   :  { %v579_v60 = vpop.xlane.xlu1 %578  ;;  %v444_v61 = vmul.f32 %v4340_v59, %v5158_v28  ;;  %v760_v12 = vpop.f32.mrf.mxu3 }
 0x391   :  { %v601_v62 = vsub.f32 %v5165_v37, %v579_v60 }
 0x392   :  { %v449_v0 = vpack.c.bf16 %v444_v61, %v443_v54 }
 0x393   :  { %v609_v1 = vmul.f32 1.442695, %v601_v62 }
 0x394   :  { %3963 = vmatmul.msk.bf16.gmra.mxu2 %vm358_vm3, %v449_v0 }
 0x395   :  { %4341 = vpow2.f32 %v609_v1  ;;  %v776_v1 = vmul.f32 0.35355338, %v757_v22 }
 0x398   :  { %v427_v17 = vpop.xlane.xlu1 %426  ;;  %v762_v40 = vpop.f32.mrf.mxu3 }
 0x399   :  { %v778_v3 = vmul.f32 0.35355338, %v762_v40 }
 0x39b   :  { %v5235_v2 = vpop.eup %4341  ;;  %v5263_v49 = vadd.f32 %v778_v3, %v5062_v8 }
 0x39c   :  { %v625_v4 = vsel %vm358_vm3, %v5235_v2, 0.0 }
 0x39d   :  { %626 = vadd.xlane.f32.xlu2 %v625_v4  ;;  %v800_v52 = vsel %vm358_vm3, %v5263_v49, -inf }
 0x3a0   :  { %v588_v9 = vpop.xlane.xlu1 %587 }
 0x3a1   :  { %v604_v28 = vsub.f32 %v5175_v48, %v588_v9  ;;  %v5287_v9 = vadd.f32 %v776_v1, %v5053_v63 }
 0x3a3   :  { %v615_v37 = vmul.f32 1.442695, %v604_v28 }
 0x3a5   :  { %4343 = vpow2.f32 %v615_v37 }
 0x3a6   :  { %4345 = vrcp.f32 %v427_v17 }
 0x3a8   :  { %792 = vmax.xlane.f32.xlu0 %v791_v51  ;;  %v777_v51 = vmul.f32 0.35355338, %v760_v12 }
 0x3a9   :  { %v430_v15 = vpop.xlane.xlu0 %429 }
 0x3aa   :  { %4347 = vrcp.f32 %v430_v15  ;;  %v5297_v15 = vadd.f32 %v777_v51, %v5097_v27 }
 0x3ab   :  { %v5247_v20 = vpop.eup %4343 }
 0x3ac   :  { %v634_v21 = vsel %vm358_vm3, %v5247_v20, 0.0  ;;  %v4346_v48 = vpop.eup %4345  ;;  %v797_v12 = vsel %vm358_vm3, %v5297_v15, -inf }
 0x3ad   :  { %635 = vadd.xlane.f32.xlu1 %v634_v21  ;;  %v445_v29 = vmul.f32 %v4346_v48, %v5169_v41 }
 0x3b0   :  { %v4348_v25 = vpop.eup %4347 }
 0x3b1   :  { %v585_v18 = vpop.xlane.xlu0 %584  ;;  %v446_v30 = vmul.f32 %v4348_v25, %v5182_v26 }
 0x3b2   :  { %v603_v31 = vsub.f32 %v5187_v55, %v585_v18  ;;  %v765_v55 = vpop.f32.mrf.mxu3 }
 0x3b3   :  { %v450_v38 = vpack.c.bf16 %v446_v30, %v445_v29  ;;  %v779_v48 = vmul.f32 0.35355338, %v765_v55 }
 0x3b4   :  { %v613_v10 = vmul.f32 1.442695, %v603_v31 }
 0x3b5   :  { %673 = vrot.lane.b32.xlu2 %v4999_v33, %s4829_s30  ;;  %3964 = vmatmul.msk.bf16.gmra.mxu2 %vm358_vm3, %v450_v38  ;;  %v5308_v18 = vadd.f32 %v779_v48, %v5106_v35 }
 0x3b6   :  { %4349 = vpow2.f32 %v613_v10 }
 0x3b7   :  { %v803_v30 = vsel %vm358_vm3, %v5308_v18, -inf }
 0x3ba   :  { %v767_v59 = vpop.f32.mrf.mxu3 }
 0x3bb   :  { %v780_v60 = vmul.f32 0.35355338, %v767_v59 }
 0x3bc   :  { %v5257_v45 = vpop.eup %4349 }
 0x3bd   :  { %v591_v46 = vpop.xlane.xlu2 %590  ;;  %v631_v41 = vsel %vm358_vm3, %v5257_v45, 0.0  ;;  %v5279_v0 = vadd.f32 %v780_v60, %v5079_v16 }
 0x3be   :  { %v605_v26 = vsub.f32 %v5195_v7, %v591_v46  ;;  %632 = vadd.xlane.f32.xlu0 %v631_v41 }
 0x3bf   :  { %v806_v17 = vsel %vm358_vm3, %v5279_v0, -inf }
 0x3c0   :  { %v617_v47 = vmul.f32 1.442695, %v605_v26 }
 0x3c2   :  { %4351 = vpow2.f32 %v617_v47 }
 0x3c4   :  { %v5321_v38 = vpop.f32.mrf.mxu2 }
 0x3c5   :  { %v594_v50 = vpop.xlane.xlu1 %593  ;;  %3981 = vmatmul.msk.bf16.vlgmr.msrb.gmra.mxu2 %vm296_vm2, %v5120_v43 }
 0x3c6   :  { %v606_v53 = vsub.f32 %v5203_v57, %v594_v50  ;;  %801 = vmax.xlane.f32.xlu0 %v800_v52 }
 0x3c8   :  { %v619_v56 = vmul.f32 1.442695, %v606_v53  ;;  %v5270_v7 = vpop.eup %4351 }
 0x3c9   :  { %v637_v54 = vsel %vm358_vm3, %v5270_v7, 0.0 }
 0x3ca   :  { %4353 = vpow2.f32 %v619_v56 }
 0x3cc   :  { %v5324_v46 = vpop.f32.mrf.mxu2 }
 0x3cd   :  { %v597_v57 = vpop.xlane.xlu2 %596 }
 0x3ce   :  { %638 = vadd.xlane.f32.xlu0 %v637_v54  ;;  %v607_v5 = vsub.f32 %v5208_v24, %v597_v57  ;;  %v794_v24 = vsel %vm358_vm3, %v5287_v9, -inf }
 0x3d0   :  { %v5274_v61 = vpop.eup %4353  ;;  %v621_v4 = vmul.f32 1.442695, %v607_v5 }
 0x3d1   :  { %v770_v62 = vpop.f32.mrf.mxu3  ;;  %v640_v43 = vsel %vm358_vm3, %v5274_v61, 0.0 }
 0x3d2   :  { %641 = vadd.xlane.f32.xlu1 %v640_v43  ;;  %4355 = vpow2.f32 %v621_v4  ;;  %v781_v29 = vmul.f32 0.35355338, %v770_v62 }
 0x3d5   :  { %3982 = vmatmul.msk.bf16.gmra.mxu2 %vm296_vm2, %v5122_v44  ;;  %v600_v10 = vpop.xlane.xlu0 %599 }
 0x3d6   :  { %807 = vmax.xlane.f32.xlu0 %v806_v17  ;;  %v608_v40 = vsub.f32 %v5214_v36, %v600_v10 }
 0x3d8   :  { %v5299_v21 = vpop.eup %4355  ;;  %v623_v3 = vmul.f32 1.442695, %v608_v40 }
 0x3d9   :  { %v772_v6 = vpop.f32.mrf.mxu3  ;;  %v643_v25 = vsel %vm358_vm3, %v5299_v21, 0.0 }
 0x3da   :  { %v782_v28 = vmul.f32 0.35355338, %v772_v6  ;;  %4357 = vpow2.f32 %v623_v3 }
 0x3dc   :  { %v5290_v37 = vadd.f32 %v782_v28, %v5089_v23 }
 0x3dd   :  { %v676_v22 = vpop.permute.xlu1 %675  ;;  %v630_v41 = vpop.xlane.xlu0 %629 }
 0x3de   :  { %795 = vmax.xlane.f32.xlu2 %v794_v24  ;;  %697 = vmatpush.bf16.msrb.mxu1 %v676_v22  ;;  %v812_v44 = vsel %vm358_vm3, %v5290_v37, -inf }
 0x3df   :  { %813 = vmax.xlane.f32.xlu0 %v812_v44 }
 0x3e5   :  { %3983 = vmatmul.msk.bf16.gmra.mxu2 %vm296_vm2, %v5239_v11  ;;  %v5315_v11 = vadd.f32 %v781_v29, %v5113_v39  ;;  %v670_v43 = vpop.permute.xlu1 %669 }
 0x3e6   :  { %798 = vmax.xlane.f32.xlu2 %v797_v12 }
 0x3e7   :  { %644 = vadd.xlane.f32.xlu0 %v643_v25  ;;  %v809_v31 = vsel %vm358_vm3, %v5315_v11, -inf }
 0x3eb   :  { %889 = vrot.lane.b32.xlu1 %v4994_v32, %s4830_s5 }
 0x3ee   :  { %804 = vmax.xlane.f32.xlu2 %v803_v30 }
 0x3f0   :  { %v672_v47 = vpop.permute.xlu0 %671 }
 0x3f5   :  { %3984 = vmatmul.msk.bf16.gmra.mxu2 %vm296_vm2, %v5199_v13  ;;  %v5328_v13 = vpop.eup %4357 }
 0x3f6   :  { %810 = vmax.xlane.f32.xlu2 %v809_v31  ;;  %v646_v50 = vsel %vm358_vm3, %v5328_v13, 0.0 }
 0x407   :  { %v5330_v55 = vpop.f32.mrf.mxu2 }
 0x40e   :  { %1103 = vrot.lane.b32.xlu2 %v4994_v32, %s4831_s7 }
 0x40f   :  { %v5334_v56 = vpop.f32.mrf.mxu2 }
 0x410   :  { %v627_v26 = vpop.xlane.xlu2 %626 }
 0x411   :  { %4359 = vrcp.f32 %v627_v26 }
 0x412   :  { %4361 = vrcp.f32 %v630_v41 }
 0x415   :  { %647 = vadd.xlane.f32.xlu1 %v646_v50 }
 0x417   :  { %v4360_v52 = vpop.eup %4359  ;;  %v5342_v5 = vpop.f32.mrf.mxu2 }
 0x418   :  { %v674_v36 = vpop.permute.xlu2 %673  ;;  %v4362_v59 = vpop.eup %4361  ;;  %v657_v60 = vmul.f32 %v4360_v52, %v5235_v2 }
 0x419   :  { %698 = vmatpush.bf16.msrb.mxu1 %v674_v36  ;;  %v658_v62 = vmul.f32 %v4362_v59, %v5218_v42 }
 0x41b   :  { %v793_v53 = vpop.xlane.xlu0 %792  ;;  %v665_v57 = vpack.c.bf16 %v658_v62, %v657_v60 }
 0x41c   :  { %v815_v32 = vsub.f32 %v5243_v14, %v793_v53 }
 0x41d   :  { %699 = vmatpush.bf16.msrb.mxu1 %v672_v47 }
 0x41e   :  { %v823_v54 = vmul.f32 1.442695, %v815_v32 }
 0x41f   :  { %v5346_v4 = vpop.f32.mrf.mxu2 }
 0x420   :  { %4363 = vpow2.f32 %v823_v54  ;;  %v636_v17 = vpop.xlane.xlu1 %635 }
 0x421   :  { %700 = vmatpush.bf16.msrb.mxu1 %v670_v43  ;;  %4365 = vrcp.f32 %v636_v17 }
 0x424   :  { %3969 = vmatmul.msk.bf16.vlgmr.msrb.gmra.mxu1 %vm358_vm3, %v665_v57 }
 0x426   :  { %v5340_v1 = vpop.eup %4363 }
 0x427   :  { %v839_v14 = vsel %vm358_vm3, %v5340_v1, 0.0  ;;  %v4366_v42 = vpop.eup %4365 }
 0x428   :  { %840 = vadd.xlane.f32.xlu0 %v839_v14  ;;  %v660_v24 = vmul.f32 %v4366_v42, %v5247_v20 }
 0x431   :  { %v633_v2 = vpop.xlane.xlu0 %632 }
 0x432   :  { %4367 = vrcp.f32 %v633_v2 }
 0x438   :  { %v4368_v6 = vpop.eup %4367  ;;  %v5348_v28 = vpop.f32.mrf.mxu2 }
 0x439   :  { %v5350_v51 = vpop.xlane.xlu0 %801  ;;  %v659_v22 = vmul.f32 %v4368_v6, %v5257_v45 }
 0x43b   :  { %v666_v44 = vpack.c.bf16 %v660_v24, %v659_v22 }
 0x43d   :  { %3970 = vmatmul.msk.bf16.gmra.mxu1 %vm358_vm3, %v666_v44 }
 0x440   :  { %v5355_v48 = vpop.f32.mrf.mxu2 }
 0x441   :  { %v639_v12 = vpop.xlane.xlu0 %638 }
 0x442   :  { %4369 = vrcp.f32 %v639_v12 }
 0x445   :  { %v642_v25 = vpop.xlane.xlu1 %641 }
 0x446   :  { %4371 = vrcp.f32 %v642_v25 }
 0x448   :  { %v969_v29 = vpop.f32.mrf.mxu2  ;;  %v4370_v31 = vpop.eup %4369 }
 0x449   :  { %v989_v30 = vmul.f32 0.35355338, %v969_v29  ;;  %v661_v20 = vmul.f32 %v4370_v31, %v5270_v7  ;;  %v5394_v24 = vpop.xlane.xlu0 %807 }
 0x44b   :  { %v5358_v10 = vadd.f32 %v989_v30, %v5046_v58 }
 0x44c   :  { %v4372_v40 = vpop.eup %4371 }
 0x44d   :  { %v1005_v45 = vsel %vm358_vm3, %v5358_v10, -inf  ;;  %v662_v3 = vmul.f32 %v4372_v40, %v5274_v61 }
 0x44e   :  { %1006 = vmax.xlane.f32.xlu1 %v1005_v45 }
 0x44f   :  { %v667_v41 = vpack.c.bf16 %v662_v3, %v661_v20 }
 0x450   :  { %v971_v26 = vpop.f32.mrf.mxu2 }
 0x451   :  { %v990_v47 = vmul.f32 0.35355338, %v971_v26  ;;  %v796_v50 = vpop.xlane.xlu2 %795  ;;  %3971 = vmatmul.msk.bf16.gmra.mxu1 %vm358_vm3, %v667_v41 }
 0x452   :  { %v816_v36 = vsub.f32 %v5287_v9, %v796_v50 }
 0x453   :  { %v5367_v58 = vadd.f32 %v990_v47, %v5053_v63 }
 0x454   :  { %v825_v52 = vmul.f32 1.442695, %v816_v36 }
 0x455   :  { %v1008_v53 = vsel %vm358_vm3, %v5367_v58, -inf }
 0x456   :  { %4373 = vpow2.f32 %v825_v52  ;;  %1009 = vmax.xlane.f32.xlu2 %v1008_v53 }
 0x458   :  { %v974_v7 = vpop.f32.mrf.mxu2 }
 0x459   :  { %v991_v61 = vmul.f32 0.35355338, %v974_v7  ;;  %v5371_v32 = vpop.xlane.xlu2 %798 }
 0x45b   :  { %v5374_v59 = vadd.f32 %v991_v61, %v5097_v27 }
 0x45c   :  { %v5376_v60 = vpop.eup %4373 }
 0x45d   :  { %v890_v54 = vpop.permute.xlu1 %889  ;;  %v1011_v63 = vsel %vm358_vm3, %v5374_v59, -inf  ;;  %v842_v9 = vsel %vm358_vm3, %v5376_v60, 0.0 }
 0x45e   :  { %911 = vmatpush.bf16.msrb.mxu0 %v890_v54  ;;  %1012 = vmax.xlane.f32.xlu1 %v1011_v63 }
 0x45f   :  { %843 = vadd.xlane.f32.xlu0 %v842_v9 }
 0x460   :  { %v976_v62 = vpop.f32.mrf.mxu2 }
 0x461   :  { %v992_v43 = vmul.f32 0.35355338, %v976_v62  ;;  %v805_v57 = vpop.xlane.xlu2 %804 }
 0x463   :  { %v5383_v14 = vadd.f32 %v992_v43, %v5062_v8  ;;  %v5398_v8 = vpop.xlane.xlu0 %813 }
 0x465   :  { %v1014_v27 = vsel %vm358_vm3, %v5383_v14, -inf }
 0x466   :  { %1015 = vmax.xlane.f32.xlu2 %v1014_v27 }
 0x468   :  { %v979_v17 = vpop.f32.mrf.mxu2 }
 0x469   :  { %v993_v2 = vmul.f32 0.35355338, %v979_v17  ;;  %v5387_v42 = vpop.xlane.xlu2 %810 }
 0x46b   :  { %v5390_v6 = vadd.f32 %v993_v2, %v5106_v35  ;;  %v645_v25 = vpop.xlane.xlu0 %644 }
 0x46c   :  { %4375 = vrcp.f32 %v645_v25 }
 0x46d   :  { %v1017_v22 = vsel %vm358_vm3, %v5390_v6, -inf }
 0x46e   :  { %1018 = vmax.xlane.f32.xlu1 %v1017_v22 }
 0x470   :  { %v981_v12 = vpop.f32.mrf.mxu2 }
 0x471   :  { %v1104_v44 = vpop.permute.xlu2 %1103  ;;  %v994_v50 = vmul.f32 0.35355338, %v981_v12 }
 0x472   :  { %1125 = vmatpush.bf16.msra.mxu1 %v1104_v44  ;;  %v4376_v30 = vpop.eup %4375  ;;  %v820_v44 = vsub.f32 %v5279_v0, %v5394_v24  ;;  %v817_v0 = vsub.f32 %v5297_v15, %v5371_v32  ;;  %v822_v32 = vsub.f32 %v5290_v37, %v5398_v8  ;;  %v821_v8 = vsub.f32 %v5315_v11, %v5387_v42 }
 0x473   :  { %885 = vrot.lane.b32.xlu0 %v5001_v34, %s4830_s5  ;;  %v663_v40 = vmul.f32 %v4376_v30, %v5299_v21  ;;  %v5416_v21 = vadd.f32 %v994_v50, %v5079_v16  ;;  %v818_v50 = vsub.f32 %v5263_v49, %v5350_v51 }
 0x474   :  { %v833_v25 = vmul.f32 1.442695, %v820_v44  ;;  %v835_v51 = vmul.f32 1.442695, %v821_v8 }
 0x475   :  { %v1020_v52 = vsel %vm358_vm3, %v5416_v21, -inf }
 0x478   :  { %v984_v35 = vpop.f32.mrf.mxu2 }
 0x479   :  { %v995_v36 = vmul.f32 0.35355338, %v984_v35 }
 0x47b   :  { %v5425_v53 = vadd.f32 %v995_v36, %v5113_v39  ;;  %v837_v36 = vmul.f32 1.442695, %v822_v32 }
 0x47e   :  { %1101 = vrot.lane.b32.xlu2 %v4999_v33, %s4831_s7 }
 0x480   :  { %v986_v20 = vpop.f32.mrf.mxu2 }
 0x481   :  { %v996_v41 = vmul.f32 0.35355338, %v986_v20 }
 0x486   :  { %1099 = vrot.lane.b32.xlu2 %v5001_v34, %s4831_s7  ;;  %v5410_v34 = vadd.f32 %v996_v41, %v5089_v23 }
 0x487   :  { %887 = vrot.lane.b32.xlu1 %v4999_v33, %s4830_s5  ;;  %v819_v33 = vsub.f32 %v5308_v18, %v805_v57  ;;  %v1023_v18 = vsel %vm358_vm3, %v5425_v53, -inf }
 0x488   :  { %v648_v29 = vpop.xlane.xlu1 %647  ;;  %v1026_v26 = vsel %vm358_vm3, %v5410_v34, -inf }
 0x489   :  { %4377 = vrcp.f32 %v648_v29  ;;  %v831_v47 = vmul.f32 1.442695, %v819_v33 }
 0x48b   :  { %4379 = vpow2.f32 %v831_v47 }
 0x48f   :  { %v4378_v31 = vpop.eup %4377 }
 0x490   :  { %v664_v45 = vmul.f32 %v4378_v31, %v5328_v13  ;;  %v827_v31 = vmul.f32 1.442695, %v817_v0 }
 0x491   :  { %v5418_v13 = vpop.eup %4379 }
 0x492   :  { %v668_v3 = vpack.c.bf16 %v664_v45, %v663_v40  ;;  %v851_v23 = vsel %vm358_vm3, %v5418_v13, 0.0 }
 0x494   :  { %3972 = vmatmul.msk.bf16.gmra.mxu1 %vm358_vm3, %v668_v3 }
 0x49b   :  { %v841_v45 = vpop.xlane.xlu0 %840 }
 0x49d   :  { %1027 = vmax.xlane.f32.xlu0 %v1026_v26 }
 0x4a1   :  { %v702_v41 = vpop.f32.mrf.mxu1 }
 0x4af   :  { %1021 = vmax.xlane.f32.xlu2 %v1020_v52  ;;  %v704_v52 = vpop.f32.mrf.mxu1 }
 0x4b1   :  { %852 = vadd.xlane.f32.xlu1 %v851_v23 }
 0x4b7   :  { %1024 = vmax.xlane.f32.xlu2 %v1023_v18  ;;  %v829_v18 = vmul.f32 1.442695, %v818_v50 }
 0x4ba   :  { %v707_v49 = vpop.f32.mrf.mxu1 }
 0x4c1   :  { %v1007_v16 = vpop.xlane.xlu1 %1006 }
 0x4c2   :  { %v1029_v7 = vsub.f32 %v5358_v10, %v1007_v16 }
 0x4c4   :  { %v1037_v61 = vmul.f32 1.442695, %v1029_v7 }
 0x4c6   :  { %4381 = vpow2.f32 %v1037_v61 }
 0x4c9   :  { %v1010_v54 = vpop.xlane.xlu2 %1009 }
 0x4ca   :  { %v1030_v63 = vsub.f32 %v5367_v58, %v1010_v54 }
 0x4cc   :  { %v5431_v9 = vpop.eup %4381  ;;  %v1039_v62 = vmul.f32 1.442695, %v1030_v63  ;;  %v709_v63 = vpop.f32.mrf.mxu1 }
 0x4cd   :  { %v1053_v43 = vsel %vm358_vm3, %v5431_v9, 0.0 }
 0x4ce   :  { %4383 = vpow2.f32 %v1039_v62  ;;  %1054 = vadd.xlane.f32.xlu0 %v1053_v43 }
 0x4cf   :  { %883 = vrot.lane.b32.xlu2 %v4986_v19, %s4830_s5 }
 0x4d1   :  { %v1013_v39 = vpop.xlane.xlu1 %1012 }
 0x4d2   :  { %v1031_v57 = vsub.f32 %v5374_v59, %v1013_v39  ;;  %v844_v15 = vpop.xlane.xlu0 %843 }
 0x4d4   :  { %v5438_v10 = vpop.eup %4383  ;;  %v1041_v27 = vmul.f32 1.442695, %v1031_v57  ;;  %v712_v57 = vpop.f32.mrf.mxu1 }
 0x4d5   :  { %v1056_v58 = vsel %vm358_vm3, %v5438_v10, 0.0 }
 0x4d6   :  { %4385 = vpow2.f32 %v1041_v27  ;;  %1057 = vadd.xlane.f32.xlu1 %v1056_v58 }
 0x4d9   :  { %v1016_v17 = vpop.xlane.xlu2 %1015 }
 0x4da   :  { %v1032_v2 = vsub.f32 %v5383_v14, %v1016_v17  ;;  %v4155_v17 = vpack.i.bf16 %v704_v52, %v702_v41 }
 0x4dc   :  { %v5443_v22 = vpop.eup %4385  ;;  %v1043_v12 = vmul.f32 1.442695, %v1032_v2  ;;  %v714_v2 = vpop.f32.mrf.mxu1 }
 0x4dd   :  { %v1059_v59 = vsel %vm358_vm3, %v5443_v22, 0.0 }
 0x4de   :  { %4387 = vpow2.f32 %v1043_v12  ;;  %1060 = vadd.xlane.f32.xlu1 %v1059_v59  ;;  %v4170_v59 = vpack.i.bf16 %v709_v63, %v707_v49 }
 0x4df   :  { %4389 = vpow2.f32 %v833_v25 }
 0x4e0   :  { %4391 = vpow2.f32 %v827_v31 }
 0x4e1   :  { %v1102_v35 = vpop.permute.xlu2 %1101  ;;  %v1019_v40 = vpop.xlane.xlu1 %1018 }
 0x4e2   :  { %1126 = vmatpush.bf16.msra.mxu1 %v1102_v35  ;;  %1097 = vrot.lane.b32.xlu0 %v4986_v19, %s4831_s7  ;;  %v1033_v20 = vsub.f32 %v5390_v6, %v1019_v40 }
 0x4e4   :  { %v5451_v29 = vpop.eup %4387  ;;  %v1045_v3 = vmul.f32 1.442695, %v1033_v20 }
 0x4e5   :  { %v1062_v14 = vsel %vm358_vm3, %v5451_v29, 0.0  ;;  %v5457_v30 = vpop.eup %4389  ;;  %v886_v23 = vpop.permute.xlu0 %885 }
 0x4e6   :  { %1063 = vadd.xlane.f32.xlu1 %v1062_v14  ;;  %v854_v19 = vsel %vm358_vm3, %v5457_v30, 0.0  ;;  %v5462_v26 = vpop.eup %4391  ;;  %4393 = vpow2.f32 %v1045_v3 }
 0x4e7   :  { %v845_v33 = vsel %vm358_vm3, %v5462_v26, 0.0  ;;  %4395 = vpow2.f32 %v837_v36 }
 0x4e8   :  { %4397 = vpow2.f32 %v829_v18 }
 0x4e9   :  { %v1100_v24 = vpop.permute.xlu2 %1099  ;;  %4399 = vpow2.f32 %v835_v51 }
 0x4ea   :  { %1127 = vmatpush.bf16.msra.mxu1 %v1100_v24 }
 0x4ec   :  { %v5470_v6 = vpop.eup %4393 }
 0x4ed   :  { %v1065_v37 = vsel %vm358_vm3, %v5470_v6, 0.0  ;;  %v5476_v16 = vpop.eup %4395 }
 0x4ee   :  { %855 = vadd.xlane.f32.xlu1 %v854_v19  ;;  %v860_v7 = vsel %vm358_vm3, %v5476_v16, 0.0  ;;  %v5480_v61 = vpop.eup %4397  ;;  %v4185_v19 = vpack.i.bf16 %v714_v2, %v712_v57 }
 0x4ef   :  { %v848_v54 = vsel %vm358_vm3, %v5480_v61, 0.0  ;;  %v5484_v62 = vpop.eup %4399 }
 0x4f0   :  { %v857_v39 = vsel %vm358_vm3, %v5484_v62, 0.0 }
 0x4f8   :  { %846 = vadd.xlane.f32.xlu2 %v845_v33 }
 0x4f9   :  { %v888_v47 = vpop.permute.xlu1 %887 }
 0x4fa   :  { %912 = vmatpush.bf16.msrb.mxu0 %v888_v47 }
 0x4fe   :  { %913 = vmatpush.bf16.msrb.mxu0 %v886_v23 }
 0x500   :  { %1066 = vadd.xlane.f32.xlu2 %v1065_v37 }
 0x508   :  { %861 = vadd.xlane.f32.xlu2 %v860_v7 }
 0x50c   :  { %849 = vadd.xlane.f32.xlu0 %v848_v54 }
 0x510   :  { %v1028_v43 = vpop.xlane.xlu0 %1027 }
 0x511   :  { %v1036_v11 = vsub.f32 %v5410_v34, %v1028_v43  ;;  %v717_v25 = vpop.f32.mrf.mxu1 }
 0x513   :  { %v1051_v42 = vmul.f32 1.442695, %v1036_v11 }
 0x514   :  { %858 = vadd.xlane.f32.xlu0 %v857_v39 }
 0x515   :  { %4401 = vpow2.f32 %v1051_v42 }
 0x516   :  { %4403 = vrcp.f32 %v844_v15 }
 0x519   :  { %v719_v41 = vpop.f32.mrf.mxu1 }
 0x51a   :  { %v4200_v33 = vpack.i.bf16 %v719_v41, %v717_v25 }
 0x51b   :  { %v5489_v27 = vpop.eup %4401 }
 0x51c   :  { %v1074_v58 = vsel %vm358_vm3, %v5489_v27, 0.0  ;;  %v4404_v0 = vpop.eup %4403 }
 0x51d   :  { %1075 = vadd.xlane.f32.xlu0 %v1074_v58  ;;  %v872_v20 = vmul.f32 %v4404_v0, %v5376_v60 }
 0x520   :  { %4156 = vrot.lane.b32.xlu2 %v4155_v17, %s4819_s22 }
 0x522   :  { %v1022_v44 = vpop.xlane.xlu2 %1021 }
 0x523   :  { %v1034_v34 = vsub.f32 %v5416_v21, %v1022_v44 }
 0x524   :  { %v853_v60 = vpop.xlane.xlu1 %852 }
 0x525   :  { %v1047_v12 = vmul.f32 1.442695, %v1034_v34 }
 0x527   :  { %4405 = vpow2.f32 %v1047_v12 }
 0x528   :  { %4171 = vrot.lane.b32.xlu2 %v4170_v59, %s4819_s22  ;;  %4407 = vrcp.f32 %v841_v45 }
 0x52a   :  { %v1025_v35 = vpop.xlane.xlu2 %1024 }
 0x52b   :  { %v1035_v14 = vsub.f32 %v5425_v53, %v1025_v35 }
 0x52d   :  { %v5497_v24 = vpop.eup %4405  ;;  %v1049_v31 = vmul.f32 1.442695, %v1035_v14 }
 0x52e   :  { %v1068_v40 = vsel %vm358_vm3, %v5497_v24, 0.0  ;;  %v4408_v21 = vpop.eup %4407 }
 0x52f   :  { %4409 = vpow2.f32 %v1049_v31  ;;  %1069 = vadd.xlane.f32.xlu1 %v1068_v40  ;;  %v871_v45 = vmul.f32 %v4408_v21, %v5340_v1 }
 0x530   :  { %4186 = vrot.lane.b32.xlu2 %v4185_v19, %s4819_s22 }
 0x531   :  { %v879_v53 = vpack.c.bf16 %v872_v20, %v871_v45 }
 0x532   :  { %v884_v3 = vpop.permute.xlu2 %883 }
 0x533   :  { %914 = vmatpush.bf16.msrb.mxu0 %v884_v3 }
 0x535   :  { %v5504_v15 = vpop.eup %4409 }
 0x536   :  { %3977 = vmatmul.msk.bf16.vlgmr.msrb.gmra.mxu0 %vm358_vm3, %v879_v53  ;;  %v1071_v32 = vsel %vm358_vm3, %v5504_v15, 0.0 }
 0x537   :  { %1072 = vadd.xlane.f32.xlu1 %v1071_v32 }
 0x538   :  { %4201 = vrot.lane.b32.xlu2 %v4200_v33, %s4819_s22 }
 0x541   :  { %v1055_v47 = vpop.xlane.xlu0 %1054 }
 0x549   :  { %v1058_v50 = vpop.xlane.xlu1 %1057 }
 0x54a   :  { %4411 = vrcp.f32 %v1058_v50 }
 0x54b   :  { %4413 = vrcp.f32 %v1055_v47 }
 0x550   :  { %v4412_v1 = vpop.eup %4411 }
 0x551   :  { %v4414_v36 = vpop.eup %4413  ;;  %v1061_v52 = vpop.xlane.xlu1 %1060  ;;  %v1086_v23 = vmul.f32 %v4412_v1, %v5438_v10 }
 0x552   :  { %v1085_v18 = vmul.f32 %v4414_v36, %v5431_v9 }
 0x554   :  { %v1098_v37 = vpop.permute.xlu0 %1097  ;;  %v1093_v8 = vpack.c.bf16 %v1086_v23, %v1085_v18 }
 0x555   :  { %1128 = vmatpush.bf16.msra.mxu1 %v1098_v37 }
 0x558   :  { %3985 = vmatmul.msk.bf16.vlgmr.msra.gmra.mxu1 %vm358_vm3, %v1093_v8  ;;  %v4118_v8 = vld [vmem:[#allocation4 + $0x8] sm:$0xff] }
 0x559   :  { %v1064_v49 = vpop.xlane.xlu1 %1063  ;;  %1314 = vmatpush.bf16.msra.mxu3 %v4118_v8 }
 0x55a   :  { %4415 = vrcp.f32 %v1064_v49 }
 0x55b   :  { %4417 = vrcp.f32 %v1061_v52 }
 0x560   :  { %v4416_v51 = vpop.eup %4415 }
 0x561   :  { %v4418_v7 = vpop.eup %4417  ;;  %v1088_v54 = vmul.f32 %v4416_v51, %v5451_v29  ;;  %v856_v58 = vpop.xlane.xlu1 %855 }
 0x562   :  { %v1087_v63 = vmul.f32 %v4418_v7, %v5443_v22 }
 0x564   :  { %v1094_v43 = vpack.c.bf16 %v1088_v54, %v1087_v63 }
 0x568   :  { %3986 = vmatmul.msk.bf16.gmra.mxu1 %vm358_vm3, %v1094_v43 }
 0x56b   :  { %v847_v10 = vpop.xlane.xlu2 %846 }
 0x56c   :  { %4419 = vrcp.f32 %v847_v10  ;;  %v4117_v10 = vld [vmem:[#allocation4] sm:$0xff] }
 0x56d   :  { %1315 = vmatpush.bf16.msra.mxu3 %v4117_v10 }
 0x572   :  { %v4420_v11 = vpop.eup %4419 }
 0x573   :  { %v873_v39 = vmul.f32 %v4420_v11, %v5462_v26  ;;  %v1067_v22 = vpop.xlane.xlu2 %1066 }
 0x57b   :  { %v862_v25 = vpop.xlane.xlu2 %861 }
 0x57f   :  { %v850_v9 = vpop.xlane.xlu0 %849 }
 0x580   :  { %4421 = vrcp.f32 %v850_v9 }
 0x581   :  { %4423 = vrcp.f32 %v856_v58 }
 0x582   :  { %4425 = vrcp.f32 %v853_v60 }
 0x586   :  { %v4422_v42 = vpop.eup %4421 }
 0x587   :  { %v874_v57 = vmul.f32 %v4422_v42, %v5480_v61  ;;  %v4424_v29 = vpop.eup %4423  ;;  %v859_v12 = vpop.xlane.xlu0 %858 }
 0x588   :  { %v4426_v2 = vpop.eup %4425  ;;  %v876_v44 = vmul.f32 %v4424_v29, %v5457_v30  ;;  %4427 = vrcp.f32 %v859_v12 }
 0x589   :  { %v880_v17 = vpack.c.bf16 %v874_v57, %v873_v39  ;;  %v875_v34 = vmul.f32 %v4426_v2, %v5418_v13  ;;  %4429 = vrcp.f32 %v862_v25  ;;  %v4157_v39 = vpop.permute.xlu2 %4156 }
 0x58a   :  { %4431 = vrcp.f32 %v1067_v22  ;;  %v4159_v58 = vunpack.i.h.bf16 %v4157_v39 }
 0x58b   :  { %3978 = vmatmul.msk.bf16.gmra.mxu0 %vm358_vm3, %v880_v17  ;;  %v881_v59 = vpack.c.bf16 %v876_v44, %v875_v34  ;;  %v4158_v17 = vunpack.i.l.bf16 %v4157_v39 }
 0x58c   :  { %v1247_v44 = vsel %vm296_vm2, %v5324_v46, %v4159_v58 }
 0x58d   :  { %v1246_v34 = vsel %vm296_vm2, %v5321_v38, %v4158_v17 }
 0x58e   :  { %v4428_v26 = vpop.eup %4427 }
 0x58f   :  { %v4430_v35 = vpop.eup %4429  ;;  %v877_v14 = vmul.f32 %v4428_v26, %v5484_v62 }
 0x590   :  { %v4432_v0 = vpop.eup %4431  ;;  %v878_v31 = vmul.f32 %v4430_v35, %v5476_v16  ;;  %v1076_v45 = vpop.xlane.xlu0 %1075 }
 0x591   :  { %v1089_v13 = vmul.f32 %v4432_v0, %v5470_v6  ;;  %v4172_v0 = vpop.permute.xlu2 %4171 }
 0x592   :  { %v882_v40 = vpack.c.bf16 %v878_v31, %v877_v14  ;;  %v4174_v31 = vunpack.i.h.bf16 %v4172_v0 }
 0x59b   :  { %3979 = vmatmul.msk.bf16.gmra.mxu0 %vm358_vm3, %v881_v59 }
 0x5a2   :  { %v1070_v61 = vpop.xlane.xlu1 %1069 }
 0x5a3   :  { %4433 = vrcp.f32 %v1070_v61 }
 0x5a9   :  { %v4434_v30 = vpop.eup %4433 }
 0x5aa   :  { %v1090_v19 = vmul.f32 %v4434_v30, %v5497_v24  ;;  %v1073_v21 = vpop.xlane.xlu1 %1072  ;;  %v4173_v30 = vunpack.i.l.bf16 %v4172_v0 }
 0x5ab   :  { %3980 = vmatmul.msk.bf16.gmra.mxu0 %vm358_vm3, %v882_v40  ;;  %4435 = vrcp.f32 %v1073_v21 }
 0x5ac   :  { %v1095_v20 = vpack.c.bf16 %v1090_v19, %v1089_v13  ;;  %4437 = vrcp.f32 %v1076_v45  ;;  %v1249_v19 = vsel %vm296_vm2, %v5334_v56, %v4174_v31  ;;  %v1248_v21 = vsel %vm296_vm2, %v5330_v55, %v4173_v30  ;;  %v4648_v30 = vld [vmem:[%s6812_s0 + $0x18] sm:$0xff] }
 0x5ae   :  { %3987 = vmatmul.msk.bf16.gmra.mxu1 %vm358_vm3, %v1095_v20 }
 0x5b1   :  { %v4436_v62 = vpop.eup %4435 }
 0x5b2   :  { %v4438_v41 = vpop.eup %4437  ;;  %v1091_v16 = vmul.f32 %v4436_v62, %v5504_v15 }
 0x5b3   :  { %v916_v3 = vpop.f32.mrf.mxu0  ;;  %v1092_v53 = vmul.f32 %v4438_v41, %v5489_v27 }
 0x5b5   :  { %v1096_v33 = vpack.c.bf16 %v1092_v53, %v1091_v16 }
 0x5bb   :  { %v918_v32 = vpop.f32.mrf.mxu0 }
 0x5bc   :  { %v4160_v6 = vpack.i.bf16 %v918_v32, %v916_v3  ;;  %v4187_v32 = vpop.permute.xlu2 %4186 }
 0x5bd   :  { %v4188_v56 = vunpack.i.l.bf16 %v4187_v32 }
 0x5be   :  { %4161 = vrot.lane.b32.xlu1 %v4160_v6, %s4821_s24  ;;  %3988 = vmatmul.msk.bf16.gmra.mxu1 %vm358_vm3, %v1096_v33  ;;  %v4189_v33 = vunpack.i.h.bf16 %v4187_v32 }
 0x5d5   :  { %v1130_v24 = vpop.f32.mrf.mxu1 }
 0x5dd   :  { %v1132_v60 = vpop.f32.mrf.mxu1 }
 0x5de   :  { %v4165_v47 = vpack.i.bf16 %v1132_v60, %v1130_v24 }
 0x5e0   :  { %4166 = vrot.lane.b32.xlu0 %v4165_v47, %s4832_s9  ;;  %v1251_v47 = vsel %vm296_vm2, %v5346_v4, %v4189_v33 }
 0x5e5   :  { %v1135_v50 = vpop.f32.mrf.mxu1 }
 0x5ed   :  { %v1137_v1 = vpop.f32.mrf.mxu1 }
 0x5ee   :  { %v4180_v36 = vpack.i.bf16 %v1137_v1, %v1135_v50  ;;  %v1250_v50 = vsel %vm296_vm2, %v5342_v5, %v4188_v56 }
 0x5f0   :  { %4181 = vrot.lane.b32.xlu1 %v4180_v36, %s4832_s9 }
 0x608   :  { %v921_v15 = vpop.f32.mrf.mxu0 }
 0x610   :  { %v923_v27 = vpop.f32.mrf.mxu0 }
 0x611   :  { %v4175_v52 = vpack.i.bf16 %v923_v27, %v921_v15 }
 0x613   :  { %4176 = vrot.lane.b32.xlu0 %v4175_v52, %s4821_s24 }
 0x618   :  { %v926_v23 = vpop.f32.mrf.mxu0 }
 0x620   :  { %v928_v18 = vpop.f32.mrf.mxu0 }
 0x621   :  { %v4190_v37 = vpack.i.bf16 %v928_v18, %v926_v23 }
 0x623   :  { %4191 = vrot.lane.b32.xlu0 %v4190_v37, %s4821_s24  ;;  %v4202_v37 = vpop.permute.xlu2 %4201 }
 0x624   :  { %v4203_v4 = vunpack.i.l.bf16 %v4202_v37 }
 0x628   :  { %v931_v49 = vpop.f32.mrf.mxu0 }
 0x62b   :  { %v1140_v51 = vpop.f32.mrf.mxu1 }
 0x630   :  { %v933_v7 = vpop.f32.mrf.mxu0  ;;  %v4162_v57 = vpop.permute.xlu1 %4161 }
 0x631   :  { %v4205_v54 = vpack.i.bf16 %v933_v7, %v931_v49  ;;  %v4164_v22 = vunpack.i.h.bf16 %v4162_v57  ;;  %v4163_v29 = vunpack.i.l.bf16 %v4162_v57  ;;  %v4204_v49 = vunpack.i.h.bf16 %v4202_v37 }
 0x633   :  { %v1142_v63 = vpop.f32.mrf.mxu1  ;;  %4206 = vrot.lane.b32.xlu0 %v4205_v54, %s4821_s24  ;;  %v1256_v25 = vsel %vm1254_vm4, %v1247_v44, %v4164_v22  ;;  %v1255_v26 = vsel %vm1254_vm4, %v1246_v34, %v4163_v29  ;;  %v1253_v54 = vsel %vm296_vm2, %v5355_v48, %v4204_v49  ;;  %v4296_v48 = vld [vmem:[%s6818_s6] ss:$0 sm:$0xff]  ;;  %v4646_v34 = vld [vmem:[%s6812_s0 + $0x8] sm:$0xff] }
 0x634   :  { %v4195_v43 = vpack.i.bf16 %v1142_v63, %v1140_v51  ;;  %v1252_v63 = vsel %vm296_vm2, %v5348_v28, %v4203_v4  ;;  %v4645_v28 = vld [vmem:[%s6812_s0] sm:$0xff] }
 0x636   :  { %4196 = vrot.lane.b32.xlu1 %v4195_v43, %s4832_s9 }
 0x63b   :  { %v1145_v9 = vpop.f32.mrf.mxu1 }
 0x643   :  { %v1147_v11 = vpop.f32.mrf.mxu1 }
 0x644   :  { %v4210_v42 = vpack.i.bf16 %v1147_v11, %v1145_v9 }
 0x646   :  { %4211 = vrot.lane.b32.xlu1 %v4210_v42, %s4832_s9 }
 0x652   :  { %v4167_v2 = vpop.permute.xlu0 %4166 }
 0x653   :  { %v4169_v12 = vunpack.i.h.bf16 %v4167_v2  ;;  %v4168_v59 = vunpack.i.l.bf16 %v4167_v2 }
 0x655   :  { %v1265_v61 = vsel %vm1263_vm5, %v1256_v25, %v4169_v12  ;;  %v1264_v35 = vsel %vm1263_vm5, %v1255_v26, %v4168_v59 }
 0x656   :  { %v1272_v14 = vpack.c.bf16 %v1265_v61, %v1264_v35  ;;  %v4647_v61 = vld [vmem:[%s6812_s0 + $0x10] sm:$0xff] }
 0x658   :  { %3997 = vmatmul.msk.bf16.vlgmr.msra.gmra.mxu3 %vm185_vm0, %v1272_v14 }
 0x662   :  { %v4182_v46 = vpop.permute.xlu1 %4181 }
 0x663   :  { %v4184_v20 = vunpack.i.h.bf16 %v4182_v46  ;;  %v4183_v45 = vunpack.i.l.bf16 %v4182_v46 }
 0x685   :  { %v4177_v40 = vpop.permute.xlu0 %4176 }
 0x686   :  { %v4179_v13 = vunpack.i.h.bf16 %v4177_v40  ;;  %v4178_v38 = vunpack.i.l.bf16 %v4177_v40 }
 0x688   :  { %v1257_v3 = vsel %vm1254_vm4, %v1248_v21, %v4178_v38  ;;  %v1258_v62 = vsel %vm1254_vm4, %v1249_v19, %v4179_v13  ;;  %v4649_v19 = vld [vmem:[%s6812_s0 + $0x20] sm:$0xff] }
 0x689   :  { %v1266_v41 = vsel %vm1263_vm5, %v1257_v3, %v4183_v45  ;;  %v1267_v16 = vsel %vm1263_vm5, %v1258_v62, %v4184_v20  ;;  %v4833_v3 = vmov 32.0  }
 0x68a   :  { %v1273_v53 = vpack.c.bf16 %v1267_v16, %v1266_v41  ;;  %4439 = vrcp.f32 %v4833_v3  ;;  %v4650_v41 = vld [vmem:[%s6812_s0 + $0x28] sm:$0xff] }
 0x68c   :  { %3998 = vmatmul.msk.bf16.gmra.mxu3 %vm185_vm0, %v1273_v53 }
 0x690   :  { %v4440_v32 = vpop.eup %4439 }
 0x691   :  { %v1372_v56 = vmul.f32 32.0, %v4440_v32  ;;  %vm1376_vm6 = vweird.f32 %v4440_v32 }
 0x695   :  { %v4192_v6 = vpop.permute.xlu0 %4191 }
 0x696   :  { %v4194_v24 = vunpack.i.h.bf16 %v4192_v6  ;;  %v4193_v60 = vunpack.i.l.bf16 %v4192_v6 }
 0x698   :  { %v1259_v15 = vsel %vm1254_vm4, %v1250_v50, %v4193_v60  ;;  %v1260_v27 = vsel %vm1254_vm4, %v1251_v47, %v4194_v24  ;;  %v4651_v24 = vld [vmem:[%s6812_s0 + $0x30] sm:$0xff]  ;;  %v1373_v47 = vsub.f32 1.0, %v1372_v56 }
 0x69a   :  { %v1374_v50 = vmul.f32 %v4440_v32, %v1373_v47 }
 0x6a5   :  { %v4207_v8 = vpop.permute.xlu0 %4206 }
 0x6a6   :  { %v4209_v51 = vunpack.i.h.bf16 %v4207_v8  ;;  %v4208_v7 = vunpack.i.l.bf16 %v4207_v8 }
 0x6a8   :  { %v4197_v55 = vpop.permute.xlu1 %4196  ;;  %v1261_v9 = vsel %vm1254_vm4, %v1252_v63, %v4208_v7  ;;  %v1262_v11 = vsel %vm1254_vm4, %v1253_v54, %v4209_v51  ;;  %v4652_v7 = vld [vmem:[%s6812_s0 + $0x38] sm:$0xff] }
 0x6a9   :  { %v4199_v1 = vunpack.i.h.bf16 %v4197_v55  ;;  %v4198_v36 = vunpack.i.l.bf16 %v4197_v55 }
 0x6ab   :  { %v1268_v52 = vsel %vm1263_vm5, %v1259_v15, %v4198_v36  ;;  %v1269_v23 = vsel %vm1263_vm5, %v1260_v27, %v4199_v1  ;;  %v1375_v1 = vadd.f32 %v4440_v32, %v1374_v50 }
 0x6ac   :  { %v1274_v18 = vpack.c.bf16 %v1269_v23, %v1268_v52 }
 0x6ad   :  { %v5606_v36 = vsel %vm1376_vm6, %v4440_v32, %v1375_v1 }
 0x6ae   :  { %3999 = vmatmul.msk.bf16.gmra.mxu3 %vm185_vm0, %v1274_v18 }
 0x6b8   :  { %v4212_v5 = vpop.permute.xlu1 %4211 }
 0x6b9   :  { %v4214_v43 = vunpack.i.h.bf16 %v4212_v5  ;;  %v4213_v10 = vunpack.i.l.bf16 %v4212_v5 }
 0x6bb   :  { %v1270_v42 = vsel %vm1263_vm5, %v1261_v9, %v4213_v10  ;;  %v1271_v39 = vsel %vm1263_vm5, %v1262_v11, %v4214_v43 }
 0x6bc   :  { %v1275_v57 = vpack.c.bf16 %v1271_v39, %v1270_v42 }
 0x6be   :  { %4000 = vmatmul.msk.bf16.gmra.mxu3 %vm185_vm0, %v1275_v57 }
 0x6db   :  { %v1317_v58 = vpop.f32.mrf.mxu3 }
 0x6dc   :  { %v1318_v17 = vadd.f32 %v4296_v48, %v1317_v58 }
 0x6de   :  { %v1337_v22 = vadd.f32 %v4645_v28, %v1318_v17 }
 0x6e0   :  { %v1347_v29 = vsel %vm185_vm0, %v1337_v22, 0.0 }
 0x6e1   :  { %1348 = vadd.xlane.f32.xlu2 %v1347_v29 }
 0x6e3   :  { %v1319_v2 = vpop.f32.mrf.mxu3 }
 0x6e4   :  { %v1320_v44 = vadd.f32 %v4296_v48, %v1319_v2 }
 0x6e6   :  { %v1338_v12 = vadd.f32 %v4646_v34, %v1320_v44 }
 0x6e8   :  { %v1350_v59 = vsel %vm185_vm0, %v1338_v12, 0.0 }
 0x6e9   :  { %1351 = vadd.xlane.f32.xlu0 %v1350_v59 }
 0x70f   :  { %v1322_v25 = vpop.f32.mrf.mxu3 }
 0x710   :  { %v1323_v26 = vadd.f32 %v4296_v48, %v1322_v25 }
 0x712   :  { %v1339_v35 = vadd.f32 %v4647_v61, %v1323_v26 }
 0x714   :  { %v1353_v14 = vsel %vm185_vm0, %v1339_v35, 0.0 }
 0x715   :  { %1354 = vadd.xlane.f32.xlu1 %v1353_v14 }
 0x717   :  { %v1324_v0 = vpop.f32.mrf.mxu3 }
 0x718   :  { %v1325_v31 = vadd.f32 %v4296_v48, %v1324_v0 }
 0x71a   :  { %v1340_v46 = vadd.f32 %v4648_v30, %v1325_v31 }
 0x71c   :  { %v1356_v40 = vsel %vm185_vm0, %v1340_v46, 0.0 }
 0x71d   :  { %1357 = vadd.xlane.f32.xlu2 %v1356_v40 }
 0x731   :  { %v1327_v13 = vpop.f32.mrf.mxu3 }
 0x732   :  { %v1328_v38 = vadd.f32 %v4296_v48, %v1327_v13 }
 0x734   :  { %v1341_v21 = vadd.f32 %v4649_v19, %v1328_v38  ;;  %v4119_v38 = vld [vmem:[#allocation7] sm:$0xff] }
 0x736   :  { %v1359_v20 = vsel %vm185_vm0, %v1341_v21, 0.0 }
 0x737   :  { %1360 = vadd.xlane.f32.xlu0 %v1359_v20 }
 0x739   :  { %v1329_v45 = vpop.f32.mrf.mxu3 }
 0x73a   :  { %v1330_v62 = vadd.f32 %v4296_v48, %v1329_v45 }
 0x73c   :  { %v1342_v16 = vadd.f32 %v4650_v41, %v1330_v62 }
 0x73e   :  { %v1362_v53 = vsel %vm185_vm0, %v1342_v16, 0.0 }
 0x73f   :  { %1363 = vadd.xlane.f32.xlu1 %v1362_v53 }
 0x741   :  { %v1332_v6 = vpop.f32.mrf.mxu3 }
 0x742   :  { %v1333_v33 = vadd.f32 %v4296_v48, %v1332_v6 }
 0x744   :  { %v1343_v60 = vadd.f32 %v4651_v24, %v1333_v33 }
 0x746   :  { %v1365_v55 = vsel %vm185_vm0, %v1343_v60, 0.0 }
 0x747   :  { %1366 = vadd.xlane.f32.xlu1 %v1365_v55 }
 0x749   :  { %v1334_v23 = vpop.f32.mrf.mxu3 }
 0x74a   :  { %v1335_v37 = vadd.f32 %v4296_v48, %v1334_v23  ;;  %v5662_v23 = vld [vmem:[#allocation6] ss:$0 sm:$0xff] }
 0x74c   :  { %v1344_v5 = vadd.f32 %v4652_v7, %v1335_v37  ;;  %v5670_v7 = vld [vmem:[%s6820_s8] ss:$0 sm:$0xff] }
 0x74e   :  { %v1368_v43 = vsel %vm185_vm0, %v1344_v5, 0.0 }
 0x754   :  { %v1349_v15 = vpop.xlane.xlu2 %1348 }
 0x755   :  { %v1378_v27 = vmul.f32 %v5606_v36, %v1349_v15 }
 0x757   :  { %v5609_v52 = vsub.f32 %v1337_v22, %v1378_v27 }
 0x759   :  { %v1394_v18 = vmul.f32 %v5609_v52, %v5609_v52 }
 0x75b   :  { %v1402_v8 = vsel %vm185_vm0, %v1394_v18, 0.0 }
 0x75c   :  { %v1352_v49 = vpop.xlane.xlu0 %1351  ;;  %1403 = vadd.xlane.f32.xlu2 %v1402_v8 }
 0x75d   :  { %v1379_v4 = vmul.f32 %v5606_v36, %v1352_v49 }
 0x75f   :  { %v5615_v51 = vsub.f32 %v1338_v12, %v1379_v4 }
 0x761   :  { %v1395_v54 = vmul.f32 %v5615_v51, %v5615_v51 }
 0x763   :  { %v1405_v63 = vsel %vm185_vm0, %v1395_v54, 0.0 }
 0x764   :  { %1406 = vadd.xlane.f32.xlu0 %v1405_v63  ;;  %1369 = vadd.xlane.f32.xlu2 %v1368_v43 }
 0x788   :  { %v1355_v10 = vpop.xlane.xlu1 %1354 }
 0x789   :  { %v1380_v9 = vmul.f32 %v5606_v36, %v1355_v10 }
 0x78b   :  { %v5625_v11 = vsub.f32 %v1339_v35, %v1380_v9 }
 0x78d   :  { %v1396_v42 = vmul.f32 %v5625_v11, %v5625_v11 }
 0x78f   :  { %v1408_v39 = vsel %vm185_vm0, %v1396_v42, 0.0 }
 0x790   :  { %1409 = vadd.xlane.f32.xlu0 %v1408_v39  ;;  %v1358_v57 = vpop.xlane.xlu2 %1357 }
 0x791   :  { %v1381_v48 = vmul.f32 %v5606_v36, %v1358_v57 }
 0x793   :  { %v5631_v58 = vsub.f32 %v1340_v46, %v1381_v48  ;;  %v4120_v46 = vld [vmem:[#allocation7 + $0x8] sm:$0xff] }
 0x794   :  { %1594 = vmatpush.bf16.msra.mxu0 %v4120_v46 }
 0x795   :  { %v1397_v17 = vmul.f32 %v5631_v58, %v5631_v58 }
 0x797   :  { %v1411_v28 = vsel %vm185_vm0, %v1397_v17, 0.0 }
 0x798   :  { %1412 = vadd.xlane.f32.xlu1 %v1411_v28  ;;  %1595 = vmatpush.bf16.msra.mxu0 %v4119_v38 }
 0x7aa   :  { %v1361_v22 = vpop.xlane.xlu0 %1360 }
 0x7ab   :  { %v1382_v29 = vmul.f32 %v5606_v36, %v1361_v22 }
 0x7ad   :  { %v5637_v2 = vsub.f32 %v1341_v21, %v1382_v29 }
 0x7af   :  { %v1398_v44 = vmul.f32 %v5637_v2, %v5637_v2 }
 0x7b1   :  { %v1414_v34 = vsel %vm185_vm0, %v1398_v44, 0.0 }
 0x7b2   :  { %v1364_v12 = vpop.xlane.xlu1 %1363  ;;  %1415 = vadd.xlane.f32.xlu2 %v1414_v34 }
 0x7b3   :  { %v1383_v59 = vmul.f32 %v5606_v36, %v1364_v12 }
 0x7b5   :  { %v5643_v25 = vsub.f32 %v1342_v16, %v1383_v59 }
 0x7b7   :  { %v1399_v26 = vmul.f32 %v5643_v25, %v5643_v25 }
 0x7b9   :  { %v1417_v61 = vsel %vm185_vm0, %v1399_v26, 0.0 }
 0x7ba   :  { %v1367_v35 = vpop.xlane.xlu1 %1366  ;;  %1418 = vadd.xlane.f32.xlu0 %v1417_v61 }
 0x7bb   :  { %v1384_v14 = vmul.f32 %v5606_v36, %v1367_v35 }
 0x7bd   :  { %v5649_v0 = vsub.f32 %v1343_v60, %v1384_v14 }
 0x7bf   :  { %v1400_v31 = vmul.f32 %v5649_v0, %v5649_v0 }
 0x7c1   :  { %v1420_v30 = vsel %vm185_vm0, %v1400_v31, 0.0 }
 0x7c2   :  { %1421 = vadd.xlane.f32.xlu1 %v1420_v30 }
 0x7cf   :  { %v1404_v40 = vpop.xlane.xlu2 %1403 }
 0x7d0   :  { %v1426_v13 = vmul.f32 %v1404_v40, %v5606_v36 }
 0x7d2   :  { %v1434_v19 = vadd.f32 1e-05, %v1426_v13 }
 0x7d4   :  { %4441 = vrsqrt.f32 %v1434_v19  ;;  %vm1448_vm8 = vweird.f32 %v1434_v19 }
 0x7d7   :  { %v1407_v21 = vpop.xlane.xlu0 %1406  ;;  %v1370_v20 = vpop.xlane.xlu2 %1369 }
 0x7d8   :  { %v1427_v45 = vmul.f32 %v1407_v21, %v5606_v36  ;;  %v1385_v3 = vmul.f32 %v5606_v36, %v1370_v20 }
 0x7da   :  { %v4442_v62 = vpop.eup %4441  ;;  %v1435_v41 = vadd.f32 1e-05, %v1427_v45  ;;  %v5657_v16 = vsub.f32 %v1344_v5, %v1385_v3 }
 0x7db   :  { %v1443_v53 = vmul.f32 %v4442_v62, %v1434_v19  ;;  %vm1449_vm7 = vweird.f32 %v4442_v62 }
 0x7dc   :  { %4443 = vrsqrt.f32 %v1435_v41  ;;  %v1401_v32 = vmul.f32 %v5657_v16, %v5657_v16  ;;  %vm1450_vm9 = vmor %vm1448_vm8, %vm1449_vm7  ;;  %vm1458_vm11 = vweird.f32 %v1435_v41 }
 0x7dd   :  { %v1444_v6 = vmul.f32 %v4442_v62, %v1443_v53 }
 0x7de   :  { %v1423_v33 = vsel %vm185_vm0, %v1401_v32, 0.0 }
 0x7df   :  { %v1445_v56 = vmul.f32 0.5, %v1444_v6  ;;  %1424 = vadd.xlane.f32.xlu2 %v1423_v33 }
 0x7e1   :  { %v1446_v24 = vsub.f32 1.5, %v1445_v56 }
 0x7e2   :  { %v4444_v60 = vpop.eup %4443 }
 0x7e3   :  { %v1447_v55 = vmul.f32 %v4442_v62, %v1446_v24  ;;  %v1453_v47 = vmul.f32 %v4444_v60, %v1435_v41  ;;  %vm1459_vm10 = vweird.f32 %v4444_v60 }
 0x7e4   :  { %vm1460_vm12 = vmor %vm1458_vm11, %vm1459_vm10 }
 0x7e5   :  { %v1454_v50 = vmul.f32 %v4444_v60, %v1453_v47  ;;  %v1451_v1 = vsel %vm1450_vm9, %v4442_v62, %v1447_v55 }
 0x7e6   :  { %v1522_v18 = vmul.f32 %v1451_v1, %v5609_v52 }
 0x7e7   :  { %v1455_v15 = vmul.f32 0.5, %v1454_v50 }
 0x7e8   :  { %v1533_v49 = vmul.f32 %v5662_v23, %v1522_v18 }
 0x7e9   :  { %v1456_v27 = vsub.f32 1.5, %v1455_v15 }
 0x7ea   :  { %v5674_v54 = vadd.f32 %v5670_v7, %v1533_v49 }
 0x7eb   :  { %v1457_v37 = vmul.f32 %v4444_v60, %v1456_v27 }
 0x7ed   :  { %v1461_v8 = vsel %vm1460_vm12, %v4444_v60, %v1457_v37 }
 0x7ee   :  { %v1523_v4 = vmul.f32 %v1461_v8, %v5615_v51 }
 0x7f0   :  { %v1534_v5 = vmul.f32 %v5662_v23, %v1523_v4 }
 0x7f2   :  { %v5677_v52 = vadd.f32 %v5670_v7, %v1534_v5 }
 0x7f4   :  { %v1552_v63 = vpack.c.bf16 %v5677_v52, %v5674_v54 }
 0x7f6   :  { %4009 = vmatmul.msk.bf16.vlgmr.msra.gmra.mxu0 %vm185_vm0, %v1552_v63 }
 0x803   :  { %v1410_v43 = vpop.xlane.xlu0 %1409 }
 0x804   :  { %v1428_v51 = vmul.f32 %v1410_v43, %v5606_v36 }
 0x806   :  { %v1436_v10 = vadd.f32 1e-05, %v1428_v51 }
 0x808   :  { %4445 = vrsqrt.f32 %v1436_v10  ;;  %vm1468_vm14 = vweird.f32 %v1436_v10 }
 0x80b   :  { %v1413_v9 = vpop.xlane.xlu1 %1412 }
 0x80c   :  { %v1429_v42 = vmul.f32 %v1413_v9, %v5606_v36 }
 0x80e   :  { %v4446_v39 = vpop.eup %4445  ;;  %v1437_v57 = vadd.f32 1e-05, %v1429_v42 }
 0x80f   :  { %v1463_v48 = vmul.f32 %v4446_v39, %v1436_v10  ;;  %vm1469_vm13 = vweird.f32 %v4446_v39 }
 0x810   :  { %4447 = vrsqrt.f32 %v1437_v57  ;;  %vm1470_vm15 = vmor %vm1468_vm14, %vm1469_vm13  ;;  %vm1478_vm7 = vweird.f32 %v1437_v57 }
 0x811   :  { %v1464_v17 = vmul.f32 %v4446_v39, %v1463_v48 }
 0x813   :  { %v1465_v28 = vmul.f32 0.5, %v1464_v17  ;;  %v4122_v17 = vld [vmem:[#allocation9 + $0x8] sm:$0xff] }
 0x814   :  { %1667 = vmatpush.bf16.msra.mxu2 %v4122_v17 }
 0x815   :  { %v1466_v22 = vsub.f32 1.5, %v1465_v28 }
 0x816   :  { %v4448_v29 = vpop.eup %4447 }
 0x817   :  { %v1467_v44 = vmul.f32 %v4446_v39, %v1466_v22  ;;  %v1473_v34 = vmul.f32 %v4448_v29, %v1437_v57  ;;  %vm1479_vm6 = vweird.f32 %v4448_v29 }
 0x818   :  { %vm1480_vm8 = vmor %vm1478_vm7, %vm1479_vm6 }
 0x819   :  { %v1474_v12 = vmul.f32 %v4448_v29, %v1473_v34  ;;  %v1471_v59 = vsel %vm1470_vm15, %v4446_v39, %v1467_v44  ;;  %v4121_v44 = vld [vmem:[#allocation9] sm:$0xff] }
 0x81a   :  { %v1524_v35 = vmul.f32 %v1471_v59, %v5625_v11  ;;  %1668 = vmatpush.bf16.msra.mxu2 %v4121_v44 }
 0x81b   :  { %v1475_v26 = vmul.f32 0.5, %v1474_v12 }
 0x81c   :  { %v1535_v46 = vmul.f32 %v5662_v23, %v1524_v35 }
 0x81d   :  { %v1476_v61 = vsub.f32 1.5, %v1475_v26 }
 0x81e   :  { %v5690_v19 = vadd.f32 %v5670_v7, %v1535_v46 }
 0x81f   :  { %v1477_v14 = vmul.f32 %v4448_v29, %v1476_v61 }
 0x821   :  { %v1481_v31 = vsel %vm1480_vm8, %v4448_v29, %v1477_v14 }
 0x822   :  { %v1525_v30 = vmul.f32 %v1481_v31, %v5631_v58 }
 0x824   :  { %v1536_v40 = vmul.f32 %v5662_v23, %v1525_v30 }
 0x825   :  { %v1416_v13 = vpop.xlane.xlu2 %1415 }
 0x826   :  { %v1430_v38 = vmul.f32 %v1416_v13, %v5606_v36  ;;  %v5693_v21 = vadd.f32 %v5670_v7, %v1536_v40 }
 0x828   :  { %v1438_v11 = vadd.f32 1e-05, %v1430_v38  ;;  %v1553_v20 = vpack.c.bf16 %v5693_v21, %v5690_v19 }
 0x82a   :  { %4449 = vrsqrt.f32 %v1438_v11  ;;  %4010 = vmatmul.msk.bf16.gmra.mxu0 %vm185_vm0, %v1553_v20  ;;  %vm1488_vm10 = vweird.f32 %v1438_v11 }
 0x82d   :  { %v1419_v58 = vpop.xlane.xlu0 %1418 }
 0x82e   :  { %v1431_v45 = vmul.f32 %v1419_v58, %v5606_v36 }
 0x830   :  { %v4450_v3 = vpop.eup %4449  ;;  %v1439_v62 = vadd.f32 1e-05, %v1431_v45 }
 0x831   :  { %v1483_v41 = vmul.f32 %v4450_v3, %v1438_v11  ;;  %vm1489_vm9 = vweird.f32 %v4450_v3 }
 0x832   :  { %4451 = vrsqrt.f32 %v1439_v62  ;;  %vm1490_vm11 = vmor %vm1488_vm10, %vm1489_vm9  ;;  %vm1498_vm13 = vweird.f32 %v1439_v62 }
 0x833   :  { %v1484_v53 = vmul.f32 %v4450_v3, %v1483_v41 }
 0x835   :  { %v1485_v32 = vmul.f32 0.5, %v1484_v53  ;;  %v1422_v60 = vpop.xlane.xlu1 %1421 }
 0x836   :  { %v1432_v1 = vmul.f32 %v1422_v60, %v5606_v36 }
 0x837   :  { %v1486_v6 = vsub.f32 1.5, %v1485_v32 }
 0x838   :  { %v4452_v33 = vpop.eup %4451  ;;  %v1440_v37 = vadd.f32 1e-05, %v1432_v1 }
 0x839   :  { %v1487_v56 = vmul.f32 %v4450_v3, %v1486_v6  ;;  %v1493_v24 = vmul.f32 %v4452_v33, %v1439_v62  ;;  %vm1499_vm12 = vweird.f32 %v4452_v33 }
 0x83a   :  { %vm1500_vm14 = vmor %vm1498_vm13, %vm1499_vm12  ;;  %4453 = vrsqrt.f32 %v1440_v37  ;;  %vm1508_vm6 = vweird.f32 %v1440_v37 }
 0x83b   :  { %v1494_v55 = vmul.f32 %v4452_v33, %v1493_v24  ;;  %v1491_v47 = vsel %vm1490_vm11, %v4450_v3, %v1487_v56 }
 0x83c   :  { %v1526_v27 = vmul.f32 %v1491_v47, %v5637_v2 }
 0x83d   :  { %v1495_v50 = vmul.f32 0.5, %v1494_v55 }
 0x83e   :  { %v1537_v4 = vmul.f32 %v5662_v23, %v1526_v27 }
 0x83f   :  { %v1496_v15 = vsub.f32 1.5, %v1495_v50 }
 0x840   :  { %v5705_v63 = vadd.f32 %v5670_v7, %v1537_v4  ;;  %v4454_v51 = vpop.eup %4453 }
 0x841   :  { %v1497_v18 = vmul.f32 %v4452_v33, %v1496_v15  ;;  %v1503_v10 = vmul.f32 %v4454_v51, %v1440_v37  ;;  %vm1509_vm15 = vweird.f32 %v4454_v51 }
 0x842   :  { %vm1510_vm7 = vmor %vm1508_vm6, %vm1509_vm15 }
 0x843   :  { %v1501_v8 = vsel %vm1500_vm14, %v4452_v33, %v1497_v18  ;;  %v1504_v9 = vmul.f32 %v4454_v51, %v1503_v10 }
 0x844   :  { %v1527_v49 = vmul.f32 %v1501_v8, %v5643_v25 }
 0x845   :  { %v1505_v57 = vmul.f32 0.5, %v1504_v9 }
 0x846   :  { %v1538_v5 = vmul.f32 %v5662_v23, %v1527_v49 }
 0x847   :  { %v1506_v48 = vsub.f32 1.5, %v1505_v57 }
 0x848   :  { %v5708_v43 = vadd.f32 %v5670_v7, %v1538_v5  ;;  %v4300_v5 = vld [vmem:[%s6824_s12] ss:$0 sm:$0xff] }
 0x849   :  { %v1507_v22 = vmul.f32 %v4454_v51, %v1506_v48 }
 0x84a   :  { %v1554_v2 = vpack.c.bf16 %v5708_v43, %v5705_v63 }
 0x84b   :  { %v1511_v12 = vsel %vm1510_vm7, %v4454_v51, %v1507_v22 }
 0x84c   :  { %4011 = vmatmul.msk.bf16.gmra.mxu0 %vm185_vm0, %v1554_v2  ;;  %v1528_v61 = vmul.f32 %v1511_v12, %v5649_v0 }
 0x84e   :  { %v1539_v30 = vmul.f32 %v5662_v23, %v1528_v61 }
 0x850   :  { %v5719_v40 = vadd.f32 %v5670_v7, %v1539_v30 }
 0x852   :  { %v1425_v25 = vpop.xlane.xlu2 %1424 }
 0x853   :  { %v1433_v42 = vmul.f32 %v1425_v25, %v5606_v36 }
 0x855   :  { %v1441_v39 = vadd.f32 1e-05, %v1433_v42 }
 0x857   :  { %4455 = vrsqrt.f32 %v1441_v39  ;;  %vm1518_vm9 = vweird.f32 %v1441_v39 }
 0x85d   :  { %v4456_v28 = vpop.eup %4455 }
 0x85e   :  { %v1513_v29 = vmul.f32 %v4456_v28, %v1441_v39  ;;  %vm1519_vm8 = vweird.f32 %v4456_v28 }
 0x85f   :  { %vm1520_vm10 = vmor %vm1518_vm9, %vm1519_vm8 }
 0x860   :  { %v1514_v34 = vmul.f32 %v4456_v28, %v1513_v29 }
 0x862   :  { %v1515_v59 = vmul.f32 0.5, %v1514_v34 }
 0x864   :  { %v1516_v26 = vsub.f32 1.5, %v1515_v59 }
 0x866   :  { %v1517_v35 = vmul.f32 %v4456_v28, %v1516_v26 }
 0x868   :  { %v1521_v14 = vsel %vm1520_vm10, %v4456_v28, %v1517_v35 }
 0x869   :  { %v1529_v31 = vmul.f32 %v1521_v14, %v5657_v16  ;;  %v4299_v16 = vld [vmem:[%s6822_s10] ss:$0 sm:$0xff] }
 0x86b   :  { %v1540_v46 = vmul.f32 %v5662_v23, %v1529_v31 }
 0x86d   :  { %v5722_v13 = vadd.f32 %v5670_v7, %v1540_v46 }
 0x86f   :  { %v1555_v38 = vpack.c.bf16 %v5722_v13, %v5719_v40 }
 0x871   :  { %4012 = vmatmul.msk.bf16.gmra.mxu0 %vm185_vm0, %v1555_v38 }
 0x873   :  { %v1597_v0 = vpop.f32.mrf.mxu0 }
 0x874   :  { %v1598_v11 = vadd.f32 %v4299_v16, %v1597_v0 }
 0x876   :  { %v1617_v23 = vmax.f32 %v1598_v11, 0.0 }
 0x87b   :  { %v1599_v20 = vpop.f32.mrf.mxu0 }
 0x87c   :  { %v1600_v58 = vadd.f32 %v4299_v16, %v1599_v20 }
 0x87e   :  { %v1618_v45 = vmax.f32 %v1600_v58, 0.0 }
 0x880   :  { %v1625_v3 = vpack.c.bf16 %v1618_v45, %v1617_v23 }
 0x882   :  { %4021 = vmatmul.msk.bf16.vlgmr.msra.gmra.mxu2 %vm185_vm0, %v1625_v3 }
 0x8a7   :  { %v1602_v7 = vpop.f32.mrf.mxu0 }
 0x8a8   :  { %v1603_v62 = vadd.f32 %v4299_v16, %v1602_v7 }
 0x8aa   :  { %v1619_v32 = vmax.f32 %v1603_v62, 0.0 }
 0x8af   :  { %v1604_v41 = vpop.f32.mrf.mxu0 }
 0x8b0   :  { %v1605_v53 = vadd.f32 %v4299_v16, %v1604_v41 }
 0x8b2   :  { %v1620_v6 = vmax.f32 %v1605_v53, 0.0 }
 0x8b4   :  { %v1626_v33 = vpack.c.bf16 %v1620_v6, %v1619_v32 }
 0x8b6   :  { %4022 = vmatmul.msk.bf16.gmra.mxu2 %vm185_vm0, %v1626_v33 }
 0x8c9   :  { %v1607_v56 = vpop.f32.mrf.mxu0 }
 0x8ca   :  { %v1608_v24 = vadd.f32 %v4299_v16, %v1607_v56 }
 0x8cc   :  { %v1621_v47 = vmax.f32 %v1608_v24, 0.0 }
 0x8d1   :  { %v1609_v60 = vpop.f32.mrf.mxu0 }
 0x8d2   :  { %v1610_v55 = vadd.f32 %v4299_v16, %v1609_v60 }
 0x8d4   :  { %v1622_v50 = vmax.f32 %v1610_v55, 0.0 }
 0x8d6   :  { %v1627_v1 = vpack.c.bf16 %v1622_v50, %v1621_v47 }
 0x8d8   :  { %4023 = vmatmul.msk.bf16.gmra.mxu2 %vm185_vm0, %v1627_v1 }
 0x8ee   :  { %v1612_v15 = vpop.f32.mrf.mxu0 }
 0x8ef   :  { %v1613_v27 = vadd.f32 %v4299_v16, %v1612_v15 }
 0x8f1   :  { %v1623_v8 = vmax.f32 %v1613_v27, 0.0 }
 0x8f6   :  { %v1614_v18 = vpop.f32.mrf.mxu0 }
 0x8f7   :  { %v1615_v37 = vadd.f32 %v4299_v16, %v1614_v18 }
 0x8f9   :  { %v1624_v49 = vmax.f32 %v1615_v37, 0.0 }
 0x8fb   :  { %v1628_v4 = vpack.c.bf16 %v1624_v49, %v1623_v8 }
 0x8fd   :  { %4024 = vmatmul.msk.bf16.gmra.mxu2 %vm185_vm0, %v1628_v4 }
 0x905   :  { %v1670_v2 = vpop.f32.mrf.mxu2 }
 0x906   :  { %v1671_v51 = vadd.f32 %v4300_v5, %v1670_v2 }
 0x908   :  { %v1690_v10 = vadd.f32 %v1671_v51, %v5674_v54 }
 0x90a   :  { %v1700_v9 = vsel %vm185_vm0, %v1690_v10, 0.0 }
 0x90b   :  { %1701 = vadd.xlane.f32.xlu0 %v1700_v9 }
 0x90d   :  { %v1672_v25 = vpop.f32.mrf.mxu2 }
 0x90e   :  { %v1673_v42 = vadd.f32 %v4300_v5, %v1672_v25 }
 0x910   :  { %v1691_v39 = vadd.f32 %v1673_v42, %v5677_v52 }
 0x912   :  { %v1703_v57 = vsel %vm185_vm0, %v1691_v39, 0.0 }
 0x913   :  { %1704 = vadd.xlane.f32.xlu1 %v1703_v57 }
 0x939   :  { %v1675_v48 = vpop.f32.mrf.mxu2 }
 0x93a   :  { %v1676_v17 = vadd.f32 %v4300_v5, %v1675_v48 }
 0x93c   :  { %v1692_v28 = vadd.f32 %v1676_v17, %v5690_v19 }
 0x93e   :  { %v1706_v22 = vsel %vm185_vm0, %v1692_v28, 0.0 }
 0x93f   :  { %1707 = vadd.xlane.f32.xlu2 %v1706_v22 }
 0x941   :  { %v1677_v29 = vpop.f32.mrf.mxu2 }
 0x942   :  { %v1678_v44 = vadd.f32 %v4300_v5, %v1677_v29 }
 0x944   :  { %v1693_v54 = vadd.f32 %v1678_v44, %v5693_v21 }
 0x946   :  { %v1709_v34 = vsel %vm185_vm0, %v1693_v54, 0.0 }
 0x947   :  { %1710 = vadd.xlane.f32.xlu0 %v1709_v34 }
 0x95b   :  { %v1680_v12 = vpop.f32.mrf.mxu2 }
 0x95c   :  { %v1681_v59 = vadd.f32 %v4300_v5, %v1680_v12 }
 0x95e   :  { %v1694_v52 = vadd.f32 %v1681_v59, %v5705_v63 }
 0x960   :  { %v1712_v26 = vsel %vm185_vm0, %v1694_v52, 0.0 }
 0x961   :  { %1713 = vadd.xlane.f32.xlu1 %v1712_v26 }
 0x963   :  { %v1682_v61 = vpop.f32.mrf.mxu2 }
 0x964   :  { %v1683_v35 = vadd.f32 %v4300_v5, %v1682_v61 }
 0x966   :  { %v1695_v19 = vadd.f32 %v1683_v35, %v5708_v43 }
 0x968   :  { %v1715_v14 = vsel %vm185_vm0, %v1695_v19, 0.0 }
 0x969   :  { %1716 = vadd.xlane.f32.xlu2 %v1715_v14 }
 0x97e   :  { %v1702_v31 = vpop.xlane.xlu0 %1701 }
 0x97f   :  { %v1724_v21 = vmul.f32 %v1702_v31, %v5606_v36 }
 0x980   :  { %v1685_v30 = vpop.f32.mrf.mxu2 }
 0x981   :  { %v5750_v46 = vsub.f32 %v1690_v10, %v1724_v21  ;;  %v1686_v38 = vadd.f32 %v4300_v5, %v1685_v30 }
 0x983   :  { %v1740_v63 = vmul.f32 %v5750_v46, %v5750_v46  ;;  %v1696_v0 = vadd.f32 %v1686_v38, %v5719_v40 }
 0x985   :  { %v1748_v16 = vsel %vm185_vm0, %v1740_v63, 0.0  ;;  %v1718_v11 = vsel %vm185_vm0, %v1696_v0, 0.0 }
 0x986   :  { %v1705_v43 = vpop.xlane.xlu1 %1704  ;;  %1749 = vadd.xlane.f32.xlu0 %v1748_v16  ;;  %1719 = vadd.xlane.f32.xlu2 %v1718_v11 }
 0x987   :  { %v1725_v20 = vmul.f32 %v1705_v43, %v5606_v36 }
 0x988   :  { %v1687_v58 = vpop.f32.mrf.mxu2 }
 0x989   :  { %v5758_v23 = vsub.f32 %v1691_v39, %v1725_v20  ;;  %v1688_v45 = vadd.f32 %v4300_v5, %v1687_v58  ;;  %v4124_v5 = vld [vmem:[%s6815_s3 + $0x18] sm:$0xff]  ;;  %v4123_v39 = vld [vmem:[%s6815_s3 + $0x10] sm:$0xff]  ;;  %v5815_v20 = vld [vmem:[%s6826_s14] ss:$0 sm:$0xff] }
 0x98a   :  { %1942 = vmatpush.bf16.msrb.mxu1 %v4124_v5 }
 0x98b   :  { %v1741_v3 = vmul.f32 %v5758_v23, %v5758_v23  ;;  %v1697_v7 = vadd.f32 %v1688_v45, %v5722_v13 }
 0x98d   :  { %v1751_v40 = vsel %vm185_vm0, %v1741_v3, 0.0  ;;  %v1721_v62 = vsel %vm185_vm0, %v1697_v7, 0.0 }
 0x98e   :  { %1752 = vadd.xlane.f32.xlu1 %v1751_v40  ;;  %1722 = vadd.xlane.f32.xlu0 %v1721_v62 }
 0x98f   :  { %1943 = vmatpush.bf16.msrb.mxu1 %v4123_v39 }
 0x9b2   :  { %v1708_v41 = vpop.xlane.xlu2 %1707 }
 0x9b3   :  { %v1726_v53 = vmul.f32 %v1708_v41, %v5606_v36 }
 0x9b5   :  { %v5766_v32 = vsub.f32 %v1692_v28, %v1726_v53 }
 0x9b7   :  { %v1742_v6 = vmul.f32 %v5766_v32, %v5766_v32 }
 0x9b9   :  { %v1754_v33 = vsel %vm185_vm0, %v1742_v6, 0.0 }
 0x9ba   :  { %v1711_v56 = vpop.xlane.xlu0 %1710  ;;  %1755 = vadd.xlane.f32.xlu1 %v1754_v33 }
 0x9bb   :  { %v1727_v13 = vmul.f32 %v1711_v56, %v5606_v36 }
 0x9bd   :  { %v5772_v24 = vsub.f32 %v1693_v54, %v1727_v13 }
 0x9bf   :  { %v1743_v60 = vmul.f32 %v5772_v24, %v5772_v24 }
 0x9c1   :  { %v1757_v55 = vsel %vm185_vm0, %v1743_v60, 0.0 }
 0x9c2   :  { %1758 = vadd.xlane.f32.xlu2 %v1757_v55 }
 0x9d4   :  { %v1714_v47 = vpop.xlane.xlu1 %1713 }
 0x9d5   :  { %v1728_v50 = vmul.f32 %v1714_v47, %v5606_v36 }
 0x9d7   :  { %v5778_v1 = vsub.f32 %v1694_v52, %v1728_v50 }
 0x9d9   :  { %v1744_v15 = vmul.f32 %v5778_v1, %v5778_v1 }
 0x9db   :  { %v1760_v27 = vsel %vm185_vm0, %v1744_v15, 0.0 }
 0x9dc   :  { %1761 = vadd.xlane.f32.xlu0 %v1760_v27  ;;  %v1717_v18 = vpop.xlane.xlu2 %1716 }
 0x9dd   :  { %v1729_v37 = vmul.f32 %v1717_v18, %v5606_v36 }
 0x9df   :  { %v5784_v8 = vsub.f32 %v1695_v19, %v1729_v37 }
 0x9e1   :  { %v1745_v49 = vmul.f32 %v5784_v8, %v5784_v8 }
 0x9e3   :  { %v1763_v4 = vsel %vm185_vm0, %v1745_v49, 0.0 }
 0x9e4   :  { %1764 = vadd.xlane.f32.xlu1 %v1763_v4 }
 0x9f9   :  { %v1750_v2 = vpop.xlane.xlu0 %1749  ;;  %v1720_v51 = vpop.xlane.xlu2 %1719 }
 0x9fa   :  { %v1772_v10 = vmul.f32 %v1750_v2, %v5606_v36  ;;  %v1730_v9 = vmul.f32 %v1720_v51, %v5606_v36 }
 0x9fc   :  { %v1780_v25 = vadd.f32 1e-05, %v1772_v10  ;;  %v5794_v42 = vsub.f32 %v1696_v0, %v1730_v9  ;;  %v5809_v0 = vld [vmem:[#allocation10] ss:$0 sm:$0xff] }
 0x9fe   :  { %4457 = vrsqrt.f32 %v1780_v25  ;;  %v1746_v57 = vmul.f32 %v5794_v42, %v5794_v42  ;;  %vm1794_vm12 = vweird.f32 %v1780_v25 }
 0xa00   :  { %v1766_v48 = vsel %vm185_vm0, %v1746_v57, 0.0 }
 0xa01   :  { %v1753_v17 = vpop.xlane.xlu1 %1752  ;;  %v1723_v28 = vpop.xlane.xlu0 %1722  ;;  %1767 = vadd.xlane.f32.xlu2 %v1766_v48 }
 0xa02   :  { %v1773_v22 = vmul.f32 %v1753_v17, %v5606_v36  ;;  %v1731_v29 = vmul.f32 %v1723_v28, %v5606_v36 }
 0xa04   :  { %v4458_v44 = vpop.eup %4457  ;;  %v1781_v54 = vadd.f32 1e-05, %v1773_v22  ;;  %v5804_v34 = vsub.f32 %v1697_v7, %v1731_v29 }
 0xa05   :  { %v1789_v12 = vmul.f32 %v4458_v44, %v1780_v25  ;;  %vm1795_vm11 = vweird.f32 %v4458_v44 }
 0xa06   :  { %4459 = vrsqrt.f32 %v1781_v54  ;;  %v1747_v59 = vmul.f32 %v5804_v34, %v5804_v34  ;;  %vm1796_vm13 = vmor %vm1794_vm12, %vm1795_vm11  ;;  %vm1804_vm15 = vweird.f32 %v1781_v54 }
 0xa07   :  { %v1790_v52 = vmul.f32 %v4458_v44, %v1789_v12 }
 0xa08   :  { %v1769_v26 = vsel %vm185_vm0, %v1747_v59, 0.0 }
 0xa09   :  { %v1791_v61 = vmul.f32 0.5, %v1790_v52  ;;  %1770 = vadd.xlane.f32.xlu0 %v1769_v26 }
 0xa0b   :  { %v1792_v35 = vsub.f32 1.5, %v1791_v61 }
 0xa0c   :  { %v4460_v19 = vpop.eup %4459 }
 0xa0d   :  { %v1793_v14 = vmul.f32 %v4458_v44, %v1792_v35  ;;  %v1799_v31 = vmul.f32 %v4460_v19, %v1781_v54  ;;  %vm1805_vm14 = vweird.f32 %v4460_v19 }
 0xa0e   :  { %vm1806_vm6 = vmor %vm1804_vm15, %vm1805_vm14 }
 0xa0f   :  { %v1800_v21 = vmul.f32 %v4460_v19, %v1799_v31  ;;  %v1797_v30 = vsel %vm1796_vm13, %v4458_v44, %v1793_v14 }
 0xa10   :  { %v1868_v16 = vmul.f32 %v1797_v30, %v5750_v46 }
 0xa11   :  { %v1801_v38 = vmul.f32 0.5, %v1800_v21 }
 0xa12   :  { %v1879_v58 = vmul.f32 %v5809_v0, %v1868_v16 }
 0xa13   :  { %v1802_v63 = vsub.f32 1.5, %v1801_v38 }
 0xa14   :  { %v5821_v7 = vadd.f32 %v5815_v20, %v1879_v58 }
 0xa15   :  { %v1803_v11 = vmul.f32 %v4460_v19, %v1802_v63 }
 0xa17   :  { %v1807_v43 = vsel %vm1806_vm6, %v4460_v19, %v1803_v11 }
 0xa18   :  { %v1869_v45 = vmul.f32 %v1807_v43, %v5758_v23 }
 0xa1a   :  { %v1880_v3 = vmul.f32 %v5809_v0, %v1869_v45 }
 0xa1c   :  { %v5824_v46 = vadd.f32 %v5815_v20, %v1880_v3 }
 0xa1e   :  { %v1898_v40 = vpack.c.bf16 %v5824_v46, %v5821_v7 }
 0xa20   :  { %4038 = vmatmul.msk.bf16.vlgmr.msrb.gmra.mxu1 %vm185_vm0, %v1898_v40 }
 0xa2d   :  { %v1756_v62 = vpop.xlane.xlu1 %1755 }
 0xa2e   :  { %v1774_v41 = vmul.f32 %v1756_v62, %v5606_v36 }
 0xa30   :  { %v1782_v53 = vadd.f32 1e-05, %v1774_v41 }
 0xa32   :  { %4461 = vrsqrt.f32 %v1782_v53  ;;  %vm1814_vm8 = vweird.f32 %v1782_v53 }
 0xa35   :  { %v1759_v6 = vpop.xlane.xlu2 %1758 }
 0xa36   :  { %v1775_v23 = vmul.f32 %v1759_v6, %v5606_v36 }
 0xa38   :  { %v4462_v33 = vpop.eup %4461  ;;  %v1783_v56 = vadd.f32 1e-05, %v1775_v23 }
 0xa39   :  { %v1809_v13 = vmul.f32 %v4462_v33, %v1782_v53  ;;  %vm1815_vm7 = vweird.f32 %v4462_v33 }
 0xa3a   :  { %4463 = vrsqrt.f32 %v1783_v56  ;;  %vm1816_vm9 = vmor %vm1814_vm8, %vm1815_vm7  ;;  %vm1824_vm11 = vweird.f32 %v1783_v56 }
 0xa3b   :  { %v1810_v60 = vmul.f32 %v4462_v33, %v1809_v13 }
 0xa3d   :  { %v1811_v55 = vmul.f32 0.5, %v1810_v60 }
 0xa3f   :  { %v1812_v47 = vsub.f32 1.5, %v1811_v55 }
 0xa40   :  { %v4464_v50 = vpop.eup %4463 }
 0xa41   :  { %v1813_v15 = vmul.f32 %v4462_v33, %v1812_v47  ;;  %v1819_v27 = vmul.f32 %v4464_v50, %v1783_v56  ;;  %vm1825_vm10 = vweird.f32 %v4464_v50 }
 0xa42   :  { %vm1826_vm12 = vmor %vm1824_vm11, %vm1825_vm10 }
 0xa43   :  { %v1820_v18 = vmul.f32 %v4464_v50, %v1819_v27  ;;  %v1817_v37 = vsel %vm1816_vm9, %v4462_v33, %v1813_v15 }
 0xa44   :  { %v1870_v5 = vmul.f32 %v1817_v37, %v5766_v32 }
 0xa45   :  { %v1821_v49 = vmul.f32 0.5, %v1820_v18 }
 0xa46   :  { %v1881_v9 = vmul.f32 %v5809_v0, %v1870_v5 }
 0xa47   :  { %v1822_v4 = vsub.f32 1.5, %v1821_v49 }
 0xa48   :  { %v5837_v48 = vadd.f32 %v5815_v20, %v1881_v9 }
 0xa49   :  { %v1823_v2 = vmul.f32 %v4464_v50, %v1822_v4 }
 0xa4b   :  { %v1827_v51 = vsel %vm1826_vm12, %v4464_v50, %v1823_v2 }
 0xa4c   :  { %v1871_v10 = vmul.f32 %v1827_v51, %v5772_v24 }
 0xa4e   :  { %v1882_v25 = vmul.f32 %v5809_v0, %v1871_v10 }
 0xa4f   :  { %v1762_v39 = vpop.xlane.xlu0 %1761 }
 0xa50   :  { %v1776_v57 = vmul.f32 %v1762_v39, %v5606_v36  ;;  %v5840_v17 = vadd.f32 %v5815_v20, %v1882_v25 }
 0xa52   :  { %v1784_v32 = vadd.f32 1e-05, %v1776_v57  ;;  %v1899_v28 = vpack.c.bf16 %v5840_v17, %v5837_v48 }
 0xa54   :  { %4465 = vrsqrt.f32 %v1784_v32  ;;  %4039 = vmatmul.msk.bf16.gmra.mxu1 %vm185_vm0, %v1899_v28  ;;  %vm1834_vm14 = vweird.f32 %v1784_v32 }
 0xa57   :  { %v1765_v24 = vpop.xlane.xlu1 %1764 }
 0xa58   :  { %v1777_v22 = vmul.f32 %v1765_v24, %v5606_v36 }
 0xa5a   :  { %v4466_v29 = vpop.eup %4465  ;;  %v1785_v44 = vadd.f32 1e-05, %v1777_v22 }
 0xa5b   :  { %v1829_v54 = vmul.f32 %v4466_v29, %v1784_v32  ;;  %vm1835_vm13 = vweird.f32 %v4466_v29 }
 0xa5c   :  { %4467 = vrsqrt.f32 %v1785_v44  ;;  %vm1836_vm15 = vmor %vm1834_vm14, %vm1835_vm13  ;;  %vm1844_vm7 = vweird.f32 %v1785_v44 }
 0xa5d   :  { %v1830_v12 = vmul.f32 %v4466_v29, %v1829_v54 }
 0xa5f   :  { %v1831_v59 = vmul.f32 0.5, %v1830_v12 }
 0xa61   :  { %v1832_v52 = vsub.f32 1.5, %v1831_v59 }
 0xa62   :  { %v4468_v26 = vpop.eup %4467 }
 0xa63   :  { %v1833_v61 = vmul.f32 %v4466_v29, %v1832_v52  ;;  %v1839_v35 = vmul.f32 %v4468_v26, %v1785_v44  ;;  %vm1845_vm6 = vweird.f32 %v4468_v26 }
 0xa64   :  { %vm1846_vm8 = vmor %vm1844_vm7, %vm1845_vm6 }
 0xa65   :  { %v1840_v19 = vmul.f32 %v4468_v26, %v1839_v35  ;;  %v1837_v14 = vsel %vm1836_vm15, %v4466_v29, %v1833_v61 }
 0xa66   :  { %v1872_v30 = vmul.f32 %v1837_v14, %v5778_v1 }
 0xa67   :  { %v1841_v31 = vmul.f32 0.5, %v1840_v19 }
 0xa68   :  { %v1883_v11 = vmul.f32 %v5809_v0, %v1872_v30 }
 0xa69   :  { %v1842_v21 = vsub.f32 1.5, %v1841_v31 }
 0xa6a   :  { %v5851_v58 = vadd.f32 %v5815_v20, %v1883_v11 }
 0xa6b   :  { %v1843_v38 = vmul.f32 %v4468_v26, %v1842_v21 }
 0xa6d   :  { %v1847_v63 = vsel %vm1846_vm8, %v4468_v26, %v1843_v38 }
 0xa6e   :  { %v1873_v16 = vmul.f32 %v1847_v63, %v5784_v8 }
 0xa70   :  { %v1884_v43 = vmul.f32 %v5809_v0, %v1873_v16 }
 0xa72   :  { %v5854_v45 = vadd.f32 %v5815_v20, %v1884_v43 }
 0xa74   :  { %v1768_v3 = vpop.xlane.xlu2 %1767  ;;  %v1900_v1 = vpack.c.bf16 %v5854_v45, %v5851_v58 }
 0xa75   :  { %v1778_v40 = vmul.f32 %v1768_v3, %v5606_v36 }
 0xa76   :  { %4040 = vmatmul.msk.bf16.gmra.mxu1 %vm185_vm0, %v1900_v1 }
 0xa77   :  { %v1786_v62 = vadd.f32 1e-05, %v1778_v40 }
 0xa79   :  { %4469 = vrsqrt.f32 %v1786_v62  ;;  %vm1854_vm10 = vweird.f32 %v1786_v62 }
 0xa7c   :  { %v1771_v8 = vpop.xlane.xlu0 %1770 }
 0xa7d   :  { %v1779_v41 = vmul.f32 %v1771_v8, %v5606_v36 }
 0xa7f   :  { %v4470_v53 = vpop.eup %4469  ;;  %v1787_v6 = vadd.f32 1e-05, %v1779_v41 }
 0xa80   :  { %v1849_v23 = vmul.f32 %v4470_v53, %v1786_v62  ;;  %vm1855_vm9 = vweird.f32 %v4470_v53 }
 0xa81   :  { %4471 = vrsqrt.f32 %v1787_v6  ;;  %vm1856_vm11 = vmor %vm1854_vm10, %vm1855_vm9  ;;  %vm1864_vm13 = vweird.f32 %v1787_v6 }
 0xa82   :  { %v1850_v33 = vmul.f32 %v4470_v53, %v1849_v23 }
 0xa84   :  { %v1851_v56 = vmul.f32 0.5, %v1850_v33 }
 0xa86   :  { %v1852_v13 = vsub.f32 1.5, %v1851_v56 }
 0xa87   :  { %v4472_v60 = vpop.eup %4471 }
 0xa88   :  { %v1853_v55 = vmul.f32 %v4470_v53, %v1852_v13  ;;  %v1859_v47 = vmul.f32 %v4472_v60, %v1787_v6  ;;  %vm1865_vm12 = vweird.f32 %v4472_v60 }
 0xa89   :  { %vm1866_vm14 = vmor %vm1864_vm13, %vm1865_vm12 }
 0xa8a   :  { %v1860_v50 = vmul.f32 %v4472_v60, %v1859_v47  ;;  %v1857_v15 = vsel %vm1856_vm11, %v4470_v53, %v1853_v55 }
 0xa8b   :  { %v1874_v37 = vmul.f32 %v1857_v15, %v5794_v42 }
 0xa8c   :  { %v1861_v27 = vmul.f32 0.5, %v1860_v50 }
 0xa8d   :  { %v1885_v2 = vmul.f32 %v5809_v0, %v1874_v37 }
 0xa8e   :  { %v1862_v18 = vsub.f32 1.5, %v1861_v27 }
 0xa8f   :  { %v5866_v10 = vadd.f32 %v5815_v20, %v1885_v2 }
 0xa90   :  { %v1863_v49 = vmul.f32 %v4472_v60, %v1862_v18 }
 0xa92   :  { %v1867_v4 = vsel %vm1866_vm14, %v4472_v60, %v1863_v49 }
 0xa93   :  { %v1875_v5 = vmul.f32 %v1867_v4, %v5804_v34  ;;  %v4303_v34 = vld [vmem:[%s6816_s4 + $0x1] ss:$0 sm:$0xff] }
 0xa95   :  { %v1886_v51 = vmul.f32 %v5809_v0, %v1875_v5 }
 0xa97   :  { %v5869_v9 = vadd.f32 %v5815_v20, %v1886_v51 }
 0xa99   :  { %v1901_v25 = vpack.c.bf16 %v5869_v9, %v5866_v10 }
 0xa9b   :  { %4041 = vmatmul.msk.bf16.gmra.mxu1 %vm185_vm0, %v1901_v25 }
 0xa9d   :  { %v1945_v42 = vpop.f32.mrf.mxu1 }
 0xa9e   :  { %v1946_v57 = vadd.f32 %v4303_v34, %v1945_v42 }
 0xaa5   :  { %v1947_v39 = vpop.f32.mrf.mxu1 }
 0xaa6   :  { %v1948_v32 = vadd.f32 %v4303_v34, %v1947_v39 }
 0xaa8   :  { %v4215_v0 = vpack.i.bf16 %v1948_v32, %v1946_v57  ;;  %v5877_v28 = vpack.c.bf16 %v1948_v32, %v1946_v57 }
 0xaaa   :  { %2672 = vrot.lane.b32.xlu0 %v5877_v28, %s4827_s2  ;;  %4216 = vrot.lane.b32.xlu1 %v4215_v0, %s4825_s21 }
 0xab2   :  { %2244 = vrot.lane.b32.xlu1 %v5877_v28, %s4826_s23 }
 0xaba   :  { %2458 = vrot.lane.b32.xlu1 %v5877_v28, %s4828_s28 }
 0xad1   :  { %v1950_v20 = vpop.f32.mrf.mxu1 }
 0xad2   :  { %v1951_v22 = vadd.f32 %v4303_v34, %v1950_v20 }
 0xad9   :  { %v1952_v24 = vpop.f32.mrf.mxu1 }
 0xada   :  { %v1953_v29 = vadd.f32 %v4303_v34, %v1952_v24 }
 0xadc   :  { %v4220_v44 = vpack.i.bf16 %v1953_v29, %v1951_v22  ;;  %v5886_v54 = vpack.c.bf16 %v1953_v29, %v1951_v22 }
 0xade   :  { %4221 = vrot.lane.b32.xlu2 %v4220_v44, %s4825_s21  ;;  %2460 = vrot.lane.b32.xlu1 %v5886_v54, %s4828_s28 }
 0xadf   :  { %2246 = vrot.lane.b32.xlu0 %v5886_v54, %s4826_s23 }
 0xae7   :  { %2674 = vrot.lane.b32.xlu0 %v5886_v54, %s4827_s2 }
 0xaf3   :  { %v1955_v12 = vpop.f32.mrf.mxu1 }
 0xaf4   :  { %v1956_v52 = vadd.f32 %v4303_v34, %v1955_v12 }
 0xafb   :  { %v1957_v59 = vpop.f32.mrf.mxu1 }
 0xafc   :  { %v1958_v26 = vadd.f32 %v4303_v34, %v1957_v59 }
 0xafe   :  { %v4225_v61 = vpack.i.bf16 %v1958_v26, %v1956_v52  ;;  %v5895_v35 = vpack.c.bf16 %v1958_v26, %v1956_v52 }
 0xb00   :  { %2248 = vrot.lane.b32.xlu1 %v5895_v35, %s4826_s23  ;;  %4226 = vrot.lane.b32.xlu0 %v4225_v61, %s4825_s21 }
 0xb08   :  { %2462 = vrot.lane.b32.xlu1 %v5895_v35, %s4828_s28  ;;  %2676 = vrot.lane.b32.xlu0 %v5895_v35, %s4827_s2 }
 0xb10   :  { %2192 = vrot.lane.b32.xlu1 %v5886_v54, %s4814_s26 }
 0xb18   :  { %v1960_v19 = vpop.f32.mrf.mxu1 }
 0xb19   :  { %v1961_v30 = vadd.f32 %v4303_v34, %v1960_v19 }
 0xb1c   :  { %v4217_v14 = vpop.permute.xlu1 %4216  ;;  %v5925_v40 = vpop.permute.xlu0 %2672 }
 0xb1d   :  { %v4218_v31 = vunpack.i.l.bf16 %v4217_v14  ;;  %v4219_v11 = vunpack.i.h.bf16 %v4217_v14 }
 0xb1f   :  { %1997 = vxpose.xlu2.b32.start [1/8] (short) (narrow) %v4218_v31, 32  ;;  %v5963_v31 = vld [vmem:[%s6813_s1] sm:$0xff] }
 0xb20   :  { %v1962_v21 = vpop.f32.mrf.mxu1 }
 0xb21   :  { %v1963_v38 = vadd.f32 %v4303_v34, %v1962_v21 }
 0xb23   :  { %v4230_v63 = vpack.i.bf16 %v1963_v38, %v1961_v30  ;;  %v5906_v16 = vpack.c.bf16 %v1963_v38, %v1961_v30 }
 0xb24   :  { %v2245_v8 = vpop.permute.xlu1 %2244 }
 0xb25   :  { %4231 = vrot.lane.b32.xlu0 %v4230_v63, %s4825_s21  ;;  %2464 = vrot.lane.b32.xlu1 %v5906_v16, %s4828_s28 }
 0xb27   :  { %1998 = vxpose.xlu2.b32.cont [2/8] (short) (narrow) %v4219_v11, 32 }
 0xb2c   :  { %v2459_v53 = vpop.permute.xlu1 %2458 }
 0xb2d   :  { %2194 = vrot.lane.b32.xlu0 %v5895_v35, %s4814_s26  ;;  %2410 = vrot.lane.b32.xlu1 %v5906_v16, %s4829_s30 }
 0xb35   :  { %2408 = vrot.lane.b32.xlu0 %v5895_v35, %s4829_s30 }
 0xb38   :  { %v4222_v43 = vpop.permute.xlu2 %4221 }
 0xb39   :  { %v4223_v3 = vunpack.i.l.bf16 %v4222_v43  ;;  %v4224_v1 = vunpack.i.h.bf16 %v4222_v43  ;;  %v5973_v43 = vld [vmem:[%s6813_s1 + $0x8] sm:$0xff] }
 0xb3b   :  { %1999 = vxpose.xlu2.b32.cont [3/8] (short) (narrow) %v4223_v3, 32 }
 0xb3d   :  { %2250 = vrot.lane.b32.xlu0 %v5906_v16, %s4826_s23 }
 0xb43   :  { %2000 = vxpose.xlu2.b32.cont [4/8] (short) (narrow) %v4224_v1, 32 }
 0xb45   :  { %2678 = vrot.lane.b32.xlu0 %v5906_v16, %s4827_s2 }
 0xb4d   :  { %2196 = vrot.lane.b32.xlu0 %v5906_v16, %s4814_s26 }
 0xb50   :  { %v2461_v23 = vpop.permute.xlu1 %2460 }
 0xb51   :  { %v2247_v62 = vpop.permute.xlu0 %2246 }
 0xb55   :  { %2190 = vrot.lane.b32.xlu0 %v5877_v28, %s4814_s26 }
 0xb59   :  { %v2675_v41 = vpop.permute.xlu0 %2674 }
 0xb5d   :  { %2404 = vrot.lane.b32.xlu0 %v5877_v28, %s4829_s30 }
 0xb65   :  { %2838 = vrot.lane.b32.xlu0 %v5906_v16, %s4831_s7 }
 0xb72   :  { %v4227_v6 = vpop.permute.xlu0 %4226  ;;  %v2249_v56 = vpop.permute.xlu1 %2248 }
 0xb73   :  { %v4228_v33 = vunpack.i.l.bf16 %v4227_v6  ;;  %v4229_v13 = vunpack.i.h.bf16 %v4227_v6 }
 0xb75   :  { %2001 = vxpose.xlu2.b32.cont [5/8] (short) (narrow) %v4228_v33, 32 }
 0xb7a   :  { %v2463_v60 = vpop.permute.xlu1 %2462  ;;  %v2677_v55 = vpop.permute.xlu0 %2676 }
 0xb7d   :  { %2002 = vxpose.xlu2.b32.cont [6/8] (short) (narrow) %v4229_v13, 32 }
 0xb82   :  { %v2193_v47 = vpop.permute.xlu1 %2192 }
 0xb97   :  { %v4232_v50 = vpop.permute.xlu0 %4231  ;;  %v2465_v15 = vpop.permute.xlu1 %2464 }
 0xb98   :  { %v4233_v27 = vunpack.i.l.bf16 %v4232_v50  ;;  %v4234_v49 = vunpack.i.h.bf16 %v4232_v50 }
 0xb9a   :  { %2003 = vxpose.xlu2.b32.cont [7/8] (short) (narrow) %v4233_v27, 32  ;;  %v6003_v27 = vld [vmem:[%s6813_s1 + $0x18] sm:$0xff] }
 0xb9f   :  { %v2195_v18 = vpop.permute.xlu0 %2194  ;;  %v2411_v37 = vpop.permute.xlu1 %2410 }
 0xba0   :  { %2432 = vmatpush.bf16.msra.mxu1 %v2411_v37 }
 0xba2   :  { %2004 = vxpose.xlu2.b32.end [8/8] (short) (narrow) %v4234_v49, 32 }
 0xba7   :  { %v2409_v4 = vpop.permute.xlu0 %2408 }
 0xba8   :  { %2433 = vmatpush.bf16.msra.mxu1 %v2409_v4 }
 0xbaf   :  { %v2251_v5 = vpop.permute.xlu0 %2250 }
 0xbb7   :  { %v2679_v2 = vpop.permute.xlu0 %2678 }
 0xbbf   :  { %v2197_v51 = vpop.permute.xlu0 %2196 }
 0xbc0   :  { %2218 = vmatpush.bf16.msrb.mxu0 %v2197_v51 }
 0xbc4   :  { %2219 = vmatpush.bf16.msrb.mxu0 %v2195_v18 }
 0xbc7   :  { %v2191_v25 = vpop.permute.xlu0 %2190 }
 0xbc8   :  { %2220 = vmatpush.bf16.msrb.mxu0 %v2193_v47 }
 0xbcc   :  { %2221 = vmatpush.bf16.msrb.mxu0 %v2191_v25 }
 0xbcf   :  { %v2405_v59 = vpop.permute.xlu0 %2404 }
 0xbd7   :  { %v2839_v26 = vpop.permute.xlu0 %2838 }
 0xc03   :  { %v2013_v42 = vpop.trf.xlu2 }
 0xc04   :  { %v2033_v34 = vpack.c.bf16 %v2013_v42, %v2013_v42  ;;  %v6018_v42 = vld [vmem:[%s6813_s1 + $0x20] sm:$0xff] }
 0xc06   :  { %v2047_v39 = vsel %vm309_vm1, %v2033_v34, 0 }
 0xc07   :  { %2056 = vmatpush.bf16.msrb.mxu3 %v2047_v39 }
 0xc0a   :  { %4042 = vmatmul.msk.bf16.vlgmr.msrb.gmra.mxu3 %vm296_vm2, %v5877_v28 }
 0xc0b   :  { %2406 = vrot.lane.b32.xlu2 %v5886_v54, %s4829_s30  ;;  %v2014_v57 = vpop.trf.xlu2 }
 0xc0c   :  { %v2243_v32 = vpack.c.bf16 %v2014_v57, %v2014_v57 }
 0xc0e   :  { %v2265_v0 = vsel %vm309_vm1, %v2243_v32, 0 }
 0xc0f   :  { %2274 = vmatpush.bf16.msrb.mxu2 %v2265_v0 }
 0xc12   :  { %4050 = vmatmul.msk.bf16.vlgmr.msrb.gmra.mxu2 %vm296_vm2, %v2245_v8 }
 0xc13   :  { %2624 = vrot.lane.b32.xlu2 %v5906_v16, %s4830_s5  ;;  %v2015_v20 = vpop.trf.xlu2 }
 0xc14   :  { %v2457_v24 = vpack.c.bf16 %v2015_v20, %v2015_v20 }
 0xc16   :  { %v2479_v22 = vsel %vm309_vm1, %v2457_v24, 0 }
 0xc17   :  { %2488 = vmatpush.bf16.msra.mxu3 %v2479_v22 }
 0xc1a   :  { %4043 = vmatmul.msk.bf16.gmra.mxu3 %vm296_vm2, %v5886_v54 }
 0xc1b   :  { %v2016_v29 = vpop.trf.xlu2 }
 0xc1c   :  { %v2671_v44 = vpack.c.bf16 %v2016_v29, %v2016_v29  ;;  %v6033_v29 = vld [vmem:[%s6813_s1 + $0x28] sm:$0xff] }
 0xc1e   :  { %v2693_v12 = vsel %vm309_vm1, %v2671_v44, 0 }
 0xc1f   :  { %2702 = vmatpush.bf16.msra.mxu2 %v2693_v12 }
 0xc22   :  { %4051 = vmatmul.msk.bf16.gmra.mxu2 %vm296_vm2, %v2247_v62 }
 0xc2a   :  { %4044 = vmatmul.msk.bf16.gmra.mxu3 %vm296_vm2, %v5895_v35 }
 0xc32   :  { %4052 = vmatmul.msk.bf16.gmra.mxu2 %vm296_vm2, %v2249_v56 }
 0xc3a   :  { %4045 = vmatmul.msk.bf16.gmra.mxu3 %vm296_vm2, %v5906_v16 }
 0xc42   :  { %4053 = vmatmul.msk.bf16.gmra.mxu2 %vm296_vm2, %v2251_v5 }
 0xc4a   :  { %4058 = vmatmul.msk.bf16.vlgmr.msra.gmra.mxu3 %vm296_vm2, %v2459_v53 }
 0xc52   :  { %4066 = vmatmul.msk.bf16.vlgmr.msra.gmra.mxu2 %vm296_vm2, %v5925_v40 }
 0xc5a   :  { %4059 = vmatmul.msk.bf16.gmra.mxu3 %vm296_vm2, %v2461_v23  ;;  %v5988_v23 = vld [vmem:[%s6813_s1 + $0x10] sm:$0xff] }
 0xc62   :  { %4067 = vmatmul.msk.bf16.gmra.mxu2 %vm296_vm2, %v2675_v41 }
 0xc65   :  { %v2407_v52 = vpop.permute.xlu2 %2406 }
 0xc66   :  { %2434 = vmatpush.bf16.msra.mxu1 %v2407_v52 }
 0xc6a   :  { %2435 = vmatpush.bf16.msra.mxu1 %v2405_v59  ;;  %4060 = vmatmul.msk.bf16.gmra.mxu3 %vm296_vm2, %v2463_v60 }
 0xc6d   :  { %v2625_v61 = vpop.permute.xlu2 %2624 }
 0xc6e   :  { %2860 = vmatpush.bf16.msrb.mxu1 %v2839_v26  ;;  %2646 = vmatpush.bf16.msra.mxu0 %v2625_v61 }
 0xc72   :  { %4068 = vmatmul.msk.bf16.gmra.mxu2 %vm296_vm2, %v2677_v55 }
 0xc7a   :  { %4061 = vmatmul.msk.bf16.gmra.mxu3 %vm296_vm2, %v2465_v15 }
 0xc82   :  { %4069 = vmatmul.msk.bf16.gmra.mxu2 %vm296_vm2, %v2679_v2 }
 0xc8d   :  { %v2058_v19 = vpop.f32.mrf.mxu3 }
 0xc8e   :  { %v2078_v14 = vmul.f32 0.35355338, %v2058_v19 }
 0xc90   :  { %v5966_v21 = vadd.f32 %v5963_v31, %v2078_v14 }
 0xc92   :  { %v2094_v30 = vsel %vm358_vm3, %v5966_v21, -inf }
 0xc93   :  { %2095 = vmax.xlane.f32.xlu1 %v2094_v30  ;;  %v6048_v30 = vld [vmem:[%s6813_s1 + $0x30] sm:$0xff] }
 0xc95   :  { %v2060_v38 = vpop.f32.mrf.mxu3  ;;  %v2276_v63 = vpop.f32.mrf.mxu2 }
 0xc96   :  { %v2079_v16 = vmul.f32 0.35355338, %v2060_v38  ;;  %v2296_v11 = vmul.f32 0.35355338, %v2276_v63 }
 0xc98   :  { %v5976_v3 = vadd.f32 %v5973_v43, %v2079_v16  ;;  %v5979_v1 = vadd.f32 %v5963_v31, %v2296_v11 }
 0xc9a   :  { %v2097_v40 = vsel %vm358_vm3, %v5976_v3, -inf  ;;  %v2312_v62 = vsel %vm358_vm3, %v5979_v1, -inf }
 0xc9b   :  { %2098 = vmax.xlane.f32.xlu0 %v2097_v40  ;;  %2313 = vmax.xlane.f32.xlu1 %v2312_v62 }
 0xc9d   :  { %v2063_v8 = vpop.f32.mrf.mxu3  ;;  %v2278_v41 = vpop.f32.mrf.mxu2 }
 0xc9e   :  { %v2080_v53 = vmul.f32 0.35355338, %v2063_v8  ;;  %v2297_v6 = vmul.f32 0.35355338, %v2278_v41  ;;  %v6063_v41 = vld [vmem:[%s6813_s1 + $0x38] sm:$0xff] }
 0xca0   :  { %v5991_v33 = vadd.f32 %v5988_v23, %v2080_v53  ;;  %v5994_v56 = vadd.f32 %v5973_v43, %v2297_v6 }
 0xca2   :  { %v2100_v13 = vsel %vm358_vm3, %v5991_v33, -inf  ;;  %v2315_v60 = vsel %vm358_vm3, %v5994_v56, -inf }
 0xca3   :  { %2101 = vmax.xlane.f32.xlu0 %v2100_v13  ;;  %2316 = vmax.xlane.f32.xlu2 %v2315_v60 }
 0xca5   :  { %v2065_v55 = vpop.f32.mrf.mxu3  ;;  %v2281_v47 = vpop.f32.mrf.mxu2 }
 0xca6   :  { %v2081_v50 = vmul.f32 0.35355338, %v2065_v55  ;;  %v2298_v15 = vmul.f32 0.35355338, %v2281_v47 }
 0xca8   :  { %v6006_v18 = vadd.f32 %v6003_v27, %v2081_v50  ;;  %v6009_v37 = vadd.f32 %v5988_v23, %v2298_v15 }
 0xcaa   :  { %v2103_v49 = vsel %vm358_vm3, %v6006_v18, -inf  ;;  %v2318_v4 = vsel %vm358_vm3, %v6009_v37, -inf }
 0xcab   :  { %2104 = vmax.xlane.f32.xlu1 %v2103_v49  ;;  %2319 = vmax.xlane.f32.xlu0 %v2318_v4 }
 0xcad   :  { %v2068_v5 = vpop.f32.mrf.mxu3  ;;  %v2283_v2 = vpop.f32.mrf.mxu2 }
 0xcae   :  { %v2082_v51 = vmul.f32 0.35355338, %v2068_v5  ;;  %v2299_v25 = vmul.f32 0.35355338, %v2283_v2 }
 0xcb0   :  { %v6021_v34 = vadd.f32 %v6018_v42, %v2082_v51  ;;  %v6024_v39 = vadd.f32 %v6003_v27, %v2299_v25 }
 0xcb2   :  { %v2106_v57 = vsel %vm358_vm3, %v6021_v34, -inf  ;;  %v2321_v32 = vsel %vm358_vm3, %v6024_v39, -inf }
 0xcb3   :  { %2107 = vmax.xlane.f32.xlu0 %v2106_v57  ;;  %2322 = vmax.xlane.f32.xlu1 %v2321_v32 }
 0xcb5   :  { %v2070_v0 = vpop.f32.mrf.mxu3  ;;  %v2286_v20 = vpop.f32.mrf.mxu2 }
 0xcb6   :  { %v2083_v24 = vmul.f32 0.35355338, %v2070_v0  ;;  %v2300_v22 = vmul.f32 0.35355338, %v2286_v20 }
 0xcb8   :  { %v6036_v44 = vadd.f32 %v6033_v29, %v2083_v24  ;;  %v6039_v12 = vadd.f32 %v6018_v42, %v2300_v22 }
 0xcba   :  { %v2109_v59 = vsel %vm358_vm3, %v6036_v44, -inf  ;;  %v2324_v52 = vsel %vm358_vm3, %v6039_v12, -inf }
 0xcbb   :  { %2110 = vmax.xlane.f32.xlu1 %v2109_v59  ;;  %2325 = vmax.xlane.f32.xlu0 %v2324_v52 }
 0xcbd   :  { %v2073_v26 = vpop.f32.mrf.mxu3  ;;  %v2288_v61 = vpop.f32.mrf.mxu2 }
 0xcbe   :  { %v2084_v19 = vmul.f32 0.35355338, %v2073_v26  ;;  %v2301_v14 = vmul.f32 0.35355338, %v2288_v61 }
 0xcc0   :  { %v6051_v38 = vadd.f32 %v6048_v30, %v2084_v19  ;;  %v6054_v63 = vadd.f32 %v6033_v29, %v2301_v14 }
 0xcc2   :  { %v2112_v16 = vsel %vm358_vm3, %v6051_v38, -inf  ;;  %v2327_v11 = vsel %vm358_vm3, %v6054_v63, -inf }
 0xcc3   :  { %2113 = vmax.xlane.f32.xlu0 %v2112_v16  ;;  %2328 = vmax.xlane.f32.xlu1 %v2327_v11 }
 0xcc5   :  { %v2075_v40 = vpop.f32.mrf.mxu3  ;;  %v2291_v62 = vpop.f32.mrf.mxu2 }
 0xcc6   :  { %v2085_v8 = vmul.f32 0.35355338, %v2075_v40  ;;  %v2302_v6 = vmul.f32 0.35355338, %v2291_v62 }
 0xcc8   :  { %v6066_v53 = vadd.f32 %v6063_v41, %v2085_v8  ;;  %v6071_v47 = vadd.f32 %v6048_v30, %v2302_v6 }
 0xcca   :  { %v2115_v13 = vsel %vm358_vm3, %v6066_v53, -inf  ;;  %v2330_v4 = vsel %vm358_vm3, %v6071_v47, -inf }
 0xccb   :  { %2116 = vmax.xlane.f32.xlu1 %v2115_v13 }
 0xccd   :  { %v2293_v60 = vpop.f32.mrf.mxu2  ;;  %v2490_v55 = vpop.f32.mrf.mxu3 }
 0xcce   :  { %v2510_v50 = vmul.f32 0.35355338, %v2490_v55  ;;  %v2303_v49 = vmul.f32 0.35355338, %v2293_v60 }
 0xcd0   :  { %v6074_v15 = vadd.f32 %v5963_v31, %v2510_v50  ;;  %v6081_v25 = vadd.f32 %v6063_v41, %v2303_v49 }
 0xcd2   :  { %v2526_v5 = vsel %vm358_vm3, %v6074_v15, -inf  ;;  %v2333_v20 = vsel %vm358_vm3, %v6081_v25, -inf }
 0xcd3   :  { %2331 = vmax.xlane.f32.xlu1 %v2330_v4  ;;  %2527 = vmax.xlane.f32.xlu0 %v2526_v5 }
 0xcd5   :  { %v2492_v2 = vpop.f32.mrf.mxu3  ;;  %v2704_v51 = vpop.f32.mrf.mxu2 }
 0xcd6   :  { %v2724_v57 = vmul.f32 0.35355338, %v2704_v51  ;;  %v2511_v0 = vmul.f32 0.35355338, %v2492_v2 }
 0xcd8   :  { %v6084_v32 = vadd.f32 %v5963_v31, %v2724_v57  ;;  %v6091_v52 = vadd.f32 %v5973_v43, %v2511_v0 }
 0xcda   :  { %v2740_v24 = vsel %vm358_vm3, %v6084_v32, -inf  ;;  %v2529_v14 = vsel %vm358_vm3, %v6091_v52, -inf }
 0xcdb   :  { %2334 = vmax.xlane.f32.xlu1 %v2333_v20  ;;  %2741 = vmax.xlane.f32.xlu2 %v2740_v24 }
 0xcdd   :  { %v2495_v22 = vpop.f32.mrf.mxu3  ;;  %v2706_v59 = vpop.f32.mrf.mxu2 }
 0xcde   :  { %v2512_v26 = vmul.f32 0.35355338, %v2495_v22  ;;  %v2725_v61 = vmul.f32 0.35355338, %v2706_v59 }
 0xce0   :  { %v6094_v19 = vadd.f32 %v5988_v23, %v2512_v26  ;;  %v6097_v31 = vadd.f32 %v5973_v43, %v2725_v61 }
 0xce2   :  { %v2532_v16 = vsel %vm358_vm3, %v6094_v19, -inf  ;;  %v2743_v11 = vsel %vm358_vm3, %v6097_v31, -inf }
 0xce3   :  { %2530 = vmax.xlane.f32.xlu1 %v2529_v14  ;;  %2533 = vmax.xlane.f32.xlu2 %v2532_v16 }
 0xce4   :  { %2744 = vmax.xlane.f32.xlu0 %v2743_v11 }
 0xce5   :  { %v2497_v40 = vpop.f32.mrf.mxu3  ;;  %v2709_v62 = vpop.f32.mrf.mxu2 }
 0xce6   :  { %v2513_v8 = vmul.f32 0.35355338, %v2497_v40  ;;  %v2726_v6 = vmul.f32 0.35355338, %v2709_v62 }
 0xce8   :  { %v6106_v13 = vadd.f32 %v6003_v27, %v2513_v8  ;;  %v6109_v43 = vadd.f32 %v5988_v23, %v2726_v6 }
 0xcea   :  { %v2535_v60 = vsel %vm358_vm3, %v6106_v13, -inf  ;;  %v2746_v55 = vsel %vm358_vm3, %v6109_v43, -inf }
 0xceb   :  { %2747 = vmax.xlane.f32.xlu1 %v2746_v55 }
 0xcec   :  { %2536 = vmax.xlane.f32.xlu0 %v2535_v60 }
 0xced   :  { %v2500_v50 = vpop.f32.mrf.mxu3  ;;  %v2711_v49 = vpop.f32.mrf.mxu2 }
 0xcee   :  { %v2514_v4 = vmul.f32 0.35355338, %v2500_v50  ;;  %v2727_v5 = vmul.f32 0.35355338, %v2711_v49 }
 0xcf0   :  { %v6116_v2 = vadd.f32 %v6018_v42, %v2514_v4  ;;  %v6119_v51 = vadd.f32 %v6003_v27, %v2727_v5 }
 0xcf2   :  { %v2538_v23 = vsel %vm358_vm3, %v6116_v2, -inf  ;;  %v2749_v57 = vsel %vm358_vm3, %v6119_v51, -inf }
 0xcf3   :  { %2539 = vmax.xlane.f32.xlu1 %v2538_v23  ;;  %2750 = vmax.xlane.f32.xlu2 %v2749_v57 }
 0xcf5   :  { %v2502_v0 = vpop.f32.mrf.mxu3  ;;  %v2714_v20 = vpop.f32.mrf.mxu2 }
 0xcf6   :  { %v2515_v24 = vmul.f32 0.35355338, %v2502_v0  ;;  %v2728_v22 = vmul.f32 0.35355338, %v2714_v20 }
 0xcf8   :  { %v6126_v59 = vadd.f32 %v6033_v29, %v2515_v24  ;;  %v6129_v26 = vadd.f32 %v6018_v42, %v2728_v22 }
 0xcfa   :  { %v2541_v27 = vsel %vm358_vm3, %v6126_v59, -inf  ;;  %v2752_v61 = vsel %vm358_vm3, %v6129_v26, -inf }
 0xcfb   :  { %2542 = vmax.xlane.f32.xlu2 %v2541_v27  ;;  %2753 = vmax.xlane.f32.xlu0 %v2752_v61 }
 0xcfd   :  { %v2505_v14 = vpop.f32.mrf.mxu3  ;;  %v2716_v16 = vpop.f32.mrf.mxu2 }
 0xcfe   :  { %v2516_v11 = vmul.f32 0.35355338, %v2505_v14  ;;  %v2729_v40 = vmul.f32 0.35355338, %v2716_v16 }
 0xd00   :  { %v6136_v62 = vadd.f32 %v6048_v30, %v2516_v11  ;;  %v6139_v8 = vadd.f32 %v6033_v29, %v2729_v40 }
 0xd02   :  { %v2544_v42 = vsel %vm358_vm3, %v6136_v62, -inf  ;;  %v2755_v6 = vsel %vm358_vm3, %v6139_v8, -inf }
 0xd03   :  { %2545 = vmax.xlane.f32.xlu0 %v2544_v42  ;;  %2756 = vmax.xlane.f32.xlu1 %v2755_v6 }
 0xd05   :  { %v2507_v60 = vpop.f32.mrf.mxu3  ;;  %v2719_v55 = vpop.f32.mrf.mxu2 }
 0xd06   :  { %v2517_v50 = vmul.f32 0.35355338, %v2507_v60  ;;  %v2730_v49 = vmul.f32 0.35355338, %v2719_v55  ;;  %v2096_v4 = vpop.xlane.xlu1 %2095 }
 0xd07   :  { %v2118_v5 = vsub.f32 %v5966_v21, %v2096_v4 }
 0xd08   :  { %v6147_v23 = vadd.f32 %v6063_v41, %v2517_v50  ;;  %v6150_v29 = vadd.f32 %v6048_v30, %v2730_v49 }
 0xd09   :  { %v2126_v57 = vmul.f32 1.442695, %v2118_v5 }
 0xd0a   :  { %v2547_v0 = vsel %vm358_vm3, %v6147_v23, -inf  ;;  %v2758_v20 = vsel %vm358_vm3, %v6150_v29, -inf }
 0xd0b   :  { %4473 = vpow2.f32 %v2126_v57  ;;  %2548 = vmax.xlane.f32.xlu1 %v2547_v0  ;;  %2759 = vmax.xlane.f32.xlu0 %v2758_v20 }
 0xd0d   :  { %v2721_v24 = vpop.f32.mrf.mxu2 }
 0xd0e   :  { %v2731_v22 = vmul.f32 0.35355338, %v2721_v24  ;;  %v2099_v27 = vpop.xlane.xlu0 %2098  ;;  %v2314_v21 = vpop.xlane.xlu1 %2313 }
 0xd0f   :  { %v2119_v61 = vsub.f32 %v5976_v3, %v2099_v27  ;;  %v2336_v14 = vsub.f32 %v5979_v1, %v2314_v21 }
 0xd10   :  { %v6159_v30 = vadd.f32 %v6063_v41, %v2731_v22 }
 0xd11   :  { %v6161_v16 = vpop.eup %4473  ;;  %v2128_v11 = vmul.f32 1.442695, %v2119_v61  ;;  %v2344_v40 = vmul.f32 1.442695, %v2336_v14 }
 0xd12   :  { %v2142_v42 = vsel %vm358_vm3, %v6161_v16, 0.0  ;;  %v2761_v6 = vsel %vm358_vm3, %v6159_v30, -inf }
 0xd13   :  { %4475 = vpow2.f32 %v2128_v11  ;;  %2143 = vadd.xlane.f32.xlu0 %v2142_v42  ;;  %2762 = vmax.xlane.f32.xlu1 %v2761_v6 }
 0xd14   :  { %4477 = vpow2.f32 %v2344_v40 }
 0xd16   :  { %v2102_v3 = vpop.xlane.xlu0 %2101  ;;  %v2317_v60 = vpop.xlane.xlu2 %2316 }
 0xd17   :  { %v2120_v1 = vsub.f32 %v5991_v33, %v2102_v3  ;;  %v2337_v41 = vsub.f32 %v5994_v56, %v2317_v60 }
 0xd19   :  { %v6169_v55 = vpop.eup %4475  ;;  %v2130_v50 = vmul.f32 1.442695, %v2120_v1  ;;  %v2346_v49 = vmul.f32 1.442695, %v2337_v41 }
 0xd1a   :  { %v6171_v4 = vpop.eup %4477  ;;  %v2145_v5 = vsel %vm358_vm3, %v6169_v55, 0.0 }
 0xd1b   :  { %4479 = vpow2.f32 %v2130_v50  ;;  %v2360_v57 = vsel %vm358_vm3, %v6171_v4, 0.0  ;;  %2146 = vadd.xlane.f32.xlu1 %v2145_v5 }
 0xd1c   :  { %4481 = vpow2.f32 %v2346_v49  ;;  %2361 = vadd.xlane.f32.xlu2 %v2360_v57 }
 0xd1e   :  { %v2105_v0 = vpop.xlane.xlu1 %2104  ;;  %v2320_v56 = vpop.xlane.xlu0 %2319 }
 0xd1f   :  { %v2121_v33 = vsub.f32 %v6006_v18, %v2105_v0 }
 0xd21   :  { %v6178_v20 = vpop.eup %4479  ;;  %v2132_v24 = vmul.f32 1.442695, %v2121_v33 }
 0xd22   :  { %v6180_v22 = vpop.eup %4481  ;;  %v2148_v27 = vsel %vm358_vm3, %v6178_v20, 0.0 }
 0xd23   :  { %4483 = vpow2.f32 %v2132_v24  ;;  %2149 = vadd.xlane.f32.xlu1 %v2148_v27  ;;  %v2363_v21 = vsel %vm358_vm3, %v6180_v22, 0.0 }
 0xd24   :  { %2364 = vadd.xlane.f32.xlu2 %v2363_v21 }
 0xd26   :  { %v2323_v61 = vpop.xlane.xlu1 %2322  ;;  %v2108_v40 = vpop.xlane.xlu0 %2107 }
 0xd27   :  { %v2339_v14 = vsub.f32 %v6024_v39, %v2323_v61  ;;  %2836 = vrot.lane.b32.xlu0 %v5895_v35, %s4831_s7  ;;  %v2122_v21 = vsub.f32 %v6021_v34, %v2108_v40 }
 0xd29   :  { %v6189_v18 = vpop.eup %4483  ;;  %v2350_v11 = vmul.f32 1.442695, %v2339_v14 }
 0xd2a   :  { %v2151_v42 = vsel %vm358_vm3, %v6189_v18, 0.0 }
 0xd2b   :  { %4485 = vpow2.f32 %v2350_v11 }
 0xd2c   :  { %2152 = vadd.xlane.f32.xlu2 %v2151_v42  ;;  %v2134_v42 = vmul.f32 1.442695, %v2122_v21 }
 0xd2e   :  { %v2111_v6 = vpop.xlane.xlu1 %2110  ;;  %v2326_v41 = vpop.xlane.xlu0 %2325 }
 0xd2f   :  { %v2123_v3 = vsub.f32 %v6036_v44, %v2111_v6  ;;  %v2338_v44 = vsub.f32 %v6009_v37, %v2320_v56  ;;  %v2340_v21 = vsub.f32 %v6039_v12, %v2326_v41 }
 0xd31   :  { %v2136_v60 = vmul.f32 1.442695, %v2123_v3  ;;  %v6194_v1 = vpop.eup %4485  ;;  %v2348_v33 = vmul.f32 1.442695, %v2338_v44 }
 0xd32   :  { %v2369_v39 = vsel %vm358_vm3, %v6194_v1, 0.0 }
 0xd33   :  { %4487 = vpow2.f32 %v2136_v60  ;;  %2370 = vadd.xlane.f32.xlu1 %v2369_v39 }
 0xd34   :  { %4489 = vpow2.f32 %v2348_v33 }
 0xd36   :  { %v2329_v50 = vpop.xlane.xlu1 %2328  ;;  %v2114_v57 = vpop.xlane.xlu0 %2113 }
 0xd37   :  { %v2341_v56 = vsub.f32 %v6054_v63, %v2329_v50  ;;  %v2124_v12 = vsub.f32 %v6051_v38, %v2114_v57 }
 0xd39   :  { %v6198_v49 = vpop.eup %4487 }
 0xd3a   :  { %v2157_v5 = vsel %vm358_vm3, %v6198_v49, 0.0  ;;  %v6208_v6 = vpop.eup %4489 }
 0xd3b   :  { %2158 = vadd.xlane.f32.xlu1 %v2157_v5 }
 0xd3e   :  { %v2117_v0 = vpop.xlane.xlu1 %2116 }
 0xd3f   :  { %v2125_v63 = vsub.f32 %v6066_v53, %v2117_v0 }
 0xd44   :  { %2622 = vrot.lane.b32.xlu2 %v5895_v35, %s4830_s5  ;;  %v2366_v35 = vsel %vm358_vm3, %v6208_v6, 0.0 }
 0xd46   :  { %v2332_v24 = vpop.xlane.xlu1 %2331  ;;  %v2528_v27 = vpop.xlane.xlu0 %2527 }
 0xd47   :  { %v2342_v61 = vsub.f32 %v6071_v47, %v2332_v24  ;;  %v2550_v11 = vsub.f32 %v6074_v15, %v2528_v27  ;;  %v2354_v47 = vmul.f32 1.442695, %v2341_v56 }
 0xd49   :  { %v2356_v14 = vmul.f32 1.442695, %v2342_v61  ;;  %v2558_v3 = vmul.f32 1.442695, %v2550_v11  ;;  %v2140_v61 = vmul.f32 1.442695, %v2125_v63 }
 0xd4b   :  { %4491 = vpow2.f32 %v2356_v14 }
 0xd4c   :  { %4493 = vpow2.f32 %v2134_v42 }
 0xd4d   :  { %4495 = vpow2.f32 %v2558_v3 }
 0xd4e   :  { %v2335_v37 = vpop.xlane.xlu1 %2334  ;;  %v2742_v40 = vpop.xlane.xlu2 %2741  ;;  %4497 = vpow2.f32 %v2354_v47 }
 0xd4f   :  { %v2764_v33 = vsub.f32 %v6084_v32, %v2742_v40  ;;  %v2343_v38 = vsub.f32 %v6081_v25, %v2335_v37 }
 0xd51   :  { %v6213_v60 = vpop.eup %4491  ;;  %2367 = vadd.xlane.f32.xlu0 %v2366_v35  ;;  %v2772_v53 = vmul.f32 1.442695, %v2764_v33 }
 0xd52   :  { %v2378_v34 = vsel %vm358_vm3, %v6213_v60, 0.0  ;;  %v6217_v15 = vpop.eup %4493 }
 0xd53   :  { %2379 = vadd.xlane.f32.xlu1 %v2378_v34  ;;  %v6219_v5 = vpop.eup %4495  ;;  %v2154_v44 = vsel %vm358_vm3, %v6217_v15, 0.0  ;;  %v2138_v34 = vmul.f32 1.442695, %v2124_v12 }
 0xd54   :  { %v2574_v27 = vsel %vm358_vm3, %v6219_v5, 0.0  ;;  %v6229_v11 = vpop.eup %4497 }
 0xd55   :  { %v2375_v0 = vsel %vm358_vm3, %v6229_v11, 0.0 }
 0xd56   :  { %v2531_v39 = vpop.xlane.xlu1 %2530 }
 0xd57   :  { %v2551_v50 = vsub.f32 %v6091_v52, %v2531_v39  ;;  %v2745_v14 = vpop.xlane.xlu0 %2744  ;;  %v2352_v52 = vmul.f32 1.442695, %v2340_v21  ;;  %v6260_v21 = vpop.xlane.xlu2 %2533 }
 0xd59   :  { %v2560_v24 = vmul.f32 1.442695, %v2551_v50  ;;  %2155 = vadd.xlane.f32.xlu0 %v2154_v44  ;;  %v2358_v44 = vmul.f32 1.442695, %v2343_v38 }
 0xd5b   :  { %4499 = vpow2.f32 %v2560_v24  ;;  %2575 = vadd.xlane.f32.xlu1 %v2574_v27  ;;  %v2765_v24 = vsub.f32 %v6097_v31, %v2745_v14 }
 0xd5c   :  { %4501 = vpow2.f32 %v2140_v61 }
 0xd5d   :  { %4503 = vpow2.f32 %v2772_v53  ;;  %v2774_v61 = vmul.f32 1.442695, %v2765_v24 }
 0xd5e   :  { %4505 = vpow2.f32 %v2352_v52  ;;  %v2748_v41 = vpop.xlane.xlu1 %2747 }
 0xd5f   :  { %v6240_v56 = vpop.xlane.xlu0 %2536  ;;  %4507 = vpow2.f32 %v2138_v34  ;;  %v2766_v52 = vsub.f32 %v6109_v43, %v2748_v41 }
 0xd60   :  { %4509 = vpow2.f32 %v2358_v44 }
 0xd61   :  { %v6233_v32 = vpop.eup %4499  ;;  %2376 = vadd.xlane.f32.xlu0 %v2375_v0  ;;  %4511 = vpow2.f32 %v2774_v61 }
 0xd62   :  { %v2577_v42 = vsel %vm358_vm3, %v6233_v32, 0.0  ;;  %v6238_v3 = vpop.eup %4501 }
 0xd63   :  { %2578 = vadd.xlane.f32.xlu1 %v2577_v42  ;;  %v6242_v35 = vpop.eup %4503  ;;  %v2163_v47 = vsel %vm358_vm3, %v6238_v3, 0.0  ;;  %v2776_v42 = vmul.f32 1.442695, %v2766_v52 }
 0xd64   :  { %v6246_v40 = vpop.eup %4505  ;;  %v2788_v39 = vsel %vm358_vm3, %v6242_v35, 0.0 }
 0xd65   :  { %v2372_v57 = vsel %vm358_vm3, %v6246_v40, 0.0  ;;  %v6255_v33 = vpop.eup %4507  ;;  %4513 = vpow2.f32 %v2776_v42 }
 0xd66   :  { %v2540_v63 = vpop.xlane.xlu1 %2539  ;;  %v2160_v27 = vsel %vm358_vm3, %v6255_v33, 0.0  ;;  %v6266_v53 = vpop.eup %4509 }
 0xd67   :  { %v2381_v0 = vsel %vm358_vm3, %v6266_v53, 0.0  ;;  %v2751_v31 = vpop.xlane.xlu2 %2750  ;;  %v6277_v34 = vpop.eup %4511  ;;  %v2554_v24 = vsub.f32 %v6116_v2, %v2540_v63 }
 0xd68   :  { %v2791_v43 = vsel %vm358_vm3, %v6277_v34, 0.0 }
 0xd69   :  { %2164 = vadd.xlane.f32.xlu0 %v2163_v47  ;;  %v2767_v47 = vsub.f32 %v6119_v51, %v2751_v31 }
 0xd6b   :  { %2789 = vadd.xlane.f32.xlu1 %v2788_v39  ;;  %v2778_v39 = vmul.f32 1.442695, %v2767_v47 }
 0xd6d   :  { %2373 = vadd.xlane.f32.xlu2 %v2372_v57  ;;  %v6288_v57 = vpop.eup %4513  ;;  %4515 = vpow2.f32 %v2778_v39 }
 0xd6e   :  { %v6253_v50 = vpop.xlane.xlu0 %2753  ;;  %v2794_v51 = vsel %vm358_vm3, %v6288_v57, 0.0 }
 0xd6f   :  { %v2543_v38 = vpop.xlane.xlu2 %2542 }
 0xd70   :  { %v2555_v31 = vsub.f32 %v6126_v59, %v2543_v38  ;;  %v2768_v59 = vsub.f32 %v6129_v26, %v6253_v50 }
 0xd73   :  { %v6295_v52 = vpop.eup %4515 }
 0xd74   :  { %v2797_v2 = vsel %vm358_vm3, %v6295_v52, 0.0 }
 0xd75   :  { %2161 = vadd.xlane.f32.xlu2 %v2160_v27  ;;  %v2566_v27 = vmul.f32 1.442695, %v2554_v24 }
 0xd76   :  { %v6262_v25 = vpop.xlane.xlu0 %2545  ;;  %v6264_v37 = vpop.xlane.xlu1 %2756 }
 0xd7d   :  { %2382 = vadd.xlane.f32.xlu2 %v2381_v0  ;;  %2834 = vrot.lane.b32.xlu0 %v5886_v54, %s4831_s7 }
 0xd7e   :  { %v6273_v14 = vpop.xlane.xlu1 %2548  ;;  %v6275_v12 = vpop.xlane.xlu0 %2759 }
 0xd84   :  { %2620 = vrot.lane.b32.xlu1 %v5886_v54, %s4830_s5 }
 0xd85   :  { %2792 = vadd.xlane.f32.xlu2 %v2791_v43  ;;  %2618 = vrot.lane.b32.xlu0 %v5877_v28, %s4830_s5 }
 0xd86   :  { %v6286_v41 = vpop.xlane.xlu1 %2762  ;;  %v2144_v44 = vpop.xlane.xlu0 %2143 }
 0xd87   :  { %4517 = vrcp.f32 %v2144_v44 }
 0xd8d   :  { %2795 = vadd.xlane.f32.xlu2 %v2794_v51  ;;  %2832 = vrot.lane.b32.xlu0 %v5877_v28, %s4831_s7  ;;  %v4518_v0 = vpop.eup %4517  ;;  %v2568_v28 = vmul.f32 1.442695, %v2555_v31 }
 0xd8e   :  { %v2147_v54 = vpop.xlane.xlu1 %2146  ;;  %v2174_v42 = vmul.f32 %v4518_v0, %v6161_v16  ;;  %v2552_v16 = vsub.f32 %v6094_v19, %v6260_v21  ;;  %v2557_v19 = vsub.f32 %v6147_v23, %v6273_v14 }
 0xd8f   :  { %4519 = vrcp.f32 %v2147_v54  ;;  %v2362_v61 = vpop.xlane.xlu2 %2361 }
 0xd90   :  { %4521 = vpow2.f32 %v2566_v27  ;;  %v2780_v27 = vmul.f32 1.442695, %v2768_v59 }
 0xd91   :  { %4523 = vrcp.f32 %v2362_v61 }
 0xd95   :  { %v4520_v63 = vpop.eup %4519  ;;  %2798 = vadd.xlane.f32.xlu2 %v2797_v2  ;;  %v2562_v2 = vmul.f32 1.442695, %v2552_v16 }
 0xd96   :  { %v2175_v47 = vmul.f32 %v4520_v63, %v6169_v55  ;;  %v6302_v44 = vpop.eup %4521  ;;  %v2150_v38 = vpop.xlane.xlu1 %2149  ;;  %v2769_v63 = vsub.f32 %v6139_v8, %v6264_v37 }
 0xd97   :  { %v2365_v43 = vpop.xlane.xlu2 %2364  ;;  %v4524_v51 = vpop.eup %4523  ;;  %v2586_v55 = vsel %vm358_vm3, %v6302_v44, 0.0 }
 0xd98   :  { %v2182_v39 = vpack.c.bf16 %v2175_v47, %v2174_v42  ;;  %4525 = vrcp.f32 %v2365_v43  ;;  %v2392_v61 = vmul.f32 %v4524_v51, %v6171_v4  ;;  %v2572_v47 = vmul.f32 1.442695, %v2557_v19 }
 0xd99   :  { %v2837_v24 = vpop.permute.xlu0 %2836  ;;  %4527 = vpow2.f32 %v2568_v28  ;;  %v2782_v43 = vmul.f32 1.442695, %v2769_v63 }
 0xd9a   :  { %4046 = vmatmul.msk.bf16.vlgmr.msrb.gmra.mxu0 %vm358_vm3, %v2182_v39  ;;  %2861 = vmatpush.bf16.msrb.mxu1 %v2837_v24  ;;  %4529 = vrcp.f32 %v2150_v38 }
 0xd9d   :  { %2587 = vadd.xlane.f32.xlu2 %v2586_v55 }
 0xd9e   :  { %v4526_v54 = vpop.eup %4525 }
 0xd9f   :  { %v2393_v0 = vmul.f32 %v4526_v54, %v6180_v22  ;;  %v2153_v31 = vpop.xlane.xlu2 %2152  ;;  %v6313_v26 = vpop.eup %4527  ;;  %v2553_v22 = vsub.f32 %v6106_v13, %v6240_v56  ;;  %v2770_v13 = vsub.f32 %v6150_v29, %v6275_v12 }
 0xda0   :  { %4531 = vrcp.f32 %v2153_v31  ;;  %v4530_v21 = vpop.eup %4529  ;;  %v2589_v4 = vsel %vm358_vm3, %v6313_v26, 0.0 }
 0xda1   :  { %v2400_v50 = vpack.c.bf16 %v2393_v0, %v2392_v61  ;;  %4533 = vpow2.f32 %v2780_v27  ;;  %v2176_v28 = vmul.f32 %v4530_v21, %v6178_v20  ;;  %v2564_v24 = vmul.f32 1.442695, %v2553_v22 }
 0xda2   :  { %4535 = vpow2.f32 %v2562_v2  ;;  %v2784_v59 = vmul.f32 1.442695, %v2770_v13 }
 0xda3   :  { %4054 = vmatmul.msk.bf16.vlgmr.msra.gmra.mxu1 %vm358_vm3, %v2400_v50  ;;  %4537 = vpow2.f32 %v2572_v47 }
 0xda4   :  { %4539 = vpow2.f32 %v2782_v43 }
 0xda5   :  { %2590 = vadd.xlane.f32.xlu2 %v2589_v4  ;;  %4541 = vpow2.f32 %v2564_v24 }
 0xda6   :  { %v4532_v42 = vpop.eup %4531  ;;  %4543 = vpow2.f32 %v2784_v59  ;;  %v2371_v31 = vpop.xlane.xlu1 %2370 }
 0xda7   :  { %v2177_v23 = vmul.f32 %v4532_v42, %v6189_v18  ;;  %v2623_v14 = vpop.permute.xlu2 %2622  ;;  %v6326_v39 = vpop.eup %4533  ;;  %v2556_v18 = vsub.f32 %v6136_v62, %v6262_v25  ;;  %v2771_v62 = vsub.f32 %v6159_v30, %v6286_v41 }
 0xda8   :  { %2647 = vmatpush.bf16.msra.mxu0 %v2623_v14  ;;  %v6328_v37 = vpop.eup %4535  ;;  %v2800_v20 = vsel %vm358_vm3, %v6326_v39, 0.0 }
 0xda9   :  { %v2183_v8 = vpack.c.bf16 %v2177_v23, %v2176_v28  ;;  %v2580_v56 = vsel %vm358_vm3, %v6328_v37, 0.0  ;;  %v6339_v38 = vpop.eup %4537  ;;  %v2570_v51 = vmul.f32 1.442695, %v2556_v18  ;;  %v2786_v54 = vmul.f32 1.442695, %v2771_v62 }
 0xdaa   :  { %v6341_v16 = vpop.eup %4539  ;;  %v2595_v29 = vsel %vm358_vm3, %v6339_v38, 0.0 }
 0xdab   :  { %4047 = vmatmul.msk.bf16.gmra.mxu0 %vm358_vm3, %v2183_v8  ;;  %v6343_v55 = vpop.eup %4541  ;;  %4545 = vpow2.f32 %v2570_v51  ;;  %v2803_v25 = vsel %vm358_vm3, %v6341_v16, 0.0 }
 0xdac   :  { %v2583_v12 = vsel %vm358_vm3, %v6343_v55, 0.0  ;;  %v6353_v27 = vpop.eup %4543  ;;  %4547 = vpow2.f32 %v2786_v54 }
 0xdad   :  { %2801 = vadd.xlane.f32.xlu2 %v2800_v20  ;;  %v2806_v0 = vsel %vm358_vm3, %v6353_v27, 0.0  ;;  %4549 = vrcp.f32 %v2371_v31 }
 0xdae   :  { %2581 = vadd.xlane.f32.xlu1 %v2580_v56  ;;  %v2159_v19 = vpop.xlane.xlu1 %2158 }
 0xdb1   :  { %v6355_v61 = vpop.eup %4545 }
 0xdb2   :  { %v2592_v30 = vsel %vm358_vm3, %v6355_v61, 0.0  ;;  %v6361_v41 = vpop.eup %4547 }
 0xdb3   :  { %v2809_v50 = vsel %vm358_vm3, %v6361_v41, 0.0  ;;  %v4550_v21 = vpop.eup %4549 }
 0xdb4   :  { %v2395_v4 = vmul.f32 %v4550_v21, %v6194_v1 }
 0xdb5   :  { %2596 = vadd.xlane.f32.xlu2 %v2595_v29 }
 0xdb6   :  { %2804 = vadd.xlane.f32.xlu1 %v2803_v25 }
 0xdb7   :  { %2584 = vadd.xlane.f32.xlu0 %v2583_v12 }
 0xdbe   :  { %2807 = vadd.xlane.f32.xlu1 %v2806_v0 }
 0xdbf   :  { %2593 = vadd.xlane.f32.xlu0 %v2592_v30 }
 0xdc4   :  { %v2368_v2 = vpop.xlane.xlu0 %2367 }
 0xdc5   :  { %4551 = vrcp.f32 %v2368_v2 }
 0xdc6   :  { %4553 = vrcp.f32 %v2159_v19  ;;  %v2380_v28 = vpop.xlane.xlu1 %2379 }
 0xdc7   :  { %2810 = vadd.xlane.f32.xlu0 %v2809_v50 }
 0xdcb   :  { %v4552_v63 = vpop.eup %4551 }
 0xdcc   :  { %v2394_v22 = vmul.f32 %v4552_v63, %v6208_v6  ;;  %v2156_v42 = vpop.xlane.xlu0 %2155  ;;  %v4554_v23 = vpop.eup %4553 }
 0xdcd   :  { %4555 = vrcp.f32 %v2156_v42  ;;  %v2179_v43 = vmul.f32 %v4554_v23, %v6198_v49 }
 0xdce   :  { %v2401_v47 = vpack.c.bf16 %v2395_v4, %v2394_v22  ;;  %v2576_v13 = vpop.xlane.xlu1 %2575 }
 0xdd0   :  { %4055 = vmatmul.msk.bf16.gmra.mxu1 %vm358_vm3, %v2401_v47 }
 0xdd3   :  { %v4556_v14 = vpop.eup %4555 }
 0xdd4   :  { %v2178_v24 = vmul.f32 %v4556_v14, %v6217_v15  ;;  %v2377_v20 = vpop.xlane.xlu0 %2376 }
 0xdd5   :  { %4557 = vrcp.f32 %v2377_v20 }
 0xdd6   :  { %v2184_v8 = vpack.c.bf16 %v2179_v43, %v2178_v24  ;;  %v2579_v6 = vpop.xlane.xlu1 %2578 }
 0xdd8   :  { %4048 = vmatmul.msk.bf16.gmra.mxu0 %vm358_vm3, %v2184_v8 }
 0xddb   :  { %v4558_v56 = vpop.eup %4557 }
 0xddc   :  { %v2165_v18 = vpop.xlane.xlu0 %2164  ;;  %v2397_v51 = vmul.f32 %v4558_v56, %v6229_v11 }
 0xdde   :  { %v2790_v25 = vpop.xlane.xlu1 %2789 }
 0xde0   :  { %v2374_v1 = vpop.xlane.xlu2 %2373 }
 0xde1   :  { %4559 = vrcp.f32 %v2374_v1 }
 0xde2   :  { %4561 = vrcp.f32 %v2165_v18 }
 0xde7   :  { %v4560_v59 = vpop.eup %4559 }
 0xde8   :  { %v2396_v29 = vmul.f32 %v4560_v59, %v6246_v40  ;;  %v2162_v49 = vpop.xlane.xlu2 %2161  ;;  %v4562_v62 = vpop.eup %4561 }
 0xde9   :  { %4563 = vrcp.f32 %v2162_v49  ;;  %v2181_v0 = vmul.f32 %v4562_v62, %v6238_v3 }
 0xdea   :  { %v2402_v15 = vpack.c.bf16 %v2397_v51, %v2396_v29  ;;  %4565 = vrcp.f32 %v2380_v28 }
 0xdec   :  { %4056 = vmatmul.msk.bf16.gmra.mxu1 %vm358_vm3, %v2402_v15 }
 0xdef   :  { %v4564_v12 = vpop.eup %4563  ;;  %v2835_v54 = vpop.permute.xlu0 %2834 }
 0xdf0   :  { %v2180_v31 = vmul.f32 %v4564_v12, %v6255_v33  ;;  %v2383_v30 = vpop.xlane.xlu2 %2382  ;;  %2862 = vmatpush.bf16.msrb.mxu1 %v2835_v54  ;;  %v4566_v40 = vpop.eup %4565 }
 0xdf1   :  { %4567 = vrcp.f32 %v2383_v30  ;;  %v2398_v21 = vmul.f32 %v4566_v40, %v6213_v60 }
 0xdf2   :  { %v2185_v11 = vpack.c.bf16 %v2181_v0, %v2180_v31  ;;  %4569 = vrcp.f32 %v2579_v6 }
 0xdf3   :  { %4571 = vrcp.f32 %v2576_v13 }
 0xdf4   :  { %4049 = vmatmul.msk.bf16.gmra.mxu0 %vm358_vm3, %v2185_v11 }
 0xdf6   :  { %v2621_v2 = vpop.permute.xlu1 %2620 }
 0xdf7   :  { %v4568_v50 = vpop.eup %4567  ;;  %v2619_v19 = vpop.permute.xlu0 %2618  ;;  %2648 = vmatpush.bf16.msra.mxu0 %v2621_v2 }
 0xdf8   :  { %v2399_v63 = vmul.f32 %v4568_v50, %v6266_v53  ;;  %v2793_v3 = vpop.xlane.xlu2 %2792  ;;  %v4570_v33 = vpop.eup %4569 }
 0xdf9   :  { %v4572_v22 = vpop.eup %4571  ;;  %4573 = vrcp.f32 %v2793_v3  ;;  %v2607_v42 = vmul.f32 %v4570_v33, %v6233_v32 }
 0xdfa   :  { %v2403_v4 = vpack.c.bf16 %v2399_v63, %v2398_v21  ;;  %4575 = vrcp.f32 %v2790_v25  ;;  %v2606_v28 = vmul.f32 %v4572_v22, %v6219_v5 }
 0xdfb   :  { %2649 = vmatpush.bf16.msra.mxu0 %v2619_v19 }
 0xdfc   :  { %4057 = vmatmul.msk.bf16.gmra.mxu1 %vm358_vm3, %v2403_v4  ;;  %v2614_v14 = vpack.c.bf16 %v2607_v42, %v2606_v28 }
 0xdff   :  { %v2833_v47 = vpop.permute.xlu0 %2832  ;;  %v4574_v60 = vpop.eup %4573 }
 0xe00   :  { %v2796_v23 = vpop.xlane.xlu2 %2795  ;;  %2863 = vmatpush.bf16.msrb.mxu1 %v2833_v47  ;;  %v4576_v53 = vpop.eup %4575  ;;  %v2821_v43 = vmul.f32 %v4574_v60, %v6277_v34 }
 0xe01   :  { %v2820_v24 = vmul.f32 %v4576_v53, %v6242_v35 }
 0xe03   :  { %v2828_v13 = vpack.c.bf16 %v2821_v43, %v2820_v24 }
 0xe04   :  { %4062 = vmatmul.msk.bf16.vlgmr.msra.gmra.mxu0 %vm358_vm3, %v2614_v14 }
 0xe08   :  { %v2799_v8 = vpop.xlane.xlu2 %2798 }
 0xe09   :  { %4577 = vrcp.f32 %v2799_v8 }
 0xe0a   :  { %4579 = vrcp.f32 %v2796_v23 }
 0xe0c   :  { %4070 = vmatmul.msk.bf16.vlgmr.msrb.gmra.mxu1 %vm358_vm3, %v2828_v13 }
 0xe0f   :  { %v4578_v20 = vpop.eup %4577 }
 0xe10   :  { %v2588_v32 = vpop.xlane.xlu2 %2587  ;;  %v4580_v5 = vpop.eup %4579  ;;  %v2823_v1 = vmul.f32 %v4578_v20, %v6295_v52 }
 0xe11   :  { %v2822_v6 = vmul.f32 %v4580_v5, %v6288_v57 }
 0xe13   :  { %v2829_v18 = vpack.c.bf16 %v2823_v1, %v2822_v6 }
 0xe17   :  { %v6396_v50 = vpop.f32.mrf.mxu0 }
 0xe18   :  { %v2591_v56 = vpop.xlane.xlu2 %2590 }
 0xe1c   :  { %4071 = vmatmul.msk.bf16.gmra.mxu1 %vm358_vm3, %v2829_v18 }
 0xe1f   :  { %v6402_v33 = vpop.f32.mrf.mxu0 }
 0xe20   :  { %v2437_v34 = vpop.f32.mrf.mxu1  ;;  %v2802_v35 = vpop.xlane.xlu2 %2801 }
 0xe21   :  { %v2582_v59 = vpop.xlane.xlu1 %2581  ;;  %4581 = vrcp.f32 %v2802_v35 }
 0xe22   :  { %4583 = vrcp.f32 %v2582_v59 }
 0xe27   :  { %v4582_v52 = vpop.eup %4581 }
 0xe28   :  { %v2439_v51 = vpop.f32.mrf.mxu1  ;;  %v4584_v62 = vpop.eup %4583  ;;  %v2824_v12 = vmul.f32 %v4582_v52, %v6326_v39 }
 0xe29   :  { %v4235_v29 = vpack.i.bf16 %v2439_v51, %v2437_v34  ;;  %v2805_v49 = vpop.xlane.xlu1 %2804  ;;  %v2608_v31 = vmul.f32 %v4584_v62, %v6328_v37  ;;  %v2597_v47 = vpop.xlane.xlu2 %2596 }
 0xe2a   :  { %v2585_v15 = vpop.xlane.xlu0 %2584  ;;  %4585 = vrcp.f32 %v2805_v49  ;;  %v6406_v28 = vpop.f32.mrf.mxu0 }
 0xe2b   :  { %4236 = vrot.lane.b32.xlu2 %v4235_v29, %s4819_s22  ;;  %4587 = vrcp.f32 %v2585_v15 }
 0xe2c   :  { %4589 = vrcp.f32 %v2591_v56 }
 0xe30   :  { %v4586_v57 = vpop.eup %4585 }
 0xe31   :  { %v4588_v25 = vpop.eup %4587  ;;  %v2825_v54 = vmul.f32 %v4586_v57, %v6341_v16  ;;  %v2808_v2 = vpop.xlane.xlu1 %2807 }
 0xe32   :  { %v2594_v0 = vpop.xlane.xlu0 %2593  ;;  %v2609_v30 = vmul.f32 %v4588_v25, %v6343_v55  ;;  %4591 = vrcp.f32 %v2808_v2  ;;  %v4590_v16 = vpop.eup %4589 }
 0xe33   :  { %v2830_v11 = vpack.c.bf16 %v2825_v54, %v2824_v12  ;;  %4593 = vrcp.f32 %v2588_v32  ;;  %v2611_v55 = vmul.f32 %v4590_v16, %v6313_v26  ;;  %v6410_v14 = vpop.f32.mrf.mxu0 }
 0xe34   :  { %v2615_v40 = vpack.c.bf16 %v2609_v30, %v2608_v31 }
 0xe35   :  { %4072 = vmatmul.msk.bf16.gmra.mxu1 %vm358_vm3, %v2830_v11 }
 0xe36   :  { %4063 = vmatmul.msk.bf16.gmra.mxu0 %vm358_vm3, %v2615_v40 }
 0xe38   :  { %v4592_v19 = vpop.eup %4591 }
 0xe39   :  { %v4594_v21 = vpop.eup %4593  ;;  %v2826_v63 = vmul.f32 %v4592_v19, %v6353_v27 }
 0xe3a   :  { %v2811_v39 = vpop.xlane.xlu0 %2810  ;;  %v2610_v4 = vmul.f32 %v4594_v21, %v6302_v44  ;;  %v4126_v21 = vld [vmem:[#allocation4 + $0x18] sm:$0xff] }
 0xe3b   :  { %4595 = vrcp.f32 %v2811_v39  ;;  %3049 = vmatpush.bf16.msrb.mxu3 %v4126_v21 }
 0xe3c   :  { %v2616_v42 = vpack.c.bf16 %v2611_v55, %v2610_v4  ;;  %4597 = vrcp.f32 %v2594_v0 }
 0xe3d   :  { %4599 = vrcp.f32 %v2597_v47 }
 0xe41   :  { %v4596_v37 = vpop.eup %4595 }
 0xe42   :  { %v2827_v3 = vmul.f32 %v4596_v37, %v6361_v41  ;;  %v4598_v26 = vpop.eup %4597  ;;  %v4125_v37 = vld [vmem:[#allocation4 + $0x10] sm:$0xff] }
 0xe43   :  { %v4600_v23 = vpop.eup %4599  ;;  %v2612_v27 = vmul.f32 %v4598_v26, %v6355_v61  ;;  %3050 = vmatpush.bf16.msrb.mxu3 %v4125_v37 }
 0xe44   :  { %v2831_v22 = vpack.c.bf16 %v2827_v3, %v2826_v63  ;;  %v2613_v41 = vmul.f32 %v4600_v23, %v6339_v38 }
 0xe46   :  { %4073 = vmatmul.msk.bf16.gmra.mxu1 %vm358_vm3, %v2831_v22  ;;  %4064 = vmatmul.msk.bf16.gmra.mxu0 %vm358_vm3, %v2616_v42  ;;  %v2617_v44 = vpack.c.bf16 %v2613_v41, %v2612_v27 }
 0xe4d   :  { %v2442_v60 = vpop.f32.mrf.mxu1 }
 0xe55   :  { %v6413_v53 = vpop.f32.mrf.mxu0  ;;  %v2444_v43 = vpop.f32.mrf.mxu1 }
 0xe56   :  { %4065 = vmatmul.msk.bf16.gmra.mxu0 %vm358_vm3, %v2617_v44  ;;  %v4250_v35 = vpack.i.bf16 %v2444_v43, %v2442_v60 }
 0xe5d   :  { %v6415_v24 = vpop.f32.mrf.mxu0 }
 0xe69   :  { %v2447_v8 = vpop.f32.mrf.mxu1 }
 0xe71   :  { %v6417_v13 = vpop.f32.mrf.mxu0  ;;  %v2449_v32 = vpop.f32.mrf.mxu1 }
 0xe72   :  { %v4265_v29 = vpack.i.bf16 %v2449_v32, %v2447_v8 }
 0xe79   :  { %v6419_v20 = vpop.f32.mrf.mxu0  ;;  %v2452_v61 = vpop.f32.mrf.mxu1 }
 0xe81   :  { %v2454_v5 = vpop.f32.mrf.mxu1  ;;  %v2651_v38 = vpop.f32.mrf.mxu0 }
 0xe82   :  { %v4280_v15 = vpack.i.bf16 %v2454_v5, %v2452_v61 }
 0xe85   :  { %v4237_v55 = vpop.permute.xlu2 %4236 }
 0xe86   :  { %v4239_v3 = vunpack.i.h.bf16 %v4237_v55  ;;  %v4238_v4 = vunpack.i.l.bf16 %v4237_v55 }
 0xe88   :  { %v2982_v26 = vsel %vm296_vm2, %v6402_v33, %v4239_v3  ;;  %v2981_v23 = vsel %vm296_vm2, %v6396_v50, %v4238_v4 }
 0xe89   :  { %v2653_v1 = vpop.f32.mrf.mxu0  ;;  %v2865_v6 = vpop.f32.mrf.mxu1 }
 0xe8a   :  { %v4240_v18 = vpack.i.bf16 %v2653_v1, %v2651_v38 }
 0xe8c   :  { %4241 = vrot.lane.b32.xlu1 %v4240_v18, %s4821_s24 }
 0xe91   :  { %v2867_v56 = vpop.f32.mrf.mxu1 }
 0xe92   :  { %v4245_v34 = vpack.i.bf16 %v2867_v56, %v2865_v6 }
 0xe94   :  { %4246 = vrot.lane.b32.xlu0 %v4245_v34, %s4832_s9 }
 0xe99   :  { %v2870_v59 = vpop.f32.mrf.mxu1 }
 0xe9c   :  { %4251 = vrot.lane.b32.xlu0 %v4250_v35, %s4819_s22 }
 0xea1   :  { %v2872_v51 = vpop.f32.mrf.mxu1 }
 0xea2   :  { %v4260_v49 = vpack.i.bf16 %v2872_v51, %v2870_v59 }
 0xea4   :  { %4266 = vrot.lane.b32.xlu0 %v4265_v29, %s4819_s22  ;;  %4261 = vrot.lane.b32.xlu1 %v4260_v49, %s4832_s9 }
 0xeac   :  { %4281 = vrot.lane.b32.xlu0 %v4280_v15, %s4819_s22 }
 0xeb2   :  { %v2875_v52 = vpop.f32.mrf.mxu1 }
 0xeb3   :  { %v2656_v62 = vpop.f32.mrf.mxu0 }
 0xeba   :  { %v2877_v57 = vpop.f32.mrf.mxu1 }
 0xebb   :  { %v4275_v25 = vpack.i.bf16 %v2877_v57, %v2875_v52  ;;  %v2658_v12 = vpop.f32.mrf.mxu0 }
 0xebc   :  { %v4255_v54 = vpack.i.bf16 %v2658_v12, %v2656_v62 }
 0xebd   :  { %4276 = vrot.lane.b32.xlu1 %v4275_v25, %s4832_s9 }
 0xebe   :  { %4256 = vrot.lane.b32.xlu2 %v4255_v54, %s4821_s24 }
 0xec3   :  { %v2880_v0 = vpop.f32.mrf.mxu1  ;;  %v2661_v31 = vpop.f32.mrf.mxu0 }
 0xecb   :  { %v2882_v30 = vpop.f32.mrf.mxu1  ;;  %v2663_v11 = vpop.f32.mrf.mxu0 }
 0xecc   :  { %v4290_v40 = vpack.i.bf16 %v2882_v30, %v2880_v0  ;;  %v4270_v2 = vpack.i.bf16 %v2663_v11, %v2661_v31 }
 0xece   :  { %4291 = vrot.lane.b32.xlu1 %v4290_v40, %s4832_s9  ;;  %4271 = vrot.lane.b32.xlu2 %v4270_v2, %s4821_s24 }
 0xed3   :  { %v2666_v39 = vpop.f32.mrf.mxu0 }
 0xedb   :  { %v2668_v16 = vpop.f32.mrf.mxu0 }
 0xedc   :  { %v4285_v19 = vpack.i.bf16 %v2668_v16, %v2666_v39 }
 0xede   :  { %4286 = vrot.lane.b32.xlu2 %v4285_v19, %s4821_s24 }
 0xefe   :  { %v4242_v63 = vpop.permute.xlu1 %4241 }
 0xeff   :  { %v4244_v22 = vunpack.i.h.bf16 %v4242_v63  ;;  %v4243_v42 = vunpack.i.l.bf16 %v4242_v63 }
 0xf01   :  { %v2989_v44 = vsel %vm1254_vm4, %v2981_v23, %v4243_v42  ;;  %v2990_v60 = vsel %vm1254_vm4, %v2982_v26, %v4244_v22 }
 0xf06   :  { %v4247_v47 = vpop.permute.xlu0 %4246 }
 0xf07   :  { %v4249_v27 = vunpack.i.h.bf16 %v4247_v47  ;;  %v4248_v41 = vunpack.i.l.bf16 %v4247_v47 }
 0xf09   :  { %v2997_v43 = vsel %vm1263_vm5, %v2989_v44, %v4248_v41  ;;  %v2998_v8 = vsel %vm1263_vm5, %v2990_v60, %v4249_v27 }
 0xf0a   :  { %v3005_v32 = vpack.c.bf16 %v2998_v8, %v2997_v43 }
 0xf0c   :  { %4083 = vmatmul.msk.bf16.vlgmr.msrb.gmra.mxu3 %vm185_vm0, %v3005_v32 }
 0xf0e   :  { %v4252_v61 = vpop.permute.xlu0 %4251 }
 0xf0f   :  { %v4254_v5 = vunpack.i.h.bf16 %v4252_v61  ;;  %v4253_v38 = vunpack.i.l.bf16 %v4252_v61 }
 0xf11   :  { %v2984_v18 = vsel %vm296_vm2, %v6410_v14, %v4254_v5  ;;  %v2983_v56 = vsel %vm296_vm2, %v6406_v28, %v4253_v38 }
 0xf16   :  { %v4262_v33 = vpop.permute.xlu1 %4261  ;;  %v4267_v52 = vpop.permute.xlu0 %4266 }
 0xf17   :  { %v4264_v34 = vunpack.i.h.bf16 %v4262_v33  ;;  %v4263_v59 = vunpack.i.l.bf16 %v4262_v33  ;;  %v4269_v57 = vunpack.i.h.bf16 %v4267_v52  ;;  %v4268_v14 = vunpack.i.l.bf16 %v4267_v52 }
 0xf18   :  { %v4257_v1 = vpop.permute.xlu2 %4256 }
 0xf19   :  { %v4259_v6 = vunpack.i.h.bf16 %v4257_v1  ;;  %v4258_v50 = vunpack.i.l.bf16 %v4257_v1  ;;  %v2986_v54 = vsel %vm296_vm2, %v6415_v24, %v4269_v57  ;;  %v2985_v0 = vsel %vm296_vm2, %v6413_v53, %v4268_v14 }
 0xf1b   :  { %v2992_v35 = vsel %vm1254_vm4, %v2984_v18, %v4259_v6  ;;  %v2991_v51 = vsel %vm1254_vm4, %v2983_v56, %v4258_v50 }
 0xf1c   :  { %v2999_v29 = vsel %vm1263_vm5, %v2991_v51, %v4263_v59  ;;  %v3000_v49 = vsel %vm1263_vm5, %v2992_v35, %v4264_v34 }
 0xf1d   :  { %v3006_v15 = vpack.c.bf16 %v3000_v49, %v2999_v29 }
 0xf1e   :  { %v4282_v19 = vpop.permute.xlu0 %4281 }
 0xf1f   :  { %4084 = vmatmul.msk.bf16.gmra.mxu3 %vm185_vm0, %v3006_v15  ;;  %v4284_v37 = vunpack.i.h.bf16 %v4282_v19  ;;  %v4283_v24 = vunpack.i.l.bf16 %v4282_v19 }
 0xf21   :  { %v2988_v3 = vsel %vm296_vm2, %v6419_v20, %v4284_v37  ;;  %v2987_v4 = vsel %vm296_vm2, %v6417_v13, %v4283_v24  ;;  %v4304_v20 = vld [vmem:[%s6818_s6 + $0x1] ss:$0 sm:$0xff] }
 0xf28   :  { %v4272_v62 = vpop.permute.xlu2 %4271 }
 0xf29   :  { %v4274_v25 = vunpack.i.h.bf16 %v4272_v62  ;;  %v4273_v12 = vunpack.i.l.bf16 %v4272_v62 }
 0xf2b   :  { %v2994_v11 = vsel %vm1254_vm4, %v2986_v54, %v4274_v25  ;;  %v2993_v40 = vsel %vm1254_vm4, %v2985_v0, %v4273_v12 }
 0xf2f   :  { %v4277_v28 = vpop.permute.xlu1 %4276 }
 0xf30   :  { %v4279_v31 = vunpack.i.h.bf16 %v4277_v28  ;;  %v4278_v30 = vunpack.i.l.bf16 %v4277_v28 }
 0xf32   :  { %v3001_v2 = vsel %vm1263_vm5, %v2993_v40, %v4278_v30  ;;  %v3002_v39 = vsel %vm1263_vm5, %v2994_v11, %v4279_v31 }
 0xf33   :  { %v3007_v16 = vpack.c.bf16 %v3002_v39, %v3001_v2 }
 0xf35   :  { %4085 = vmatmul.msk.bf16.gmra.mxu3 %vm185_vm0, %v3007_v16 }
 0xf38   :  { %v4287_v21 = vpop.permute.xlu2 %4286 }
 0xf39   :  { %v4289_v55 = vunpack.i.h.bf16 %v4287_v21  ;;  %v4288_v63 = vunpack.i.l.bf16 %v4287_v21 }
 0xf3b   :  { %v2996_v47 = vsel %vm1254_vm4, %v2988_v3, %v4289_v55  ;;  %v2995_v26 = vsel %vm1254_vm4, %v2987_v4, %v4288_v63 }
 0xf40   :  { %v4292_v53 = vpop.permute.xlu1 %4291 }
 0xf41   :  { %v4294_v22 = vunpack.i.h.bf16 %v4292_v53  ;;  %v4293_v42 = vunpack.i.l.bf16 %v4292_v53 }
 0xf43   :  { %v3003_v23 = vsel %vm1263_vm5, %v2995_v26, %v4293_v42  ;;  %v3004_v27 = vsel %vm1263_vm5, %v2996_v47, %v4294_v22 }
 0xf44   :  { %v3008_v41 = vpack.c.bf16 %v3004_v27, %v3003_v23 }
 0xf46   :  { %4086 = vmatmul.msk.bf16.gmra.mxu3 %vm185_vm0, %v3008_v41 }
 0xf8f   :  { %v3052_v44 = vpop.f32.mrf.mxu3 }
 0xf90   :  { %v3053_v60 = vadd.f32 %v4304_v20, %v3052_v44 }
 0xf92   :  { %v3072_v13 = vadd.f32 %v3053_v60, %v5821_v7 }
 0xf94   :  { %v3084_v43 = vsel %vm185_vm0, %v3072_v13, 0.0 }
 0xf95   :  { %3085 = vadd.xlane.f32.xlu0 %v3084_v43 }
 0xf97   :  { %v3054_v8 = vpop.f32.mrf.mxu3 }
 0xf98   :  { %v3055_v32 = vadd.f32 %v4304_v20, %v3054_v8  ;;  %v4128_v8 = vld [vmem:[#allocation7 + $0x18] sm:$0xff] }
 0xf99   :  { %3326 = vmatpush.bf16.msrb.mxu0 %v4128_v8 }
 0xf9a   :  { %v3073_v61 = vadd.f32 %v3055_v32, %v5824_v46 }
 0xf9c   :  { %v3087_v5 = vsel %vm185_vm0, %v3073_v61, 0.0 }
 0xf9d   :  { %3088 = vadd.xlane.f32.xlu2 %v3087_v5 }
 0xfa2   :  { %v3057_v38 = vpop.f32.mrf.mxu3 }
 0xfa3   :  { %v3058_v33 = vadd.f32 %v4304_v20, %v3057_v38  ;;  %v4127_v38 = vld [vmem:[#allocation7 + $0x10] sm:$0xff] }
 0xfa4   :  { %3327 = vmatpush.bf16.msrb.mxu0 %v4127_v38 }
 0xfa5   :  { %v3074_v1 = vadd.f32 %v3058_v33, %v5837_v48 }
 0xfa7   :  { %v3090_v6 = vsel %vm185_vm0, %v3074_v1, 0.0 }
 0xfa8   :  { %3091 = vadd.xlane.f32.xlu1 %v3090_v6 }
 0xfaa   :  { %v3059_v50 = vpop.f32.mrf.mxu3 }
 0xfab   :  { %v3060_v18 = vadd.f32 %v4304_v20, %v3059_v50 }
 0xfad   :  { %v3075_v7 = vadd.f32 %v3060_v18, %v5840_v17 }
 0xfaf   :  { %v3093_v56 = vsel %vm185_vm0, %v3075_v7, 0.0 }
 0xfb0   :  { %3094 = vadd.xlane.f32.xlu0 %v3093_v56 }
 0xfb8   :  { %v3062_v34 = vpop.f32.mrf.mxu3 }
 0xfb9   :  { %v3063_v59 = vadd.f32 %v4304_v20, %v3062_v34 }
 0xfbb   :  { %v3076_v46 = vadd.f32 %v3063_v59, %v5851_v58 }
 0xfbd   :  { %v3096_v35 = vsel %vm185_vm0, %v3076_v46, 0.0 }
 0xfbe   :  { %3097 = vadd.xlane.f32.xlu2 %v3096_v35 }
 0xfc0   :  { %v3064_v51 = vpop.f32.mrf.mxu3 }
 0xfc1   :  { %v3065_v29 = vadd.f32 %v4304_v20, %v3064_v51 }
 0xfc3   :  { %v3077_v48 = vadd.f32 %v3065_v29, %v5854_v45 }
 0xfc5   :  { %v3099_v49 = vsel %vm185_vm0, %v3077_v48, 0.0 }
 0xfc6   :  { %3100 = vadd.xlane.f32.xlu1 %v3099_v49 }
 0xfc9   :  { %v3067_v15 = vpop.f32.mrf.mxu3 }
 0xfca   :  { %v3068_v52 = vadd.f32 %v4304_v20, %v3067_v15 }
 0xfcc   :  { %v3078_v17 = vadd.f32 %v3068_v52, %v5866_v10 }
 0xfce   :  { %v3102_v62 = vsel %vm185_vm0, %v3078_v17, 0.0 }
 0xfcf   :  { %3103 = vadd.xlane.f32.xlu1 %v3102_v62 }
 0xfd1   :  { %v3069_v25 = vpop.f32.mrf.mxu3 }
 0xfd2   :  { %v3070_v45 = vadd.f32 %v4304_v20, %v3069_v25 }
 0xfd4   :  { %v3079_v10 = vadd.f32 %v3070_v45, %v5869_v9  ;;  %v6538_v45 = vld [vmem:[#allocation6 + $0x1] ss:$0 sm:$0xff] }
 0xfd6   :  { %v3105_v40 = vsel %vm185_vm0, %v3079_v10, 0.0 }
0x1008   :  { %v3086_v57 = vpop.xlane.xlu0 %3085 }
0x1009   :  { %v3108_v58 = vmul.f32 %v3086_v57, %v5606_v36 }
0x100b   :  { %v6486_v14 = vsub.f32 %v3072_v13, %v3108_v58 }
0x100d   :  { %v3124_v12 = vmul.f32 %v6486_v14, %v6486_v14 }
0x100f   :  { %v3132_v28 = vsel %vm185_vm0, %v3124_v12, 0.0 }
0x1010   :  { %v3089_v54 = vpop.xlane.xlu2 %3088  ;;  %3133 = vadd.xlane.f32.xlu0 %v3132_v28 }
0x1011   :  { %v3109_v0 = vmul.f32 %v3089_v54, %v5606_v36 }
0x1013   :  { %v6493_v31 = vsub.f32 %v3073_v61, %v3109_v0 }
0x1015   :  { %v3125_v30 = vmul.f32 %v6493_v31, %v6493_v31 }
0x1017   :  { %v3135_v11 = vsel %vm185_vm0, %v3125_v30, 0.0 }
0x1018   :  { %3136 = vadd.xlane.f32.xlu2 %v3135_v11  ;;  %3106 = vadd.xlane.f32.xlu0 %v3105_v40  ;;  %v6545_v40 = vld [vmem:[%s6820_s8 + $0x1] ss:$0 sm:$0xff] }
0x101b   :  { %v3092_v2 = vpop.xlane.xlu1 %3091 }
0x101c   :  { %v3110_v39 = vmul.f32 %v3092_v2, %v5606_v36 }
0x101e   :  { %v6500_v16 = vsub.f32 %v3074_v1, %v3110_v39 }
0x1020   :  { %v3126_v19 = vmul.f32 %v6500_v16, %v6500_v16 }
0x1022   :  { %v3138_v9 = vsel %vm185_vm0, %v3126_v19, 0.0 }
0x1023   :  { %3139 = vadd.xlane.f32.xlu2 %v3138_v9  ;;  %v3095_v21 = vpop.xlane.xlu0 %3094 }
0x1024   :  { %v3111_v37 = vmul.f32 %v3095_v21, %v5606_v36 }
0x1026   :  { %v6506_v24 = vsub.f32 %v3075_v7, %v3111_v37 }
0x1028   :  { %v3127_v55 = vmul.f32 %v6506_v24, %v6506_v24 }
0x102a   :  { %v3141_v63 = vsel %vm185_vm0, %v3127_v55, 0.0 }
0x102b   :  { %3142 = vadd.xlane.f32.xlu1 %v3141_v63 }
0x1031   :  { %v3098_v53 = vpop.xlane.xlu2 %3097 }
0x1032   :  { %v3112_v3 = vmul.f32 %v3098_v53, %v5606_v36 }
0x1034   :  { %v6512_v4 = vsub.f32 %v3076_v46, %v3112_v3 }
0x1036   :  { %v3128_v22 = vmul.f32 %v6512_v4, %v6512_v4 }
0x1038   :  { %v3144_v42 = vsel %vm185_vm0, %v3128_v22, 0.0 }
0x1039   :  { %v3101_v47 = vpop.xlane.xlu1 %3100  ;;  %3145 = vadd.xlane.f32.xlu0 %v3144_v42 }
0x103a   :  { %v3113_v26 = vmul.f32 %v3101_v47, %v5606_v36 }
0x103c   :  { %v6518_v23 = vsub.f32 %v3077_v48, %v3113_v26 }
0x103e   :  { %v3129_v27 = vmul.f32 %v6518_v23, %v6518_v23 }
0x1040   :  { %v3147_v41 = vsel %vm185_vm0, %v3129_v27, 0.0 }
0x1041   :  { %3148 = vadd.xlane.f32.xlu2 %v3147_v41 }
0x1042   :  { %v3104_v20 = vpop.xlane.xlu1 %3103 }
0x1043   :  { %v3114_v44 = vmul.f32 %v3104_v20, %v5606_v36 }
0x1045   :  { %v6524_v60 = vsub.f32 %v3078_v17, %v3114_v44 }
0x1047   :  { %v3130_v13 = vmul.f32 %v6524_v60, %v6524_v60 }
0x1049   :  { %v3150_v43 = vsel %vm185_vm0, %v3130_v13, 0.0 }
0x104a   :  { %3151 = vadd.xlane.f32.xlu1 %v3150_v43 }
0x1083   :  { %v3134_v32 = vpop.xlane.xlu0 %3133 }
0x1084   :  { %v3156_v61 = vmul.f32 %v3134_v32, %v5606_v36 }
0x1086   :  { %v3164_v5 = vadd.f32 1e-05, %v3156_v61 }
0x1088   :  { %4601 = vrsqrt.f32 %v3164_v5  ;;  %vm3178_vm2 = vweird.f32 %v3164_v5 }
0x108b   :  { %v3137_v33 = vpop.xlane.xlu2 %3136  ;;  %v3107_v1 = vpop.xlane.xlu0 %3106 }
0x108c   :  { %v3157_v6 = vmul.f32 %v3137_v33, %v5606_v36  ;;  %v3115_v50 = vmul.f32 %v3107_v1, %v5606_v36 }
0x108e   :  { %v4602_v18 = vpop.eup %4601  ;;  %v3165_v7 = vadd.f32 1e-05, %v3157_v6  ;;  %v6532_v56 = vsub.f32 %v3079_v10, %v3115_v50 }
0x108f   :  { %v3173_v34 = vmul.f32 %v4602_v18, %v3164_v5  ;;  %vm3179_vm1 = vweird.f32 %v4602_v18 }
0x1090   :  { %4603 = vrsqrt.f32 %v3165_v7  ;;  %v3131_v59 = vmul.f32 %v6532_v56, %v6532_v56  ;;  %vm3180_vm3 = vmor %vm3178_vm2, %vm3179_vm1  ;;  %vm3188_vm5 = vweird.f32 %v3165_v7 }
0x1091   :  { %v3174_v46 = vmul.f32 %v4602_v18, %v3173_v34 }
0x1092   :  { %v3153_v35 = vsel %vm185_vm0, %v3131_v59, 0.0 }
0x1093   :  { %v3175_v51 = vmul.f32 0.5, %v3174_v46  ;;  %3154 = vadd.xlane.f32.xlu0 %v3153_v35 }
0x1095   :  { %v3176_v29 = vsub.f32 1.5, %v3175_v51 }
0x1096   :  { %v4604_v48 = vpop.eup %4603  ;;  %v3140_v52 = vpop.xlane.xlu2 %3139 }
0x1097   :  { %v3177_v49 = vmul.f32 %v4602_v18, %v3176_v29  ;;  %v3183_v15 = vmul.f32 %v4604_v48, %v3165_v7  ;;  %v3158_v17 = vmul.f32 %v3140_v52, %v5606_v36  ;;  %vm3189_vm4 = vweird.f32 %v4604_v48 }
0x1098   :  { %vm3190_vm15 = vmor %vm3188_vm5, %vm3189_vm4 }
0x1099   :  { %v3184_v62 = vmul.f32 %v4604_v48, %v3183_v15  ;;  %v3166_v57 = vadd.f32 1e-05, %v3158_v17  ;;  %v3181_v58 = vsel %vm3180_vm3, %v4602_v18, %v3177_v49 }
0x109a   :  { %v3252_v28 = vmul.f32 %v3181_v58, %v6486_v14 }
0x109b   :  { %v3185_v25 = vmul.f32 0.5, %v3184_v62  ;;  %4605 = vrsqrt.f32 %v3166_v57  ;;  %vm3198_vm7 = vweird.f32 %v3166_v57 }
0x109c   :  { %v3263_v2 = vmul.f32 %v6538_v45, %v3252_v28 }
0x109d   :  { %v3186_v12 = vsub.f32 1.5, %v3185_v25 }
0x109e   :  { %v3143_v0 = vpop.xlane.xlu1 %3142  ;;  %v6551_v37 = vadd.f32 %v6545_v40, %v3263_v2 }
0x109f   :  { %v3187_v54 = vmul.f32 %v4604_v48, %v3186_v12  ;;  %v3159_v10 = vmul.f32 %v3143_v0, %v5606_v36 }
0x10a1   :  { %v3191_v30 = vsel %vm3190_vm15, %v4604_v48, %v3187_v54  ;;  %v4606_v11 = vpop.eup %4605  ;;  %v3167_v19 = vadd.f32 1e-05, %v3159_v10 }
0x10a2   :  { %v3253_v39 = vmul.f32 %v3191_v30, %v6493_v31  ;;  %v3193_v9 = vmul.f32 %v4606_v11, %v3166_v57  ;;  %vm3199_vm6 = vweird.f32 %v4606_v11 }
0x10a3   :  { %4607 = vrsqrt.f32 %v3167_v19  ;;  %vm3200_vm8 = vmor %vm3198_vm7, %vm3199_vm6  ;;  %vm3208_vm10 = vweird.f32 %v3167_v19 }
0x10a4   :  { %v3264_v14 = vmul.f32 %v6538_v45, %v3253_v39  ;;  %v3194_v21 = vmul.f32 %v4606_v11, %v3193_v9 }
0x10a6   :  { %v6554_v55 = vadd.f32 %v6545_v40, %v3264_v14  ;;  %v3195_v63 = vmul.f32 0.5, %v3194_v21 }
0x10a8   :  { %v3282_v53 = vpack.c.bf16 %v6554_v55, %v6551_v37  ;;  %v3196_v3 = vsub.f32 1.5, %v3195_v63  ;;  %v4130_v63 = vld [vmem:[#allocation9 + $0x18] sm:$0xff] }
0x10a9   :  { %v4608_v22 = vpop.eup %4607  ;;  %3401 = vmatpush.bf16.msrb.mxu2 %v4130_v63 }
0x10aa   :  { %4097 = vmatmul.msk.bf16.vlgmr.msrb.gmra.mxu0 %vm185_vm0, %v3282_v53  ;;  %v3197_v31 = vmul.f32 %v4606_v11, %v3196_v3  ;;  %v3203_v42 = vmul.f32 %v4608_v22, %v3167_v19  ;;  %vm3209_vm9 = vweird.f32 %v4608_v22 }
0x10ab   :  { %vm3210_vm11 = vmor %vm3208_vm10, %vm3209_vm9 }
0x10ac   :  { %v3204_v47 = vmul.f32 %v4608_v22, %v3203_v42  ;;  %v3146_v26 = vpop.xlane.xlu0 %3145  ;;  %v3201_v41 = vsel %vm3200_vm8, %v4606_v11, %v3197_v31  ;;  %v4129_v31 = vld [vmem:[#allocation9 + $0x10] sm:$0xff] }
0x10ad   :  { %v3160_v27 = vmul.f32 %v3146_v26, %v5606_v36  ;;  %v3254_v43 = vmul.f32 %v3201_v41, %v6500_v16  ;;  %3402 = vmatpush.bf16.msrb.mxu2 %v4129_v31 }
0x10ae   :  { %v3205_v20 = vmul.f32 0.5, %v3204_v47 }
0x10af   :  { %v3168_v44 = vadd.f32 1e-05, %v3160_v27  ;;  %v3265_v33 = vmul.f32 %v6538_v45, %v3254_v43 }
0x10b0   :  { %v3206_v13 = vsub.f32 1.5, %v3205_v20 }
0x10b1   :  { %4609 = vrsqrt.f32 %v3168_v44  ;;  %v6566_v16 = vadd.f32 %v6545_v40, %v3265_v33  ;;  %vm3218_vm13 = vweird.f32 %v3168_v44 }
0x10b2   :  { %v3207_v8 = vmul.f32 %v4608_v22, %v3206_v13 }
0x10b4   :  { %v3211_v32 = vsel %vm3210_vm11, %v4608_v22, %v3207_v8  ;;  %v3149_v61 = vpop.xlane.xlu2 %3148 }
0x10b5   :  { %v3255_v5 = vmul.f32 %v3211_v32, %v6506_v24  ;;  %v3161_v38 = vmul.f32 %v3149_v61, %v5606_v36 }
0x10b7   :  { %v4610_v1 = vpop.eup %4609  ;;  %v3169_v6 = vadd.f32 1e-05, %v3161_v38  ;;  %v3266_v50 = vmul.f32 %v6538_v45, %v3255_v5 }
0x10b8   :  { %v3213_v18 = vmul.f32 %v4610_v1, %v3168_v44  ;;  %vm3219_vm12 = vweird.f32 %v4610_v1 }
0x10b9   :  { %4611 = vrsqrt.f32 %v3169_v6  ;;  %v6569_v7 = vadd.f32 %v6545_v40, %v3266_v50  ;;  %vm3220_vm14 = vmor %vm3218_vm13, %vm3219_vm12  ;;  %vm3228_vm2 = vweird.f32 %v3169_v6 }
0x10ba   :  { %v3214_v34 = vmul.f32 %v4610_v1, %v3213_v18 }
0x10bb   :  { %v3283_v24 = vpack.c.bf16 %v6569_v7, %v6566_v16 }
0x10bc   :  { %v3215_v59 = vmul.f32 0.5, %v3214_v34 }
0x10bd   :  { %4098 = vmatmul.msk.bf16.gmra.mxu0 %vm185_vm0, %v3283_v24 }
0x10be   :  { %v3216_v46 = vsub.f32 1.5, %v3215_v59 }
0x10bf   :  { %v4612_v35 = vpop.eup %4611 }
0x10c0   :  { %v3217_v51 = vmul.f32 %v4610_v1, %v3216_v46  ;;  %v3223_v29 = vmul.f32 %v4612_v35, %v3169_v6  ;;  %vm3229_vm1 = vweird.f32 %v4612_v35 }
0x10c1   :  { %vm3230_vm3 = vmor %vm3228_vm2, %vm3229_vm1 }
0x10c2   :  { %v3224_v48 = vmul.f32 %v4612_v35, %v3223_v29  ;;  %v3221_v49 = vsel %vm3220_vm14, %v4610_v1, %v3217_v51 }
0x10c3   :  { %v3256_v17 = vmul.f32 %v3221_v49, %v6512_v4  ;;  %v3152_v4 = vpop.xlane.xlu1 %3151 }
0x10c4   :  { %v3225_v15 = vmul.f32 0.5, %v3224_v48  ;;  %v3162_v10 = vmul.f32 %v3152_v4, %v5606_v36 }
0x10c5   :  { %v3267_v25 = vmul.f32 %v6538_v45, %v3256_v17 }
0x10c6   :  { %v3226_v52 = vsub.f32 1.5, %v3225_v15  ;;  %v3170_v30 = vadd.f32 1e-05, %v3162_v10  ;;  %v4308_v10 = vld [vmem:[%s6824_s12 + $0x1] ss:$0 sm:$0xff] }
0x10c7   :  { %v6579_v28 = vadd.f32 %v6545_v40, %v3267_v25 }
0x10c8   :  { %v3227_v62 = vmul.f32 %v4612_v35, %v3226_v52  ;;  %4613 = vrsqrt.f32 %v3170_v30  ;;  %vm3238_vm5 = vweird.f32 %v3170_v30 }
0x10ca   :  { %v3231_v57 = vsel %vm3230_vm3, %v4612_v35, %v3227_v62 }
0x10cb   :  { %v3257_v58 = vmul.f32 %v3231_v57, %v6518_v23 }
0x10cd   :  { %v3268_v12 = vmul.f32 %v6538_v45, %v3257_v58 }
0x10ce   :  { %v4614_v23 = vpop.eup %4613 }
0x10cf   :  { %v6582_v54 = vadd.f32 %v6545_v40, %v3268_v12  ;;  %v3233_v11 = vmul.f32 %v4614_v23, %v3170_v30  ;;  %vm3239_vm4 = vweird.f32 %v4614_v23 }
0x10d0   :  { %vm3240_vm15 = vmor %vm3238_vm5, %vm3239_vm4 }
0x10d1   :  { %v3284_v0 = vpack.c.bf16 %v6582_v54, %v6579_v28  ;;  %v3234_v2 = vmul.f32 %v4614_v23, %v3233_v11 }
0x10d3   :  { %4099 = vmatmul.msk.bf16.gmra.mxu0 %vm185_vm0, %v3284_v0  ;;  %v3235_v14 = vmul.f32 0.5, %v3234_v2 }
0x10d5   :  { %v3236_v21 = vsub.f32 1.5, %v3235_v14 }
0x10d7   :  { %v3237_v3 = vmul.f32 %v4614_v23, %v3236_v21 }
0x10d9   :  { %v3241_v47 = vsel %vm3240_vm15, %v4614_v23, %v3237_v3 }
0x10da   :  { %v3258_v41 = vmul.f32 %v3241_v47, %v6524_v60 }
0x10dc   :  { %v3269_v43 = vmul.f32 %v6538_v45, %v3258_v41 }
0x10de   :  { %v6594_v32 = vadd.f32 %v6545_v40, %v3269_v43 }
0x1106   :  { %v3155_v39 = vpop.xlane.xlu0 %3154 }
0x1107   :  { %v3163_v19 = vmul.f32 %v3155_v39, %v5606_v36 }
0x1109   :  { %v3171_v9 = vadd.f32 1e-05, %v3163_v19 }
0x110b   :  { %4615 = vrsqrt.f32 %v3171_v9  ;;  %vm3248_vm7 = vweird.f32 %v3171_v9 }
0x1111   :  { %v4616_v53 = vpop.eup %4615 }
0x1112   :  { %v3243_v22 = vmul.f32 %v4616_v53, %v3171_v9  ;;  %vm3249_vm6 = vweird.f32 %v4616_v53 }
0x1113   :  { %vm3250_vm8 = vmor %vm3248_vm7, %vm3249_vm6 }
0x1114   :  { %v3244_v42 = vmul.f32 %v4616_v53, %v3243_v22 }
0x1116   :  { %v3245_v26 = vmul.f32 0.5, %v3244_v42 }
0x1118   :  { %v3246_v27 = vsub.f32 1.5, %v3245_v26 }
0x111a   :  { %v3247_v20 = vmul.f32 %v4616_v53, %v3246_v27 }
0x111c   :  { %v3251_v44 = vsel %vm3250_vm8, %v4616_v53, %v3247_v20 }
0x111d   :  { %v3259_v13 = vmul.f32 %v3251_v44, %v6532_v56  ;;  %v4307_v56 = vld [vmem:[%s6822_s10 + $0x1] ss:$0 sm:$0xff] }
0x111f   :  { %v3270_v8 = vmul.f32 %v6538_v45, %v3259_v13 }
0x1121   :  { %v6597_v61 = vadd.f32 %v6545_v40, %v3270_v8 }
0x1123   :  { %v3285_v5 = vpack.c.bf16 %v6597_v61, %v6594_v32 }
0x1125   :  { %4100 = vmatmul.msk.bf16.gmra.mxu0 %vm185_vm0, %v3285_v5 }
0x1127   :  { %v3329_v60 = vpop.f32.mrf.mxu0 }
0x1128   :  { %v3330_v38 = vadd.f32 %v4307_v56, %v3329_v60 }
0x112a   :  { %v3349_v45 = vmax.f32 %v3330_v38, 0.0 }
0x112f   :  { %v3331_v33 = vpop.f32.mrf.mxu0 }
0x1130   :  { %v3332_v1 = vadd.f32 %v4307_v56, %v3331_v33 }
0x1132   :  { %v3350_v6 = vmax.f32 %v3332_v1, 0.0 }
0x1134   :  { %v3357_v50 = vpack.c.bf16 %v3350_v6, %v3349_v45 }
0x1136   :  { %4110 = vmatmul.msk.bf16.vlgmr.msrb.gmra.mxu2 %vm185_vm0, %v3357_v50 }
0x113a   :  { %v3334_v40 = vpop.f32.mrf.mxu0 }
0x113b   :  { %v3335_v18 = vadd.f32 %v4307_v56, %v3334_v40 }
0x113d   :  { %v3351_v59 = vmax.f32 %v3335_v18, 0.0 }
0x1142   :  { %v3336_v34 = vpop.f32.mrf.mxu0 }
0x1143   :  { %v3337_v24 = vadd.f32 %v4307_v56, %v3336_v34 }
0x1145   :  { %v3352_v46 = vmax.f32 %v3337_v24, 0.0 }
0x1147   :  { %v3358_v35 = vpack.c.bf16 %v3352_v46, %v3351_v59 }
0x1149   :  { %4111 = vmatmul.msk.bf16.gmra.mxu2 %vm185_vm0, %v3358_v35 }
0x1150   :  { %v3339_v51 = vpop.f32.mrf.mxu0 }
0x1151   :  { %v3340_v29 = vadd.f32 %v4307_v56, %v3339_v51 }
0x1153   :  { %v3353_v15 = vmax.f32 %v3340_v29, 0.0 }
0x1158   :  { %v3341_v48 = vpop.f32.mrf.mxu0 }
0x1159   :  { %v3342_v49 = vadd.f32 %v4307_v56, %v3341_v48 }
0x115b   :  { %v3354_v52 = vmax.f32 %v3342_v49, 0.0 }
0x115d   :  { %v3359_v17 = vpack.c.bf16 %v3354_v52, %v3353_v15 }
0x115f   :  { %4112 = vmatmul.msk.bf16.gmra.mxu2 %vm185_vm0, %v3359_v17 }
0x11a2   :  { %v3344_v62 = vpop.f32.mrf.mxu0 }
0x11a3   :  { %v3345_v57 = vadd.f32 %v4307_v56, %v3344_v62 }
0x11a5   :  { %v3355_v12 = vmax.f32 %v3345_v57, 0.0 }
0x11aa   :  { %v3346_v58 = vpop.f32.mrf.mxu0 }
0x11ab   :  { %v3347_v25 = vadd.f32 %v4307_v56, %v3346_v58 }
0x11ad   :  { %v3356_v0 = vmax.f32 %v3347_v25, 0.0 }
0x11af   :  { %v3360_v4 = vpack.c.bf16 %v3356_v0, %v3355_v12 }
0x11b1   :  { %4113 = vmatmul.msk.bf16.gmra.mxu2 %vm185_vm0, %v3360_v4 }
0x11b9   :  { %v3404_v30 = vpop.f32.mrf.mxu2 }
0x11ba   :  { %v3405_v23 = vadd.f32 %v4308_v10, %v3404_v30 }
0x11bc   :  { %v3424_v11 = vadd.f32 %v3405_v23, %v6551_v37 }
0x11be   :  { %v3436_v2 = vsel %vm185_vm0, %v3424_v11, 0.0 }
0x11bf   :  { %3437 = vadd.xlane.f32.xlu2 %v3436_v2 }
0x11c1   :  { %v3406_v39 = vpop.f32.mrf.mxu2 }
0x11c2   :  { %v3407_v19 = vadd.f32 %v4308_v10, %v3406_v39 }
0x11c4   :  { %v3425_v9 = vadd.f32 %v3407_v19, %v6554_v55 }
0x11c6   :  { %v3439_v14 = vsel %vm185_vm0, %v3425_v9, 0.0 }
0x11c7   :  { %3440 = vadd.xlane.f32.xlu1 %v3439_v14 }
0x11cc   :  { %v3409_v21 = vpop.f32.mrf.mxu2 }
0x11cd   :  { %v3410_v63 = vadd.f32 %v4308_v10, %v3409_v21 }
0x11cf   :  { %v3426_v53 = vadd.f32 %v3410_v63, %v6566_v16 }
0x11d1   :  { %v3442_v3 = vsel %vm185_vm0, %v3426_v53, 0.0 }
0x11d2   :  { %3443 = vadd.xlane.f32.xlu0 %v3442_v3 }
0x11d4   :  { %v3411_v22 = vpop.f32.mrf.mxu2 }
0x11d5   :  { %v3412_v31 = vadd.f32 %v4308_v10, %v3411_v22 }
0x11d7   :  { %v3427_v37 = vadd.f32 %v3412_v31, %v6569_v7 }
0x11d9   :  { %v3445_v42 = vsel %vm185_vm0, %v3427_v37, 0.0 }
0x11da   :  { %3446 = vadd.xlane.f32.xlu2 %v3445_v42 }
0x11e2   :  { %v3414_v47 = vpop.f32.mrf.mxu2 }
0x11e3   :  { %v3415_v26 = vadd.f32 %v4308_v10, %v3414_v47 }
0x11e5   :  { %v3428_v55 = vadd.f32 %v3415_v26, %v6579_v28 }
0x11e7   :  { %v3448_v27 = vsel %vm185_vm0, %v3428_v55, 0.0 }
0x11e8   :  { %3449 = vadd.xlane.f32.xlu1 %v3448_v27 }
0x11ea   :  { %v3416_v41 = vpop.f32.mrf.mxu2 }
0x11eb   :  { %v3417_v20 = vadd.f32 %v4308_v10, %v3416_v41 }
0x11ed   :  { %v3429_v16 = vadd.f32 %v3417_v20, %v6582_v54 }
0x11ef   :  { %v3451_v44 = vsel %vm185_vm0, %v3429_v16, 0.0 }
0x11f0   :  { %3452 = vadd.xlane.f32.xlu0 %v3451_v44 }
0x1232   :  { %v3438_v13 = vpop.xlane.xlu2 %3437 }
0x1233   :  { %v3460_v7 = vmul.f32 %v3438_v13, %v5606_v36 }
0x1234   :  { %v3419_v43 = vpop.f32.mrf.mxu2 }
0x1235   :  { %v6625_v8 = vsub.f32 %v3424_v11, %v3460_v7  ;;  %v3420_v5 = vadd.f32 %v4308_v10, %v3419_v43  ;;  %v6679_v7 = vld [vmem:[#allocation10 + $0x1] ss:$0 sm:$0xff] }
0x1237   :  { %v3430_v60 = vadd.f32 %v3420_v5, %v6594_v32  ;;  %v3476_v28 = vmul.f32 %v6625_v8, %v6625_v8 }
0x1239   :  { %v3484_v56 = vsel %vm185_vm0, %v3476_v28, 0.0  ;;  %v3454_v38 = vsel %vm185_vm0, %v3430_v60, 0.0 }
0x123a   :  { %v3441_v54 = vpop.xlane.xlu1 %3440  ;;  %3485 = vadd.xlane.f32.xlu0 %v3484_v56  ;;  %3455 = vadd.xlane.f32.xlu2 %v3454_v38  ;;  %v6685_v56 = vld [vmem:[%s6826_s14 + $0x1] ss:$0 sm:$0xff]  ;;  %s4835_s14 = smov 31  }
0x123b   :  { %v3461_v33 = vmul.f32 %v3441_v54, %v5606_v36 }
0x123c   :  { %v3421_v1 = vpop.f32.mrf.mxu2 }
0x123d   :  { %v6633_v45 = vsub.f32 %v3425_v9, %v3461_v33  ;;  %v3422_v6 = vadd.f32 %v4308_v10, %v3421_v1 }
0x123f   :  { %v3431_v50 = vadd.f32 %v3422_v6, %v6597_v61  ;;  %v3477_v32 = vmul.f32 %v6633_v45, %v6633_v45 }
0x1241   :  { %v3457_v40 = vsel %vm185_vm0, %v3431_v50, 0.0  ;;  %v3487_v18 = vsel %vm185_vm0, %v3477_v32, 0.0 }
0x1242   :  { %3458 = vadd.xlane.f32.xlu1 %v3457_v40  ;;  %3488 = vadd.xlane.f32.xlu2 %v3487_v18 }
0x1245   :  { %v3444_v34 = vpop.xlane.xlu0 %3443 }
0x1246   :  { %v3462_v24 = vmul.f32 %v3444_v34, %v5606_v36 }
0x1248   :  { %v6641_v59 = vsub.f32 %v3426_v53, %v3462_v24 }
0x124a   :  { %v3478_v46 = vmul.f32 %v6641_v59, %v6641_v59 }
0x124c   :  { %v3490_v35 = vsel %vm185_vm0, %v3478_v46, 0.0 }
0x124d   :  { %v3447_v61 = vpop.xlane.xlu2 %3446  ;;  %3491 = vadd.xlane.f32.xlu1 %v3490_v35 }
0x124e   :  { %v3463_v51 = vmul.f32 %v3447_v61, %v5606_v36 }
0x1250   :  { %v6647_v29 = vsub.f32 %v3427_v37, %v3463_v51 }
0x1252   :  { %v3479_v48 = vmul.f32 %v6647_v29, %v6647_v29 }
0x1254   :  { %v3493_v49 = vsel %vm185_vm0, %v3479_v48, 0.0 }
0x1255   :  { %3494 = vadd.xlane.f32.xlu0 %v3493_v49 }
0x125b   :  { %v3450_v15 = vpop.xlane.xlu1 %3449 }
0x125c   :  { %v3464_v52 = vmul.f32 %v3450_v15, %v5606_v36 }
0x125e   :  { %v6653_v17 = vsub.f32 %v3428_v55, %v3464_v52 }
0x1260   :  { %v3480_v62 = vmul.f32 %v6653_v17, %v6653_v17 }
0x1262   :  { %v3496_v57 = vsel %vm185_vm0, %v3480_v62, 0.0 }
0x1263   :  { %3497 = vadd.xlane.f32.xlu2 %v3496_v57  ;;  %v3453_v58 = vpop.xlane.xlu0 %3452 }
0x1264   :  { %v3465_v25 = vmul.f32 %v3453_v58, %v5606_v36 }
0x1266   :  { %v6659_v12 = vsub.f32 %v3429_v16, %v3465_v25 }
0x1268   :  { %v3481_v0 = vmul.f32 %v6659_v12, %v6659_v12 }
0x126a   :  { %v3499_v4 = vsel %vm185_vm0, %v3481_v0, 0.0 }
0x126b   :  { %3500 = vadd.xlane.f32.xlu1 %v3499_v4 }
0x12ad   :  { %v3456_v10 = vpop.xlane.xlu2 %3455  ;;  %v3486_v30 = vpop.xlane.xlu0 %3485 }
0x12ae   :  { %v3466_v23 = vmul.f32 %v3456_v10, %v5606_v36  ;;  %v3508_v11 = vmul.f32 %v3486_v30, %v5606_v36 }
0x12b0   :  { %v6666_v2 = vsub.f32 %v3430_v60, %v3466_v23  ;;  %v3516_v39 = vadd.f32 1e-05, %v3508_v11 }
0x12b2   :  { %4617 = vrsqrt.f32 %v3516_v39  ;;  %v3482_v19 = vmul.f32 %v6666_v2, %v6666_v2  ;;  %vm3530_vm10 = vweird.f32 %v3516_v39 }
0x12b4   :  { %v3502_v9 = vsel %vm185_vm0, %v3482_v19, 0.0 }
0x12b5   :  { %v3459_v14 = vpop.xlane.xlu1 %3458  ;;  %3503 = vadd.xlane.f32.xlu0 %v3502_v9  ;;  %v3489_v21 = vpop.xlane.xlu2 %3488 }
0x12b6   :  { %v3467_v63 = vmul.f32 %v3459_v14, %v5606_v36  ;;  %v3509_v53 = vmul.f32 %v3489_v21, %v5606_v36 }
0x12b8   :  { %v4618_v3 = vpop.eup %4617  ;;  %v6673_v22 = vsub.f32 %v3431_v50, %v3467_v63  ;;  %v3517_v31 = vadd.f32 1e-05, %v3509_v53 }
0x12b9   :  { %v3525_v37 = vmul.f32 %v4618_v3, %v3516_v39  ;;  %vm3531_vm9 = vweird.f32 %v4618_v3 }
0x12ba   :  { %4619 = vrsqrt.f32 %v3517_v31  ;;  %v3483_v42 = vmul.f32 %v6673_v22, %v6673_v22  ;;  %vm3532_vm11 = vmor %vm3530_vm10, %vm3531_vm9  ;;  %vm3540_vm13 = vweird.f32 %v3517_v31 }
0x12bb   :  { %v3526_v47 = vmul.f32 %v4618_v3, %v3525_v37 }
0x12bc   :  { %v3505_v26 = vsel %vm185_vm0, %v3483_v42, 0.0 }
0x12bd   :  { %v3527_v55 = vmul.f32 0.5, %v3526_v47  ;;  %3506 = vadd.xlane.f32.xlu2 %v3505_v26 }
0x12bf   :  { %v3528_v27 = vsub.f32 1.5, %v3527_v55 }
0x12c0   :  { %v4620_v41 = vpop.eup %4619  ;;  %v3492_v44 = vpop.xlane.xlu1 %3491 }
0x12c1   :  { %v3529_v20 = vmul.f32 %v4618_v3, %v3528_v27  ;;  %v3535_v16 = vmul.f32 %v4620_v41, %v3517_v31  ;;  %v3510_v13 = vmul.f32 %v3492_v44, %v5606_v36  ;;  %vm3541_vm12 = vweird.f32 %v4620_v41 }
0x12c2   :  { %vm3542_vm14 = vmor %vm3540_vm13, %vm3541_vm12 }
0x12c3   :  { %v3533_v43 = vsel %vm3532_vm11, %v4618_v3, %v3529_v20  ;;  %v3536_v5 = vmul.f32 %v4620_v41, %v3535_v16  ;;  %v3518_v28 = vadd.f32 1e-05, %v3510_v13 }
0x12c4   :  { %v3604_v60 = vmul.f32 %v3533_v43, %v6625_v8 }
0x12c5   :  { %v3537_v38 = vmul.f32 0.5, %v3536_v5  ;;  %4621 = vrsqrt.f32 %v3518_v28  ;;  %vm3550_vm2 = vweird.f32 %v3518_v28 }
0x12c6   :  { %v3615_v54 = vmul.f32 %v6679_v7, %v3604_v60 }
0x12c7   :  { %v3538_v33 = vsub.f32 1.5, %v3537_v38 }
0x12c8   :  { %v6689_v1 = vadd.f32 %v6685_v56, %v3615_v54  ;;  %v3495_v50 = vpop.xlane.xlu0 %3494 }
0x12c9   :  { %v3539_v6 = vmul.f32 %v4620_v41, %v3538_v33  ;;  %v3511_v8 = vmul.f32 %v3495_v50, %v5606_v36 }
0x12ca   :  { %3642 = vrot.lane.b32.xlu1 %v6689_v1, %s4834_s20 }
0x12cb   :  { %v3543_v32 = vsel %vm3542_vm14, %v4620_v41, %v3539_v6  ;;  %v4622_v40 = vpop.eup %4621  ;;  %v3519_v34 = vadd.f32 1e-05, %v3511_v8 }
0x12cc   :  { %v3605_v18 = vmul.f32 %v3543_v32, %v6633_v45  ;;  %v3545_v24 = vmul.f32 %v4622_v40, %v3518_v28  ;;  %vm3551_vm1 = vweird.f32 %v4622_v40 }
0x12cd   :  { %4623 = vrsqrt.f32 %v3519_v34  ;;  %vm3552_vm3 = vmor %vm3550_vm2, %vm3551_vm1  ;;  %vm3560_vm5 = vweird.f32 %v3519_v34 }
0x12ce   :  { %v3616_v46 = vmul.f32 %v6679_v7, %v3605_v18  ;;  %v3546_v35 = vmul.f32 %v4622_v40, %v3545_v24 }
0x12d0   :  { %v6697_v61 = vadd.f32 %v6685_v56, %v3616_v46  ;;  %v3547_v51 = vmul.f32 0.5, %v3546_v35 }
0x12d2   :  { %3644 = vrot.lane.b32.xlu0 %v6697_v61, %s4834_s20  ;;  %v3548_v48 = vsub.f32 1.5, %v3547_v51 }
0x12d3   :  { %v4624_v49 = vpop.eup %4623 }
0x12d4   :  { %v3549_v15 = vmul.f32 %v4622_v40, %v3548_v48  ;;  %v3555_v52 = vmul.f32 %v4624_v49, %v3519_v34  ;;  %vm3561_vm4 = vweird.f32 %v4624_v49 }
0x12d5   :  { %3666 = vrot.lane.b32.xlu2 %v6689_v1, %s4835_s14  ;;  %vm3562_vm15 = vmor %vm3560_vm5, %vm3561_vm4  ;;  %vm3690_vm4 = vcmask 252928   ;;  %vm3715_vm5 = vcmask 1046528  }
0x12d6   :  { %v3553_v45 = vsel %vm3552_vm3, %v4622_v40, %v3549_v15  ;;  %v3556_v62 = vmul.f32 %v4624_v49, %v3555_v52  ;;  %v3498_v57 = vpop.xlane.xlu2 %3497 }
0x12d7   :  { %v3606_v58 = vmul.f32 %v3553_v45, %v6641_v59  ;;  %v3512_v25 = vmul.f32 %v3498_v57, %v5606_v36 }
0x12d8   :  { %v3557_v0 = vmul.f32 0.5, %v3556_v62 }
0x12d9   :  { %v3520_v4 = vadd.f32 1e-05, %v3512_v25  ;;  %v3617_v10 = vmul.f32 %v6679_v7, %v3606_v58 }
0x12da   :  { %3668 = vrot.lane.b32.xlu0 %v6697_v61, %s4835_s14  ;;  %v3558_v30 = vsub.f32 1.5, %v3557_v0 }
0x12db   :  { %4625 = vrsqrt.f32 %v3520_v4  ;;  %v6709_v23 = vadd.f32 %v6685_v56, %v3617_v10  ;;  %vm3570_vm7 = vweird.f32 %v3520_v4 }
0x12dc   :  { %v3559_v11 = vmul.f32 %v4624_v49, %v3558_v30 }
0x12dd   :  { %3646 = vrot.lane.b32.xlu2 %v6709_v23, %s4834_s20  ;;  %3670 = vrot.lane.b32.xlu1 %v6709_v23, %s4835_s14 }
0x12de   :  { %v3563_v59 = vsel %vm3562_vm15, %v4624_v49, %v3559_v11  ;;  %v3501_v39 = vpop.xlane.xlu1 %3500 }
0x12df   :  { %v3607_v19 = vmul.f32 %v3563_v59, %v6647_v29  ;;  %v3513_v9 = vmul.f32 %v3501_v39, %v5606_v36 }
0x12e1   :  { %v4626_v14 = vpop.eup %4625  ;;  %v3521_v21 = vadd.f32 1e-05, %v3513_v9  ;;  %v3618_v63 = vmul.f32 %v6679_v7, %v3607_v19 }
0x12e2   :  { %v3565_v53 = vmul.f32 %v4626_v14, %v3520_v4  ;;  %vm3571_vm6 = vweird.f32 %v4626_v14 }
0x12e3   :  { %4627 = vrsqrt.f32 %v3521_v21  ;;  %v6719_v3 = vadd.f32 %v6685_v56, %v3618_v63  ;;  %vm3572_vm8 = vmor %vm3570_vm7, %vm3571_vm6  ;;  %vm3580_vm10 = vweird.f32 %v3521_v21 }
0x12e4   :  { %v3566_v31 = vmul.f32 %v4626_v14, %v3565_v53 }
0x12e5   :  { %3672 = vrot.lane.b32.xlu2 %v6719_v3, %s4835_s14  ;;  %3648 = vrot.lane.b32.xlu0 %v6719_v3, %s4834_s20 }
0x12e6   :  { %v3567_v37 = vmul.f32 0.5, %v3566_v31 }
0x12e8   :  { %v3568_v29 = vsub.f32 1.5, %v3567_v37 }
0x12e9   :  { %v4628_v42 = vpop.eup %4627 }
0x12ea   :  { %v3569_v47 = vmul.f32 %v4626_v14, %v3568_v29  ;;  %v3575_v26 = vmul.f32 %v4628_v42, %v3521_v21  ;;  %vm3581_vm9 = vweird.f32 %v4628_v42 }
0x12eb   :  { %vm3582_vm11 = vmor %vm3580_vm10, %vm3581_vm9 }
0x12ec   :  { %v3573_v55 = vsel %vm3572_vm8, %v4626_v14, %v3569_v47  ;;  %v3576_v27 = vmul.f32 %v4628_v42, %v3575_v26 }
0x12ed   :  { %v3608_v41 = vmul.f32 %v3573_v55, %v6653_v17 }
0x12ee   :  { %v3577_v20 = vmul.f32 0.5, %v3576_v27 }
0x12ef   :  { %v3619_v16 = vmul.f32 %v6679_v7, %v3608_v41 }
0x12f0   :  { %v3578_v44 = vsub.f32 1.5, %v3577_v20 }
0x12f1   :  { %v6728_v13 = vadd.f32 %v6685_v56, %v3619_v16 }
0x12f2   :  { %v3579_v43 = vmul.f32 %v4628_v42, %v3578_v44 }
0x12f3   :  { %3650 = vrot.lane.b32.xlu1 %v6728_v13, %s4834_s20  ;;  %3674 = vrot.lane.b32.xlu0 %v6728_v13, %s4835_s14 }
0x12f4   :  { %v3583_v5 = vsel %vm3582_vm11, %v4628_v42, %v3579_v43  ;;  %v6769_v42 = vld [vmem:[#allocation2 + $0x8] sm:$0xff]  ;;  %v3749_v43 = vld [vmem:[#allocation2] sm:$0xff] }
0x12f5   :  { %v3609_v17 = vmul.f32 %v3583_v5, %v6659_v12 }
0x12f7   :  { %v3620_v60 = vmul.f32 %v6679_v7, %v3609_v17 }
0x12f9   :  { %v6737_v28 = vadd.f32 %v6685_v56, %v3620_v60 }
0x12fb   :  { %3652 = vrot.lane.b32.xlu2 %v6737_v28, %s4834_s20 }
0x1328   :  { %v3504_v38 = vpop.xlane.xlu0 %3503 }
0x1329   :  { %v3514_v54 = vmul.f32 %v3504_v38, %v5606_v36 }
0x132b   :  { %v3522_v33 = vadd.f32 1e-05, %v3514_v54 }
0x132d   :  { %4629 = vrsqrt.f32 %v3522_v33  ;;  %vm3590_vm13 = vweird.f32 %v3522_v33 }
0x1330   :  { %v3507_v6 = vpop.xlane.xlu2 %3506 }
0x1331   :  { %v3515_v50 = vmul.f32 %v3507_v6, %v5606_v36 }
0x1333   :  { %v4630_v8 = vpop.eup %4629  ;;  %v3523_v32 = vadd.f32 1e-05, %v3515_v50 }
0x1334   :  { %v3585_v40 = vmul.f32 %v4630_v8, %v3522_v33  ;;  %vm3591_vm12 = vweird.f32 %v4630_v8 }
0x1335   :  { %4631 = vrsqrt.f32 %v3523_v32  ;;  %vm3592_vm14 = vmor %vm3590_vm13, %vm3591_vm12  ;;  %vm3600_vm2 = vweird.f32 %v3523_v32 }
0x1336   :  { %v3586_v12 = vmul.f32 %v4630_v8, %v3585_v40 }
0x1338   :  { %v3587_v18 = vmul.f32 0.5, %v3586_v12  ;;  %v3667_v57 = vpop.permute.xlu2 %3666 }
0x133a   :  { %v3588_v34 = vsub.f32 1.5, %v3587_v18 }
0x133b   :  { %v4632_v24 = vpop.eup %4631 }
0x133c   :  { %v3589_v46 = vmul.f32 %v4630_v8, %v3588_v34  ;;  %v3595_v35 = vmul.f32 %v4632_v24, %v3523_v32  ;;  %vm3601_vm1 = vweird.f32 %v4632_v24  ;;  %v3643_v0 = vpop.permute.xlu1 %3642 }
0x133d   :  { %vm3602_vm3 = vmor %vm3600_vm2, %vm3601_vm1 }
0x133e   :  { %v3593_v51 = vsel %vm3592_vm14, %v4630_v8, %v3589_v46  ;;  %v3596_v48 = vmul.f32 %v4632_v24, %v3595_v35 }
0x133f   :  { %v3610_v49 = vmul.f32 %v3593_v51, %v6666_v2 }
0x1340   :  { %v3597_v15 = vmul.f32 0.5, %v3596_v48  ;;  %v3647_v30 = vpop.permute.xlu2 %3646 }
0x1341   :  { %v3621_v36 = vmul.f32 %v6679_v7, %v3610_v49 }
0x1342   :  { %v3598_v52 = vsub.f32 1.5, %v3597_v15 }
0x1343   :  { %v6746_v45 = vadd.f32 %v6685_v56, %v3621_v36 }
0x1344   :  { %v3599_v62 = vmul.f32 %v4632_v24, %v3598_v52  ;;  %v3645_v2 = vpop.permute.xlu0 %3644 }
0x1345   :  { %3678 = vrot.lane.b32.xlu2 %v6746_v45, %s4835_s14  ;;  %3654 = vrot.lane.b32.xlu0 %v6746_v45, %s4834_s20 }
0x1346   :  { %v3603_v58 = vsel %vm3602_vm3, %v4632_v24, %v3599_v62 }
0x1347   :  { %v3611_v25 = vmul.f32 %v3603_v58, %v6673_v22 }
0x1348   :  { %v3673_v9 = vpop.permute.xlu2 %3672 }
0x1349   :  { %v3622_v4 = vmul.f32 %v6679_v7, %v3611_v25 }
0x134b   :  { %v3633_v10 = vadd.f32 %v6685_v56, %v3622_v4 }
0x134c   :  { %v3669_v11 = vpop.permute.xlu0 %3668 }
0x134d   :  { %3656 = vrot.lane.b32.xlu1 %v3633_v10, %s4834_s20  ;;  %3680 = vrot.lane.b32.xlu0 %v3633_v10, %s4835_s14  ;;  %v3692_v19 = vsel %vm3690_vm4, %v3645_v2, %v3669_v11 }
0x134e   :  { %v3700_v7 = vmax.f32 %v6697_v61, %v3692_v19  ;;  %v3691_v61 = vsel %vm3690_vm4, %v3643_v0, %v3667_v57 }
0x134f   :  { %v3671_v59 = vpop.permute.xlu1 %3670  ;;  %v3699_v41 = vmax.f32 %v6689_v1, %v3691_v61 }
0x1350   :  { %v3693_v39 = vsel %vm3690_vm4, %v3647_v30, %v3671_v59  ;;  %v3717_v63 = vrot.slane %v3700_v7, 1 }
0x1351   :  { %v3701_v22 = vmax.f32 %v6709_v23, %v3693_v39  ;;  %v3716_v17 = vrot.slane %v3699_v41, 1 }
0x1353   :  { %v3719_v14 = vrot.slane %v3701_v22, 1  ;;  %v3718_v33 = vsel %vm3715_vm5, %v3716_v17, %v3717_v63 }
0x1354   :  { %v3741_v6 = vmax.f32 %v3699_v41, %v3718_v33 }
0x1355   :  { %3676 = vrot.lane.b32.xlu1 %v6737_v28, %s4835_s14  ;;  %v3720_v31 = vsel %vm3715_vm5, %v3717_v63, %v3719_v14  ;;  %v3653_v40 = vpop.permute.xlu2 %3652 }
0x1356   :  { %v3742_v37 = vmax.f32 %v3700_v7, %v3720_v31  ;;  %v3751_v50 = vmul.f32 %v3749_v43, %v3741_v6 }
0x1357   :  { %v3649_v56 = vpop.permute.xlu0 %3648 }
0x1358   :  { %v3694_v21 = vsel %vm3690_vm4, %v3649_v56, %v3673_v9  ;;  %v6772_v23 = vmul.f32 %v6769_v42, %v3742_v37  ;;  %v3770_v8 = vmul.f32 %v3751_v50, %v3751_v50 }
0x1359   :  { %v6765_v53 = vmax.f32 %v6719_v3, %v3694_v21 }
0x135a   :  { %v3771_v20 = vmul.f32 %v6772_v23, %v6772_v23  ;;  %v3772_v32 = vsel %vm185_vm0, %v3770_v8, 0.0 }
0x135b   :  { %v3721_v29 = vrot.slane %v6765_v53, 1 }
0x135c   :  { %v3775_v60 = vsel %vm185_vm0, %v3771_v20, 0.0 }
0x135d   :  { %v3722_v55 = vsel %vm3715_vm5, %v3719_v14, %v3721_v29 }
0x135e   :  { %v3743_v16 = vmax.f32 %v3701_v22, %v3722_v55 }
0x1360   :  { %v3842_v38 = vmul.f32 %v3749_v43, %v3743_v16 }
0x1365   :  { %v3651_v47 = vpop.permute.xlu1 %3650  ;;  %v3675_v26 = vpop.permute.xlu0 %3674 }
0x1366   :  { %v3695_v27 = vsel %vm3690_vm4, %v3651_v47, %v3675_v26 }
0x1367   :  { %v3703_v3 = vmax.f32 %v6728_v13, %v3695_v27  ;;  %v3861_v13 = vmul.f32 %v3842_v38, %v3842_v38 }
0x1369   :  { %v3723_v44 = vrot.slane %v3703_v3, 1  ;;  %v3863_v1 = vsel %vm185_vm0, %v3861_v13, 0.0 }
0x136b   :  { %v3724_v5 = vsel %vm3715_vm5, %v3721_v29, %v3723_v44 }
0x136c   :  { %v3744_v54 = vmax.f32 %v6765_v53, %v3724_v5 }
0x136e   :  { %3776 = vadd.xlane.f32.xlu2 %v3775_v60  ;;  %v3843_v63 = vmul.f32 %v6769_v42, %v3744_v54 }
0x1370   :  { %v3862_v31 = vmul.f32 %v3843_v63, %v3843_v63 }
0x1372   :  { %v3866_v29 = vsel %vm185_vm0, %v3862_v31, 0.0 }
0x1376   :  { %3864 = vadd.xlane.f32.xlu2 %v3863_v1 }
0x137f   :  { %3773 = vadd.xlane.f32.xlu1 %v3772_v32 }
0x139f   :  { %v3679_v18 = vpop.permute.xlu2 %3678 }
0x13b7   :  { %v3655_v12 = vpop.permute.xlu0 %3654 }
0x13b8   :  { %v3697_v34 = vsel %vm3690_vm4, %v3655_v12, %v3679_v18 }
0x13b9   :  { %v3705_v35 = vmax.f32 %v6746_v45, %v3697_v34 }
0x13bb   :  { %v3727_v15 = vrot.slane %v3705_v35, 1 }
0x13bf   :  { %v3657_v24 = vpop.permute.xlu1 %3656  ;;  %v3681_v46 = vpop.permute.xlu0 %3680 }
0x13c0   :  { %v3698_v51 = vsel %vm3690_vm4, %v3657_v24, %v3681_v46 }
0x13c1   :  { %v3706_v48 = vmax.f32 %v3633_v10, %v3698_v51 }
0x13c3   :  { %v3729_v49 = vrot.slane %v3706_v48, 1 }
0x13c5   :  { %v3740_v36 = vsel %vm3715_vm5, %v3729_v49, %v3716_v17  ;;  %v3730_v62 = vsel %vm3715_vm5, %v3727_v15, %v3729_v49 }
0x13c6   :  { %v3748_v52 = vmax.f32 %v3706_v48, %v3740_v36  ;;  %v3747_v0 = vmax.f32 %v3705_v35, %v3730_v62 }
0x13c7   :  { %v3677_v57 = vpop.permute.xlu1 %3676 }
0x13c8   :  { %v3696_v58 = vsel %vm3690_vm4, %v3653_v40, %v3677_v57  ;;  %v3845_v2 = vmul.f32 %v6769_v42, %v3748_v52  ;;  %v3844_v59 = vmul.f32 %v3749_v43, %v3747_v0 }
0x13c9   :  { %v3704_v25 = vmax.f32 %v6737_v28, %v3696_v58 }
0x13ca   :  { %v3889_v4 = vmul.f32 %v3845_v2, %v3845_v2  ;;  %v3846_v56 = vmul.f32 %v3844_v59, %v3842_v38  ;;  %v3888_v37 = vmul.f32 %v3844_v59, %v3844_v59  ;;  %v3847_v27 = vmul.f32 %v3845_v2, %v3843_v63 }
0x13cb   :  { %v3725_v45 = vrot.slane %v3704_v25, 1 }
0x13cc   :  { %v3893_v30 = vsel %vm185_vm0, %v3889_v4, 0.0  ;;  %v3848_v53 = vsel %vm185_vm0, %v3846_v56, 0.0  ;;  %v3890_v61 = vsel %vm185_vm0, %v3888_v37, 0.0 }
0x13cd   :  { %v3728_v10 = vsel %vm3715_vm5, %v3725_v45, %v3727_v15  ;;  %3894 = vadd.xlane.f32.xlu2 %v3893_v30  ;;  %v3726_v11 = vsel %vm3715_vm5, %v3723_v44, %v3725_v45 }
0x13ce   :  { %v3746_v39 = vmax.f32 %v3704_v25, %v3728_v10  ;;  %v3745_v19 = vmax.f32 %v3703_v3, %v3726_v11  ;;  %v3851_v3 = vsel %vm185_vm0, %v3847_v27, 0.0 }
0x13d0   :  { %v3753_v22 = vmul.f32 %v3749_v43, %v3745_v19  ;;  %v3754_v7 = vmul.f32 %v6769_v42, %v3746_v39 }
0x13d2   :  { %v3797_v9 = vmul.f32 %v3753_v22, %v3753_v22  ;;  %v3798_v14 = vmul.f32 %v3754_v7, %v3754_v7  ;;  %v3755_v47 = vmul.f32 %v3753_v22, %v3751_v50  ;;  %v3756_v26 = vmul.f32 %v3754_v7, %v6772_v23 }
0x13d4   :  { %v3799_v28 = vsel %vm185_vm0, %v3797_v9, 0.0  ;;  %v3802_v21 = vsel %vm185_vm0, %v3798_v14, 0.0  ;;  %v3757_v55 = vsel %vm185_vm0, %v3755_v47, 0.0  ;;  %v3760_v42 = vsel %vm185_vm0, %v3756_v26, 0.0 }
0x13d5   :  { %3800 = vadd.xlane.f32.xlu0 %v3799_v28  ;;  %3803 = vadd.xlane.f32.xlu1 %v3802_v21 }
0x13d6   :  { %3849 = vadd.xlane.f32.xlu2 %v3848_v53 }
0x13dd   :  { %3867 = vadd.xlane.f32.xlu0 %v3866_v29  ;;  %3891 = vadd.xlane.f32.xlu1 %v3890_v61 }
0x13e1   :  { %v3777_v20 = vpop.xlane.xlu2 %3776 }
0x13e5   :  { %3758 = vadd.xlane.f32.xlu0 %v3757_v55  ;;  %3761 = vadd.xlane.f32.xlu1 %v3760_v42 }
0x13e9   :  { %v3865_v23 = vpop.xlane.xlu2 %3864 }
0x13ed   :  { %3852 = vadd.xlane.f32.xlu0 %v3851_v3 }
0x13f2   :  { %v3774_v41 = vpop.xlane.xlu1 %3773 }
0x13f3   :  { %v3778_v16 = vadd.f32 %v3777_v20, %v3774_v41 }
0x13f5   :  { %v3779_v44 = vrot.slane %v3778_v16, 4 }
0x13f7   :  { %v3780_v43 = vadd.f32 %v3779_v44, %v3778_v16 }
0x13f9   :  { %v3781_v5 = vrot.slane %v3780_v43, 2 }
0x13fb   :  { %v3782_v17 = vadd.f32 %v3781_v5, %v3780_v43 }
0x13fd   :  { %v3783_v60 = vrot.slane %v3782_v17, 1 }
0x13ff   :  { %v3784_v38 = vadd.f32 %v3783_v60, %v3782_v17 }
0x1401   :  { %4633 = vrsqrt.f32 %v3784_v38  ;;  %vm3792_vm0 = vcmp.eq.f32.partialorder %v3784_v38, inf  ;;  %v3795_v31 = vand.u32 2147483648, %v3784_v38  ;;  %vm3794_vm15 = vcmp.eq.f32.partialorder %v3784_v38, 0.0 }
0x1407   :  { %v4634_v6 = vpop.eup %4633 }
0x1408   :  { %v3786_v8 = vmul.f32 %v4634_v6, %v3784_v38 }
0x140a   :  { %v3787_v35 = vmul.f32 %v4634_v6, %v3786_v8 }
0x140c   :  { %v3788_v62 = vmul.f32 0.5, %v3787_v35 }
0x140e   :  { %v3789_v25 = vsub.f32 1.5, %v3788_v62 }
0x1410   :  { %v3790_v11 = vmul.f32 %v4634_v6, %v3789_v25 }
0x1412   :  { %v3791_v22 = vmul.f32 %v3790_v11, %v3784_v38 }
0x1414   :  { %v3793_v53 = vsel %vm3792_vm0, %v3784_v38, %v3791_v22  ;;  %vm3933_vm0 = vcmask 1040384  }
0x1415   :  { %v3796_v55 = vsel %vm3794_vm15, %v3795_v31, %v3793_v53  ;;  %vm3935_vm15 = vcmask 1024  }
0x1416   :  { %v3824_v44 = vmax.f32 %v3796_v55, 1e-08 }
0x1440   :  { %v3895_v32 = vpop.xlane.xlu2 %3894 }
0x1448   :  { %v3804_v54 = vpop.xlane.xlu1 %3803  ;;  %v3801_v33 = vpop.xlane.xlu0 %3800 }
0x1449   :  { %v3805_v13 = vadd.f32 %v3804_v54, %v3801_v33 }
0x144b   :  { %v3806_v1 = vrot.slane %v3805_v13, 4 }
0x144d   :  { %v3807_v50 = vadd.f32 %v3806_v1, %v3805_v13 }
0x144f   :  { %v3808_v40 = vrot.slane %v3807_v50, 2 }
0x1450   :  { %v3892_v12 = vpop.xlane.xlu1 %3891  ;;  %v3868_v18 = vpop.xlane.xlu0 %3867 }
0x1451   :  { %v3809_v34 = vadd.f32 %v3808_v40, %v3807_v50  ;;  %v3896_v24 = vadd.f32 %v3895_v32, %v3892_v12  ;;  %v3869_v46 = vadd.f32 %v3868_v18, %v3865_v23  ;;  %v3850_v23 = vpop.xlane.xlu2 %3849 }
0x1453   :  { %v3810_v51 = vrot.slane %v3809_v34, 1  ;;  %v3897_v48 = vrot.slane %v3896_v24, 4  ;;  %v3870_v49 = vrot.slane %v3869_v46, 4 }
0x1455   :  { %v3811_v15 = vadd.f32 %v3810_v51, %v3809_v34  ;;  %v3898_v36 = vadd.f32 %v3897_v48, %v3896_v24  ;;  %v3871_v52 = vadd.f32 %v3870_v49, %v3869_v46 }
0x1457   :  { %4635 = vrsqrt.f32 %v3811_v15  ;;  %v3899_v57 = vrot.slane %v3898_v36, 2  ;;  %v3872_v58 = vrot.slane %v3871_v52, 2  ;;  %vm3819_vm6 = vcmp.eq.f32.partialorder %v3811_v15, inf }
0x1458   :  { %v3759_v56 = vpop.xlane.xlu0 %3758  ;;  %v3822_v47 = vand.u32 2147483648, %v3811_v15  ;;  %v3762_v27 = vpop.xlane.xlu1 %3761  ;;  %vm3821_vm7 = vcmp.eq.f32.partialorder %v3811_v15, 0.0 }
0x1459   :  { %v3900_v2 = vadd.f32 %v3899_v57, %v3898_v36  ;;  %v3873_v0 = vadd.f32 %v3872_v58, %v3871_v52  ;;  %v3763_v60 = vadd.f32 %v3762_v27, %v3759_v56 }
0x145b   :  { %v3901_v4 = vrot.slane %v3900_v2, 1  ;;  %v3874_v45 = vrot.slane %v3873_v0, 1  ;;  %v3764_v8 = vrot.slane %v3763_v60, 4 }
0x145d   :  { %v4636_v30 = vpop.eup %4635  ;;  %v3902_v10 = vadd.f32 %v3901_v4, %v3900_v2  ;;  %v3875_v39 = vadd.f32 %v3874_v45, %v3873_v0  ;;  %v3765_v49 = vadd.f32 %v3764_v8, %v3763_v60 }
0x145e   :  { %v3813_v59 = vmul.f32 %v4636_v30, %v3811_v15 }
0x145f   :  { %4637 = vrsqrt.f32 %v3902_v10  ;;  %vm3910_vm8 = vcmp.eq.f32.partialorder %v3902_v10, inf  ;;  %v3913_v1 = vand.u32 2147483648, %v3902_v10  ;;  %vm3883_vm9 = vcmp.eq.f32.partialorder %v3875_v39, inf }
0x1460   :  { %v3814_v19 = vmul.f32 %v4636_v30, %v3813_v59  ;;  %4639 = vrsqrt.f32 %v3875_v39  ;;  %v3853_v5 = vpop.xlane.xlu0 %3852  ;;  %v3886_v32 = vand.u32 2147483648, %v3875_v39  ;;  %vm3912_vm10 = vcmp.eq.f32.partialorder %v3902_v10, 0.0 }
0x1461   :  { %v3854_v13 = vadd.f32 %v3853_v5, %v3850_v23  ;;  %vm3885_vm11 = vcmp.eq.f32.partialorder %v3875_v39, 0.0  ;;  %v3766_v62 = vrot.slane %v3765_v49, 2 }
0x1462   :  { %v3815_v7 = vmul.f32 0.5, %v3814_v19 }
0x1463   :  { %v3855_v34 = vrot.slane %v3854_v13, 4  ;;  %v3767_v25 = vadd.f32 %v3766_v62, %v3765_v49 }
0x1464   :  { %v3816_v9 = vsub.f32 1.5, %v3815_v7 }
0x1465   :  { %v4638_v14 = vpop.eup %4637  ;;  %v3856_v36 = vadd.f32 %v3855_v34, %v3854_v13  ;;  %v3768_v59 = vrot.slane %v3767_v25, 1 }
0x1466   :  { %v4640_v28 = vpop.eup %4639  ;;  %v3817_v21 = vmul.f32 %v4636_v30, %v3816_v9  ;;  %v3904_v63 = vmul.f32 %v4638_v14, %v3902_v10 }
0x1467   :  { %v3877_v37 = vmul.f32 %v4640_v28, %v3875_v39  ;;  %v3857_v57 = vrot.slane %v3856_v36, 2 }
0x1468   :  { %v3818_v29 = vmul.f32 %v3817_v21, %v3811_v15  ;;  %v3905_v61 = vmul.f32 %v4638_v14, %v3904_v63  ;;  %v3769_v63 = vadd.f32 %v3768_v59, %v3767_v25 }
0x1469   :  { %v3878_v26 = vmul.f32 %v4640_v28, %v3877_v37  ;;  %v3858_v0 = vadd.f32 %v3857_v57, %v3856_v36 }
0x146a   :  { %v3906_v42 = vmul.f32 0.5, %v3905_v61  ;;  %v3820_v3 = vsel %vm3819_vm6, %v3811_v15, %v3818_v29 }
0x146b   :  { %v3879_v41 = vmul.f32 0.5, %v3878_v26  ;;  %v3823_v20 = vsel %vm3821_vm7, %v3822_v47, %v3820_v3  ;;  %v3859_v19 = vrot.slane %v3858_v0, 1 }
0x146c   :  { %v3907_v16 = vsub.f32 1.5, %v3906_v42  ;;  %v3825_v43 = vmax.f32 %v3823_v20, 1e-08 }
0x146d   :  { %v3880_v17 = vsub.f32 1.5, %v3879_v41  ;;  %v3860_v31 = vadd.f32 %v3859_v19, %v3858_v0 }
0x146e   :  { %v3908_v54 = vmul.f32 %v4638_v14, %v3907_v16  ;;  %v3826_v33 = vmul.f32 %v3825_v43, %v3824_v44 }
0x146f   :  { %v3881_v38 = vmul.f32 %v4640_v28, %v3880_v17 }
0x1470   :  { %v3909_v6 = vmul.f32 %v3908_v54, %v3902_v10  ;;  %4641 = vrcp.f32 %v3826_v33  ;;  %v3838_v30 = vand.u32 2147483648, %v3826_v33  ;;  %vm3832_vm13 = vweird.f32 %v3826_v33 }
0x1471   :  { %v3882_v50 = vmul.f32 %v3881_v38, %v3875_v39 }
0x1472   :  { %v3911_v40 = vsel %vm3910_vm8, %v3902_v10, %v3909_v6  ;;  %v3836_v10 = vand.u32 2147483647, %v3826_v33  ;;  %v3839_v9 = vor.u32 1.1754944e-38, %v3838_v30 }
0x1473   :  { %v3884_v12 = vsel %vm3883_vm9, %v3875_v39, %v3882_v50  ;;  %v3914_v18 = vsel %vm3912_vm10, %v3913_v1, %v3911_v40 }
0x1474   :  { %v3887_v24 = vsel %vm3885_vm11, %v3886_v32, %v3884_v12  ;;  %v3916_v46 = vmax.f32 %v3914_v18, 1e-08  ;;  %vm3837_vm2 = vcmp.eq.f32.partialorder %v3836_v10, 8.507059e+37 }
0x1475   :  { %v3915_v35 = vmax.f32 %v3887_v24, 1e-08 }
0x1476   :  { %v4642_v51 = vpop.eup %4641 }
0x1477   :  { %v3828_v48 = vmul.f32 %v4642_v51, %v3826_v33  ;;  %v3917_v15 = vmul.f32 %v3916_v46, %v3915_v35  ;;  %vm3833_vm12 = vweird.f32 %v4642_v51 }
0x1478   :  { %vm3834_vm14 = vmor %vm3832_vm13, %vm3833_vm12 }
0x1479   :  { %v3829_v52 = vsub.f32 1.0, %v3828_v48  ;;  %4643 = vrcp.f32 %v3917_v15  ;;  %v3929_v39 = vand.u32 2147483648, %v3917_v15  ;;  %v3927_v56 = vand.u32 2147483647, %v3917_v15 }
0x147a   :  { %vm3923_vm3 = vweird.f32 %v3917_v15 }
0x147b   :  { %v3830_v58 = vmul.f32 %v4642_v51, %v3829_v52  ;;  %v3930_v21 = vor.u32 1.1754944e-38, %v3929_v39  ;;  %vm3928_vm5 = vcmp.eq.f32.partialorder %v3927_v56, 8.507059e+37 }
0x147d   :  { %v3831_v4 = vadd.f32 %v4642_v51, %v3830_v58 }
0x147f   :  { %v4644_v2 = vpop.eup %4643  ;;  %v3835_v22 = vsel %vm3834_vm14, %v4642_v51, %v3831_v4 }
0x1480   :  { %v3919_v45 = vmul.f32 %v4644_v2, %v3917_v15  ;;  %vm3924_vm1 = vweird.f32 %v4644_v2  ;;  %v3840_v28 = vsel %vm3837_vm2, %v3839_v9, %v3835_v22 }
0x1481   :  { %vm3925_vm4 = vmor %vm3923_vm3, %vm3924_vm1  ;;  %v3841_v29 = vmul.f32 %v3840_v28, %v3769_v63 }
0x1482   :  { %v3920_v11 = vsub.f32 1.0, %v3919_v45 }
0x1484   :  { %v3921_v7 = vmul.f32 %v4644_v2, %v3920_v11 }
0x1486   :  { %v3922_v14 = vadd.f32 %v4644_v2, %v3921_v7 }
0x1488   :  { %v3926_v53 = vsel %vm3925_vm4, %v4644_v2, %v3922_v14 }
0x1489   :  { %v3931_v37 = vsel %vm3928_vm5, %v3930_v21, %v3926_v53 }
0x148a   :  { %v3932_v61 = vmul.f32 %v3931_v37, %v3860_v31 }
0x148c   :  { %v3934_v47 = vsel %vm3933_vm0, %v3841_v29, %v3932_v61 }
0x148d   :  { %3936 = vst.msk [vmem:[%s6827_s15] sm:$0x3] %vm3935_vm15, %v3934_v47 }
0x148e   :  { %3941 = vsyncpa [#allocation3], 1 }
0x148f   :  { %3942 = vsyncpa [#allocation5], 1 }
0x1490   :  { %3943 = vsyncpa [#allocation8], 1 }
0x1491   :  { %3944 = vsyncpa [#allocation11], 1 }

</bundles_post_ra>
